<compile_context>
chip_gen: v7x
topology: tpu7x:2x2x1
jax: 0.10.0
libtpu: 0.0.40
codegen_flags: <defaults>
</compile_context>

<pallas_src>
import functools

import numpy as np
import jax
import jax.numpy as jnp
from jax.experimental import pallas as pl
from jax.experimental.pallas import tpu as pltpu

KERNEL_SIZE = 11
SIGMA = 1.5
PAD = (KERNEL_SIZE - 1) // 2
K1 = 0.01
K2 = 0.03


# ----------------------------- parameter setup ------------------------------
def _gaussian_1d():
    dist = np.arange(KERNEL_SIZE, dtype=np.float64) - (KERNEL_SIZE - 1) / 2.0
    g = np.exp(-0.5 * (dist / SIGMA) ** 2)
    return g / g.sum()


@functools.lru_cache(maxsize=None)
def _toeplitz(n):
    # Unfolded (n, n + K - 1) band matrix (used only by the pure-JAX reference).
    g = _gaussian_1d().astype(np.float32)
    m = np.zeros((n, n + KERNEL_SIZE - 1), dtype=np.float32)
    for i in range(n):
        m[i, i : i + KERNEL_SIZE] = g
    return m


@functools.lru_cache(maxsize=None)
def _folded_toeplitz(n):
    # (n, n) blur matrix with the reflect padding folded in:
    #   blur(x)[i] = sum_tap g[tap] * x[reflect(i + tap - PAD)]
    g = _gaussian_1d()
    m = np.zeros((n, n), dtype=np.float64)
    for out_i in range(n):
        for tap in range(KERNEL_SIZE):
            src = out_i + tap - PAD
            if src < 0:
                src = -src
            elif src > n - 1:
                src = 2 * (n - 1) - src
            m[out_i, src] += g[tap]
    return m.astype(np.float32)


@functools.lru_cache(maxsize=None)
def _crop_mask(H, W):
    m = np.zeros((H, W), dtype=np.float32)
    m[PAD : H - PAD, PAD : W - PAD] = 1.0
    return m


def unpatchify(x, p):
    # x: [N, L, p*p*3] -> [N, 3, h*p, w*p]   (MAE convention)
    N, L, _ = x.shape
    h = w = int(round(L ** 0.5))
    x = x.reshape(N, h, w, p, p, 3)
    x = jnp.einsum("nhwpqc->nchpwq", x)
    return x.reshape(N, 3, h * p, w * p)


# ------------------------------ Pallas kernel -------------------------------
def _ssim_block_kernel(*refs, B, H, W, NC, with_mask):
    # refs (with_mask):  p, t, m, kh, kwt, corr, crop, c12(SMEM), out
    # refs (no mask):    p, t,    kh, kwt, corr, crop, c12(SMEM), out
    if with_mask:
        p_ref, t_ref, m_ref, kh_ref, kwt_ref, corr_ref, crop_ref, c_ref, out_ref = refs
    else:
        p_ref, t_ref, kh_ref, kwt_ref, corr_ref, crop_ref, c_ref, out_ref = refs

    i = pl.program_id(0)

    p = p_ref[...]                       # (B, H, W) f32
    t = t_ref[...]
    if with_mask:
        m = m_ref[...]
        p = p * m
        t = t * m

    # Fused blur inputs; elementwise products in f32, matmul operands in bf16.
    parts = (p, t, p * p, t * t, p * t)
    stack = jnp.concatenate([q.astype(jnp.bfloat16) for q in parts], axis=0)  # (5B,H,W)

    kh = kh_ref[...]                     # (H, H)  bf16, reflect-folded
    kwt = kwt_ref[...]                   # (W, W)  bf16, reflect-folded, pre-transposed

    # Stage 1: blur along W -> one (5*B*H, W) x (W, W) MXU matmul, f32 accumulate.
    y = jnp.dot(stack.reshape(5 * B * H, W), kwt,
                preferred_element_type=jnp.float32)
    y = y.astype(jnp.bfloat16).reshape(5 * B, H, W)

    # Stage 2: blur along H -> one batched MXU matmul over the fused stack.
    khb = jnp.broadcast_to(kh, (5 * B, H, H))
    z = jax.lax.dot_general(
        khb, y,
        dimension_numbers=(((2,), (1,)), ((0,), (0,))),
        preferred_element_type=jnp.float32)                 # (5B, H, W) f32

    # f32 correction of the bf16 rounding of the blur-weight row sums.
    z = z * corr_ref[...][None, :, :]

    mu_p = z[0 * B : 1 * B]
    mu_t = z[1 * B : 2 * B]
    e_pp = z[2 * B : 3 * B]
    e_tt = z[3 * B : 4 * B]
    e_pt = z[4 * B : 5 * B]

    c1 = c_ref[0]
    c2 = c_ref[1]

    mu_pp = mu_p * mu_p
    mu_tt = mu_t * mu_t
    mu_pt = mu_p * mu_t
    sig_p = e_pp - mu_pp
    sig_t = e_tt - mu_tt
    sig_pt = e_pt - mu_pt

    num = (2.0 * mu_pt + c1) * (2.0 * sig_pt + c2)
    den = (mu_pp + mu_tt + c1) * (sig_p + sig_t + c2)
    ssim_map = num * pl.reciprocal(den, approx=False)       # EUP reciprocal

    # Border crop as a full-tile mask multiply; also mask out padding planes.
    valid = (jax.lax.broadcasted_iota(jnp.int32, (B, 1, 1), 0)
             < (NC - i * B)).astype(jnp.float32)
    blk_sum = jnp.sum(ssim_map * crop_ref[...][None, :, :] * valid)

    # Lane-dense per-block partial sum (disjoint per grid step -> parallel grid).
    out_ref[...] = jnp.broadcast_to(blk_sum, (1, 8, 128))


def _choose_plane_block(nc, H, W):
    # Rough per-plane VMEM footprint of the kernel body (bytes); budget leaves
    # headroom for double-buffered inputs on v7x (64 MiB physical VMEM).
    budget = 20 * 1024 * 1024
    per_plane = 120 * H * W + 10 * H * H
    bmax = int(max(1, min(nc, budget // per_plane, 64)))
    for b in range(bmax, max(0, bmax // 2), -1):   # prefer a divisor -> no padding
        if nc % b == 0:
            return b
    return bmax


def _ssim_sum_pallas(p_planes, t_planes, m_planes, kh_bf, kwt_bf, corr, crop,
                     c12, *, NC, B, H, W):
    nblk = p_planes.shape[0] // B
    kernel = functools.partial(_ssim_block_kernel, B=B, H=H, W=W, NC=NC,
                               with_mask=m_planes is not None)

    plane_spec = pl.BlockSpec((B, H, W), lambda i: (i, 0, 0))
    in_specs = [plane_spec, plane_spec]
    operands = [p_planes, t_planes]
    if m_planes is not None:
        in_specs.append(plane_spec)
        operands.append(m_planes)
    in_specs += [
        pl.BlockSpec((H, H), lambda i: (0, 0)),
        pl.BlockSpec((W, W), lambda i: (0, 0)),
        pl.BlockSpec((H, W), lambda i: (0, 0)),
        pl.BlockSpec((H, W), lambda i: (0, 0)),
        pl.BlockSpec(memory_space=pltpu.MemorySpace.SMEM),
    ]
    operands += [kh_bf, kwt_bf, corr, crop, c12]

    out = pl.pallas_call(
        kernel,
        out_shape=jax.ShapeDtypeStruct((nblk, 8, 128), jnp.float32),
        grid=(nblk,),
        in_specs=in_specs,
        out_specs=pl.BlockSpec((1, 8, 128), lambda i: (i, 0, 0)),
        compiler_params=pltpu.CompilerParams(
            dimension_semantics=("parallel",),
            vmem_limit_bytes=64 * 1024 * 1024,
        ),
    )(*operands)
    return out[:, 0, 0].sum()


def ssim_pallas(pred, target, mask=None):
    """pred/target: [N, C, H, W]; mask: optional [N, C, H, W] -> scalar mean SSIM."""
    N, C, H, W = pred.shape
    pred = pred.astype(jnp.float32)
    target = target.astype(jnp.float32)
    NC = N * C

    p_planes = pred.reshape(NC, H, W)
    t_planes = target.reshape(NC, H, W)
    m_planes = None if mask is None else mask.astype(jnp.float32).reshape(NC, H, W)

    # TODO(synk): global data_range (min/max over the full masked tensors) is an
    # inherently two-pass dependency; kept as fused XLA reductions in the wrapper.
    if m_planes is None:
        data_range = jnp.maximum(pred.max() - pred.min(),
                                 target.max() - target.min())
    else:
        pm = p_planes * m_planes
        tm = t_planes * m_planes
        data_range = jnp.maximum(pm.max() - pm.min(), tm.max() - tm.min())
    c1 = (K1 * data_range) ** 2
    c2 = (K2 * data_range) ** 2
    c12 = jnp.stack([c1, c2]).astype(jnp.float32)

    # Reflect padding folded into the blur matrices; bf16 operands for the MXU.
    kh_f = _folded_toeplitz(H)
    kw_f = _folded_toeplitz(W)
    kh_bf = jnp.asarray(kh_f).astype(jnp.bfloat16)          # (H, H)
    kwt_bf = jnp.asarray(kw_f.T).astype(jnp.bfloat16)       # (W, W), pre-transposed
    corr = ((1.0 / kh_bf.astype(jnp.float32).sum(axis=1))[:, None]
            * (1.0 / kwt_bf.astype(jnp.float32).sum(axis=0))[None, :]
            ).astype(jnp.float32)
    crop = jnp.asarray(_crop_mask(H, W))

    B = _choose_plane_block(NC, H, W)
    nblk = -(-NC // B)
    NC_pad = nblk * B
    if NC_pad != NC:
        pad = ((0, NC_pad - NC), (0, 0), (0, 0))
        p_planes = jnp.pad(p_planes, pad)
        t_planes = jnp.pad(t_planes, pad)
        if m_planes is not None:
            m_planes = jnp.pad(m_planes, pad)

    total = _ssim_sum_pallas(p_planes, t_planes, m_planes, kh_bf, kwt_bf,
                             corr, crop, c12, NC=NC, B=B, H=H, W=W)
    count = NC * (H - 2 * PAD) * (W - 2 * PAD)
    return total / count


# ------------------------------- the module ---------------------------------
class TargetSSIM:
    def __init__(self, patch_size=16, ignore_mask=False):
        self.patch_size = patch_size
        self.ignore_mask = ignore_mask

    def __call__(self, imgs, pred, mask=None):
        """
        imgs: [N, 3, H, W]; pred: [N, 3, H, W] or [N, L, 3*p*p]; mask: [N, L]
        """
        if pred.ndim == 3:
            pred = unpatchify(pred, self.patch_size)
        target = imgs
        if mask is None or self.ignore_mask:
            return 1.0 - ssim_pallas(pred, target)
        p = self.patch_size
        m = jnp.broadcast_to(
            mask[:, :, None].astype(jnp.float32),
            (mask.shape[0], mask.shape[1], 3 * p * p),
        )
        m = unpatchify(m, p)           # (N, 3, H, W), applied inside the kernel
        return 1.0 - ssim_pallas(pred, target, mask=m)


# ----------------------------- pure-JAX reference ---------------------------
def _ssim_reference(pred, target):
    N, C, H, W = pred.shape
    dr = jnp.maximum(pred.max() - pred.min(), target.max() - target.min())
    c1 = (K1 * dr) ** 2
    c2 = (K2 * dr) ** 2
    kh = jnp.asarray(_toeplitz(H))
    kw = jnp.asarray(_toeplitz(W))

    def blur(x):
        xp = jnp.pad(x, ((0, 0), (0, 0), (PAD, PAD), (PAD, PAD)), mode="reflect")
        return jnp.einsum(
            "hi,ncij,wj->nchw", kh, xp, kw, precision=jax.lax.Precision.HIGHEST
        )

    mu_p, mu_t = blur(pred), blur(target)
    e_pp, e_tt, e_pt = blur(pred * pred), blur(target * target), blur(pred * target)
    mu_pp, mu_tt, mu_pt = mu_p * mu_p, mu_t * mu_t, mu_p * mu_t
    sig_p, sig_t, sig_pt = e_pp - mu_pp, e_tt - mu_tt, e_pt - mu_pt
    num = (2 * mu_pt + c1) * (2 * sig_pt + c2)
    den = (mu_pp + mu_tt + c1) * (sig_p + sig_t + c2)
    ssim_map = num / den
    crop = ssim_map[..., PAD : H - PAD, PAD : W - PAD]
    return crop.mean()


# ----------------------------------- main ------------------------------------
if __name__ == "__main__":
    key = jax.random.PRNGKey(0)
    k1, k2, k3 = jax.random.split(key, 3)

    N, C, H, W = 2, 3, 32, 32
    patch = 16
    L = (H // patch) * (W // patch)

    imgs = jax.random.uniform(k1, (N, C, H, W), jnp.float32)
    pred = jax.random.uniform(k2, (N, C, H, W), jnp.float32)
    mask = (jax.random.uniform(k3, (N, L)) > 0.5).astype(jnp.float32)

    model = TargetSSIM(patch_size=patch, ignore_mask=False)
    loss = model(imgs, pred, mask)
    loss = jax.block_until_ready(loss)

    # sanity check vs pure-JAX f32 reference (same masking path)
    m = jnp.broadcast_to(mask[:, :, None], (N, L, 3 * patch * patch))
    m = unpatchify(m, patch)
    ref_loss = 1.0 - _ssim_reference(pred * m, imgs * m)
    assert jnp.allclose(loss, ref_loss, rtol=2e-3, atol=2e-3), (loss, ref_loss)

    # also exercise the no-mask path
    loss_nomask = jax.block_until_ready(model(imgs, pred, None))
    ref_nomask = 1.0 - _ssim_reference(pred, imgs)
    assert jnp.allclose(loss_nomask, ref_nomask, rtol=2e-3, atol=2e-3), (
        loss_nomask, ref_nomask)

    print("KERNEL_OK")
</pallas_src>

<mosaic_0001>
module attributes {stable_mosaic.version = 11 : i64} {
  func.func @_ssim_block_kernel(%arg0: i32, %arg1: memref<6x32x32xf32, #tpu.memory_space<vmem>>, %arg2: memref<6x32x32xf32, #tpu.memory_space<vmem>>, %arg3: memref<6x32x32xf32, #tpu.memory_space<vmem>>, %arg4: memref<32x32xbf16, #tpu.memory_space<vmem>>, %arg5: memref<32x32xbf16, #tpu.memory_space<vmem>>, %arg6: memref<32x32xf32, #tpu.memory_space<vmem>>, %arg7: memref<32x32xf32, #tpu.memory_space<vmem>>, %arg8: memref<2xf32, #tpu.memory_space<smem>>, %arg9: memref<1x8x128xf32, #tpu.memory_space<vmem>>) attributes {dimension_semantics = [#tpu.dimension_semantics<parallel>], iteration_bounds = array<i64: 1>, scalar_prefetch = 0 : i64, scratch_operands = 0 : i64, tpu.core_type = #tpu.core_type<tc>, window_params = [{transform_indices = @transform_0, window_bounds = array<i64: 6, 32, 32>}, {transform_indices = @transform_1, window_bounds = array<i64: 6, 32, 32>}, {transform_indices = @transform_2, window_bounds = array<i64: 6, 32, 32>}, {pipeline_mode = #tpu.pipeline_mode<synchronous>, transform_indices = @transform_3, window_bounds = array<i64: 32, 32>}, {pipeline_mode = #tpu.pipeline_mode<synchronous>, transform_indices = @transform_4, window_bounds = array<i64: 32, 32>}, {pipeline_mode = #tpu.pipeline_mode<synchronous>, transform_indices = @transform_5, window_bounds = array<i64: 32, 32>}, {pipeline_mode = #tpu.pipeline_mode<synchronous>, transform_indices = @transform_6, window_bounds = array<i64: 32, 32>}, {transform_indices = @transform_7, window_bounds = array<i64: 2>}, {transform_indices = @transform_8, window_bounds = array<i64: 1, 8, 128>}]} {
    %c0 = arith.constant 0 : index
    %c0_0 = arith.constant 0 : index
    %c0_1 = arith.constant 0 : index
    %0 = vector.load %arg1[%c0, %c0_0, %c0_1] : memref<6x32x32xf32, #tpu.memory_space<vmem>>, vector<6x32x32xf32>
    %c0_2 = arith.constant 0 : index
    %c0_3 = arith.constant 0 : index
    %c0_4 = arith.constant 0 : index
    %1 = vector.load %arg2[%c0_2, %c0_3, %c0_4] : memref<6x32x32xf32, #tpu.memory_space<vmem>>, vector<6x32x32xf32>
    %c0_5 = arith.constant 0 : index
    %c0_6 = arith.constant 0 : index
    %c0_7 = arith.constant 0 : index
    %2 = vector.load %arg3[%c0_5, %c0_6, %c0_7] : memref<6x32x32xf32, #tpu.memory_space<vmem>>, vector<6x32x32xf32>
    %3 = arith.mulf %0, %2 : vector<6x32x32xf32>
    %4 = arith.mulf %1, %2 : vector<6x32x32xf32>
    %5 = arith.mulf %3, %3 : vector<6x32x32xf32>
    %6 = arith.mulf %4, %4 : vector<6x32x32xf32>
    %7 = arith.mulf %3, %4 : vector<6x32x32xf32>
    %8 = arith.truncf %3 : vector<6x32x32xf32> to vector<6x32x32xbf16>
    %9 = arith.truncf %4 : vector<6x32x32xf32> to vector<6x32x32xbf16>
    %10 = arith.truncf %5 : vector<6x32x32xf32> to vector<6x32x32xbf16>
    %11 = arith.truncf %6 : vector<6x32x32xf32> to vector<6x32x32xbf16>
    %12 = arith.truncf %7 : vector<6x32x32xf32> to vector<6x32x32xbf16>
    %13 = tpu.concatenate %8, %9, %10, %11, %12 in 0 : vector<6x32x32xbf16>, vector<6x32x32xbf16>, vector<6x32x32xbf16>, vector<6x32x32xbf16>, vector<6x32x32xbf16> -> vector<30x32x32xbf16>
    %c0_8 = arith.constant 0 : index
    %c0_9 = arith.constant 0 : index
    %14 = vector.load %arg4[%c0_8, %c0_9] : memref<32x32xbf16, #tpu.memory_space<vmem>>, vector<32x32xbf16>
    %c0_10 = arith.constant 0 : index
    %c0_11 = arith.constant 0 : index
    %15 = vector.load %arg5[%c0_10, %c0_11] : memref<32x32xbf16, #tpu.memory_space<vmem>>, vector<32x32xbf16>
    %16 = vector.shape_cast %13 : vector<30x32x32xbf16> to vector<960x32xbf16>
    %cst = arith.constant dense<0.000000e+00> : vector<960x32xf32>
    %17 = tpu.matmul %16, %15, %cst {dimension_numbers = #tpu.dot_dimension_numbers<[1], [0], [0], [1], [0, 0, 1, 1], [], []>} : vector<960x32xbf16>, vector<32x32xbf16>, vector<960x32xf32> -> vector<960x32xf32>
    %18 = arith.truncf %17 : vector<960x32xf32> to vector<960x32xbf16>
    %19 = vector.shape_cast %18 : vector<960x32xbf16> to vector<30x32x32xbf16>
    %20 = vector.shape_cast %14 : vector<32x32xbf16> to vector<1x32x32xbf16>
    %21 = vector.broadcast %20 : vector<1x32x32xbf16> to vector<30x32x32xbf16>
    %cst_12 = arith.constant dense<0.000000e+00> : vector<30x32x32xf32>
    %22 = tpu.matmul %21, %19, %cst_12 {dimension_numbers = #tpu.dot_dimension_numbers<[2], [1], [1], [2], [0, 0, 0, 1, 1, 2], [0], [0]>} : vector<30x32x32xbf16>, vector<30x32x32xbf16>, vector<30x32x32xf32> -> vector<30x32x32xf32>
    %c0_13 = arith.constant 0 : index
    %c0_14 = arith.constant 0 : index
    %23 = vector.load %arg6[%c0_13, %c0_14] : memref<32x32xf32, #tpu.memory_space<vmem>>, vector<32x32xf32>
    %24 = vector.shape_cast %23 : vector<32x32xf32> to vector<1x32x32xf32>
    %25 = vector.broadcast %24 : vector<1x32x32xf32> to vector<30x32x32xf32>
    %26 = arith.mulf %22, %25 : vector<30x32x32xf32>
    %27 = vector.extract_strided_slice %26 {offsets = [0, 0, 0], sizes = [6, 32, 32], strides = [1, 1, 1]} : vector<30x32x32xf32> to vector<6x32x32xf32>
    %28 = vector.extract_strided_slice %26 {offsets = [6, 0, 0], sizes = [6, 32, 32], strides = [1, 1, 1]} : vector<30x32x32xf32> to vector<6x32x32xf32>
    %29 = vector.extract_strided_slice %26 {offsets = [12, 0, 0], sizes = [6, 32, 32], strides = [1, 1, 1]} : vector<30x32x32xf32> to vector<6x32x32xf32>
    %30 = vector.extract_strided_slice %26 {offsets = [18, 0, 0], sizes = [6, 32, 32], strides = [1, 1, 1]} : vector<30x32x32xf32> to vector<6x32x32xf32>
    %31 = vector.extract_strided_slice %26 {offsets = [24, 0, 0], sizes = [6, 32, 32], strides = [1, 1, 1]} : vector<30x32x32xf32> to vector<6x32x32xf32>
    %c0_15 = arith.constant 0 : index
    %32 = memref.load %arg8[%c0_15] : memref<2xf32, #tpu.memory_space<smem>>
    %c1 = arith.constant 1 : index
    %33 = memref.load %arg8[%c1] : memref<2xf32, #tpu.memory_space<smem>>
    %34 = arith.mulf %27, %27 : vector<6x32x32xf32>
    %35 = arith.mulf %28, %28 : vector<6x32x32xf32>
    %36 = arith.mulf %27, %28 : vector<6x32x32xf32>
    %37 = arith.subf %29, %34 : vector<6x32x32xf32>
    %38 = arith.subf %30, %35 : vector<6x32x32xf32>
    %39 = arith.subf %31, %36 : vector<6x32x32xf32>
    %cst_16 = arith.constant 2.000000e+00 : f32
    %40 = vector.broadcast %cst_16 : f32 to vector<6x32x32xf32>
    %41 = arith.mulf %40, %36 : vector<6x32x32xf32>
    %42 = vector.broadcast %32 : f32 to vector<6x32x32xf32>
    %43 = arith.addf %41, %42 : vector<6x32x32xf32>
    %cst_17 = arith.constant 2.000000e+00 : f32
    %44 = vector.broadcast %cst_17 : f32 to vector<6x32x32xf32>
    %45 = arith.mulf %44, %39 : vector<6x32x32xf32>
    %46 = vector.broadcast %33 : f32 to vector<6x32x32xf32>
    %47 = arith.addf %45, %46 : vector<6x32x32xf32>
    %48 = arith.mulf %43, %47 : vector<6x32x32xf32>
    %49 = arith.addf %34, %35 : vector<6x32x32xf32>
    %50 = vector.broadcast %32 : f32 to vector<6x32x32xf32>
    %51 = arith.addf %49, %50 : vector<6x32x32xf32>
    %52 = arith.addf %37, %38 : vector<6x32x32xf32>
    %53 = vector.broadcast %33 : f32 to vector<6x32x32xf32>
    %54 = arith.addf %52, %53 : vector<6x32x32xf32>
    %55 = arith.mulf %51, %54 : vector<6x32x32xf32>
    %56 = tpu.reciprocal %55 : vector<6x32x32xf32> -> vector<6x32x32xf32>
    %57 = arith.mulf %48, %56 : vector<6x32x32xf32>
    %58 = tpu.iota {dimensions = array<i32: 0>} : vector<6x1x1xi32>
    %c6_i32 = arith.constant 6 : i32
    %59 = arith.muli %arg0, %c6_i32 : i32
    %c6_i32_18 = arith.constant 6 : i32
    %60 = arith.subi %c6_i32_18, %59 : i32
    %61 = vector.broadcast %60 : i32 to vector<6x1x1xi32>
    %62 = arith.cmpi slt, %58, %61 : vector<6x1x1xi32>
    %63 = arith.extui %62 : vector<6x1x1xi1> to vector<6x1x1xi32>
    %64 = arith.sitofp %63 : vector<6x1x1xi32> to vector<6x1x1xf32>
    %c0_19 = arith.constant 0 : index
    %c0_20 = arith.constant 0 : index
    %65 = vector.load %arg7[%c0_19, %c0_20] : memref<32x32xf32, #tpu.memory_space<vmem>>, vector<32x32xf32>
    %66 = vector.shape_cast %65 : vector<32x32xf32> to vector<1x32x32xf32>
    %67 = vector.broadcast %66 : vector<1x32x32xf32> to vector<6x32x32xf32>
    %68 = arith.mulf %57, %67 : vector<6x32x32xf32>
    %69 = vector.broadcast %64 : vector<6x1x1xf32> to vector<6x32x32xf32>
    %70 = arith.mulf %68, %69 : vector<6x32x32xf32>
    %71 = vector.shape_cast %70 : vector<6x32x32xf32> to vector<1x6x32x32xf32>
    %cst_21 = arith.constant dense<0.000000e+00> : vector<1xf32>
    %72 = vector.multi_reduction <add>, %71, %cst_21 [1, 2, 3] : vector<1x6x32x32xf32> to vector<1xf32>
    %73 = vector.shape_cast %72 : vector<1xf32> to vector<1x1x1x1xf32>
    %74 = vector.extract %73[0, 0, 0, 0] : f32 from vector<1x1x1x1xf32>
    %75 = vector.broadcast %74 : f32 to vector<1x8x128xf32>
    %c0_22 = arith.constant 0 : index
    %c0_23 = arith.constant 0 : index
    %c0_24 = arith.constant 0 : index
    %76 = vector.load %arg9[%c0_22, %c0_23, %c0_24] : memref<1x8x128xf32, #tpu.memory_space<vmem>>, vector<1x8x128xf32>
    tpu.vector_store %arg9[%c0_22, %c0_23, %c0_24], %75 {strides = array<i32>} : memref<1x8x128xf32, #tpu.memory_space<vmem>>, vector<1x8x128xf32>,
    return
  }
  func.func @transform_0(%arg0: i32) -> (i32, i32, i32) {
    %c0_i32 = arith.constant 0 : i32
    %c0_i32_0 = arith.constant 0 : i32
    %c0_i32_1 = arith.constant 0 : i32
    return %arg0, %c0_i32, %c0_i32_0 : i32, i32, i32
  }
  func.func @transform_1(%arg0: i32) -> (i32, i32, i32) {
    %c0_i32 = arith.constant 0 : i32
    %c0_i32_0 = arith.constant 0 : i32
    %c0_i32_1 = arith.constant 0 : i32
    return %arg0, %c0_i32, %c0_i32_0 : i32, i32, i32
  }
  func.func @transform_2(%arg0: i32) -> (i32, i32, i32) {
    %c0_i32 = arith.constant 0 : i32
    %c0_i32_0 = arith.constant 0 : i32
    %c0_i32_1 = arith.constant 0 : i32
    return %arg0, %c0_i32, %c0_i32_0 : i32, i32, i32
  }
  func.func @transform_3(%arg0: i32) -> (i32, i32) {
    %c0_i32 = arith.constant 0 : i32
    %c0_i32_0 = arith.constant 0 : i32
    %c0_i32_1 = arith.constant 0 : i32
    return %c0_i32, %c0_i32_0 : i32, i32
  }
  func.func @transform_4(%arg0: i32) -> (i32, i32) {
    %c0_i32 = arith.constant 0 : i32
    %c0_i32_0 = arith.constant 0 : i32
    %c0_i32_1 = arith.constant 0 : i32
    return %c0_i32, %c0_i32_0 : i32, i32
  }
  func.func @transform_5(%arg0: i32) -> (i32, i32) {
    %c0_i32 = arith.constant 0 : i32
    %c0_i32_0 = arith.constant 0 : i32
    %c0_i32_1 = arith.constant 0 : i32
    return %c0_i32, %c0_i32_0 : i32, i32
  }
  func.func @transform_6(%arg0: i32) -> (i32, i32) {
    %c0_i32 = arith.constant 0 : i32
    %c0_i32_0 = arith.constant 0 : i32
    %c0_i32_1 = arith.constant 0 : i32
    return %c0_i32, %c0_i32_0 : i32, i32
  }
  func.func @transform_7(%arg0: i32) -> i32 {
    %c0_i32 = arith.constant 0 : i32
    %c0_i32_0 = arith.constant 0 : i32
    return %c0_i32 : i32
  }
  func.func @transform_8(%arg0: i32) -> (i32, i32, i32) {
    %c0_i32 = arith.constant 0 : i32
    %c0_i32_0 = arith.constant 0 : i32
    %c0_i32_1 = arith.constant 0 : i32
    return %arg0, %c0_i32, %c0_i32_0 : i32, i32, i32
  }
}

</mosaic_0001>

<bundles_post_ra>
// kernel: tpu_custom_call.1
= control target key start
LH: loop header
LB: loop body
LE: loop exit
PB: predicated region body
PF: predicated region fallthrough
CT: control target
= control target key end

     0   :  { %13 = vsyncpa [#allocation3], 0  ;;  %s6261_s0 = inlined_call_operand.hbm [shape: f32[6,32,32], index: 0, kind: input, shape index: {}]   ;;  %s6262_s1 = inlined_call_operand.hbm [shape: f32[6,32,32], index: 1, kind: input, shape index: {}]   ;;  %s6263_s2 = inlined_call_operand.hbm [shape: f32[6,32,32], index: 2, kind: input, shape index: {}]   ;;  %s6264_s3 = inlined_call_operand.hbm [shape: bf16[32,32], index: 3, kind: input, shape index: {}]   ;;  %s6265_s4 = inlined_call_operand.hbm [shape: bf16[32,32], index: 4, kind: input, shape index: {}]   ;;  %s6266_s5 = inlined_call_operand.hbm [shape: f32[32,32], index: 5, kind: input, shape index: {}]   ;;  %s6267_s6 = inlined_call_operand.hbm [shape: f32[32,32], index: 6, kind: input, shape index: {}]   ;;  %s6268_s7 = inlined_call_operand.hbm [shape: f32[2], index: 7, kind: input, shape index: {}]   ;;  %s6269_s8 = inlined_call_operand.hbm [shape: f32[1,8,128], index: 8, kind: output, shape index: {}]  }
   0x1   :  { %14 = vsyncpa [#allocation7], 0 }
   0x2   :  { %15 = vsyncpa [#allocation10], 0 }
   0x3   :  { %16 = vsyncpa [#allocation13], 0 }
   0x4   :  { %17 = vsyncpa [#allocation5], 0 }
   0x5   :  { %18 = vsyncpa [#allocation4], 0  ;;  %s4299_s27 = smov [#allocation6]   ;;  %s4300_s29 = smov [#allocation9]  }
   0x6   :  { %s36_s28 = sshll.u32 %s4299_s27, 4  ;;  %s60_s30 = sshll.u32 %s4300_s29, 4  ;;  %s37_s28 = int_to_ptr.vmem [resolvable:$true] %s36_s28  ;;  %s4357_s30 = int_to_ptr.vmem [resolvable:$true] %s60_s30 }
   0x7   :  { %s4101_s11 = scalar_lea.hbm %s6262_s1, 3072 }
   0x8   :  { %p4102_p0 = scmp.ne.s32.totalorder %s6262_s1, %s4101_s11  ;;  %p4105_p1 = scmp.lt.u32.totalorder %s4101_s11, %s6262_s1 }
   0xa   :  { %p4107_p2 = pnand %p4105_p1, %p4102_p0 }
   0xc   :  { %4110 = shalt.err (!%p4107_p2)
}
   0xd   :  { %s4111_s16 = scalar_lea.vmem %s37_s28, 3072  ;;  %p4116_p4 = scmp.lt.s32.totalorder %s37_s28, %s37_s28 }
   0xe   :  { %p4112_p3 = scmp.ne.s32.totalorder %s37_s28, %s4111_s16  ;;  %p4117_p5 = scmp.lt.s32.totalorder %s4111_s16, %s4111_s16 }
  0x10   :  { %p4118_p6 = por %p4117_p5, %p4116_p4 }
  0x12   :  { %p4119_p7 = pnand %p4118_p6, %p4112_p3 }
  0x14   :  { %4122 = shalt.err (!%p4119_p7)
}
  0x15   :  { %s4301_s17 = smov 128   ;;  %s4302_s18 = smov 8  }
  0x16   :  { %42 = dma.hbm_to_vmem [thread:$0]  %s6262_s1, 3072, %s37_s28, [#allocation7], %s4301_s17, %s4301_s17, %s4302_s18  }
  0x17   :  { %s4123_s23 = scalar_lea.hbm %s6264_s3, 256 }
  0x18   :  { %p4124_p8 = scmp.ne.s32.totalorder %s6264_s3, %s4123_s23  ;;  %p4127_p9 = scmp.lt.u32.totalorder %s4123_s23, %s6264_s3 }
  0x1a   :  { %p4129_p10 = pnand %p4127_p9, %p4124_p8 }
  0x1c   :  { %4132 = shalt.err (!%p4129_p10)
}
  0x1d   :  { %s4133_s29 = scalar_lea.vmem %s4357_s30, 256  ;;  %p4138_p12 = scmp.lt.s32.totalorder %s4357_s30, %s4357_s30 }
  0x1e   :  { %p4134_p11 = scmp.ne.s32.totalorder %s4357_s30, %s4133_s29  ;;  %p4139_p13 = scmp.lt.s32.totalorder %s4133_s29, %s4133_s29 }
  0x20   :  { %p4140_p0 = por %p4139_p13, %p4138_p12 }
  0x22   :  { %p4141_p1 = pnand %p4140_p0, %p4134_p11 }
  0x24   :  { %4144 = shalt.err (!%p4141_p1)
}
  0x25   :  { %s4303_s1 = smov 64   ;;  %s4304_s28 = smov 4  }
  0x26   :  { %66 = dma.hbm_to_vmem [thread:$0]  %s6264_s3, 256, %s4357_s30, [#allocation10], %s4303_s1, %s4303_s1, %s4304_s28  }
  0x27   :  { %s4305_s11 = smov [#allocation12]   ;;  %s4306_s13 = smov [#allocation2]  }
  0x28   :  { %s84_s12 = sshll.u32 %s4305_s11, 4  ;;  %s24_s14 = sshll.u32 %s4306_s13, 4  ;;  %s85_s12 = int_to_ptr.vmem [resolvable:$true] %s84_s12  ;;  %s4394_s14 = int_to_ptr.vmem [resolvable:$true] %s24_s14 }
  0x29   :  { %s4145_s19 = scalar_lea.hbm %s6266_s5, 512 }
  0x2a   :  { %p4146_p2 = scmp.ne.s32.totalorder %s6266_s5, %s4145_s19  ;;  %p4149_p3 = scmp.lt.u32.totalorder %s4145_s19, %s6266_s5 }
  0x2c   :  { %p4151_p4 = pnand %p4149_p3, %p4146_p2 }
  0x2e   :  { %4154 = shalt.err (!%p4151_p4)
}
  0x2f   :  { %s4155_s3 = scalar_lea.vmem %s85_s12, 512  ;;  %p4160_p6 = scmp.lt.s32.totalorder %s85_s12, %s85_s12 }
  0x30   :  { %p4156_p5 = scmp.ne.s32.totalorder %s85_s12, %s4155_s3  ;;  %p4161_p7 = scmp.lt.s32.totalorder %s4155_s3, %s4155_s3 }
  0x32   :  { %p4162_p8 = por %p4161_p7, %p4160_p6 }
  0x34   :  { %p4163_p9 = pnand %p4162_p8, %p4156_p5 }
  0x36   :  { %4166 = shalt.err (!%p4163_p9)
}
  0x37   :  { %90 = dma.hbm_to_vmem [thread:$0]  %s6266_s5, 512, %s85_s12, [#allocation13], %s4301_s17, %s4301_s17, %s4302_s18  }
  0x38   :  { %s4167_s27 = scalar_lea.hbm %s6261_s0, 3072 }
  0x39   :  { %p4168_p10 = scmp.ne.s32.totalorder %s6261_s0, %s4167_s27  ;;  %p4171_p11 = scmp.lt.u32.totalorder %s4167_s27, %s6261_s0 }
  0x3b   :  { %p4173_p12 = pnand %p4171_p11, %p4168_p10 }
  0x3d   :  { %4176 = shalt.err (!%p4173_p12)
}
  0x3e   :  { %s4177_s13 = scalar_lea.vmem %s4394_s14, 3072  ;;  %p4182_p0 = scmp.lt.s32.totalorder %s4394_s14, %s4394_s14 }
  0x3f   :  { %p4178_p13 = scmp.ne.s32.totalorder %s4394_s14, %s4177_s13  ;;  %p4183_p1 = scmp.lt.s32.totalorder %s4177_s13, %s4177_s13 }
  0x41   :  { %p4184_p2 = por %p4183_p1, %p4182_p0 }
  0x43   :  { %p4185_p3 = pnand %p4184_p2, %p4178_p13 }
  0x45   :  { %4188 = shalt.err (!%p4185_p3)
}
  0x46   :  { %30 = dma.hbm_to_vmem [thread:$0]  %s6261_s0, 3072, %s4394_s14, [#allocation3], %s4301_s17, %s4301_s17, %s4302_s18  }
  0x47   :  { %s4307_s15 = smov [#allocation8]   ;;  %s4308_s19 = smov [#allocation11]  }
  0x48   :  { %s48_s16 = sshll.u32 %s4307_s15, 4  ;;  %s72_s20 = sshll.u32 %s4308_s19, 4  ;;  %s49_s16 = int_to_ptr.vmem [resolvable:$true] %s48_s16  ;;  %s4431_s20 = int_to_ptr.vmem [resolvable:$true] %s72_s20 }
  0x49   :  { %s4189_s23 = scalar_lea.hbm %s6263_s2, 3072 }
  0x4a   :  { %p4190_p4 = scmp.ne.s32.totalorder %s6263_s2, %s4189_s23  ;;  %p4193_p5 = scmp.lt.u32.totalorder %s4189_s23, %s6263_s2 }
  0x4c   :  { %p4195_p6 = pnand %p4193_p5, %p4190_p4 }
  0x4e   :  { %4198 = shalt.err (!%p4195_p6)
}
  0x4f   :  { %s4199_s0 = scalar_lea.vmem %s49_s16, 3072  ;;  %p4204_p8 = scmp.lt.s32.totalorder %s49_s16, %s49_s16 }
  0x50   :  { %p4200_p7 = scmp.ne.s32.totalorder %s49_s16, %s4199_s0  ;;  %p4205_p9 = scmp.lt.s32.totalorder %s4199_s0, %s4199_s0 }
  0x52   :  { %p4206_p10 = por %p4205_p9, %p4204_p8 }
  0x54   :  { %p4207_p11 = pnand %p4206_p10, %p4200_p7 }
  0x56   :  { %4210 = shalt.err (!%p4207_p11)
}
  0x57   :  { %54 = dma.hbm_to_vmem [thread:$0]  %s6263_s2, 3072, %s49_s16, [#allocation7], %s4301_s17, %s4301_s17, %s4302_s18  }
  0x58   :  { %s4211_s9 = scalar_lea.hbm %s6265_s4, 256 }
  0x59   :  { %p4212_p12 = scmp.ne.s32.totalorder %s6265_s4, %s4211_s9  ;;  %p4215_p13 = scmp.lt.u32.totalorder %s4211_s9, %s6265_s4 }
  0x5b   :  { %p4217_p0 = pnand %p4215_p13, %p4212_p12 }
  0x5d   :  { %4220 = shalt.err (!%p4217_p0)
}
  0x5e   :  { %s4221_s12 = scalar_lea.vmem %s4431_s20, 256  ;;  %p4226_p2 = scmp.lt.s32.totalorder %s4431_s20, %s4431_s20 }
  0x5f   :  { %p4222_p1 = scmp.ne.s32.totalorder %s4431_s20, %s4221_s12  ;;  %p4227_p3 = scmp.lt.s32.totalorder %s4221_s12, %s4221_s12 }
  0x61   :  { %p4228_p4 = por %p4227_p3, %p4226_p2 }
  0x63   :  { %p4229_p5 = pnand %p4228_p4, %p4222_p1 }
  0x65   :  { %4232 = shalt.err (!%p4229_p5)
}
  0x66   :  { %78 = dma.hbm_to_vmem [thread:$0]  %s6265_s4, 256, %s4431_s20, [#allocation10], %s4303_s1, %s4303_s1, %s4304_s28  }
  0x67   :  { %s4309_s16 = smov [#allocation14]   ;;  %s4233_s23 = scalar_lea.hbm %s6267_s6, 512 }
  0x68   :  { %s96_s19 = sshll.u32 %s4309_s16, 4  ;;  %p4234_p6 = scmp.ne.s32.totalorder %s6267_s6, %s4233_s23  ;;  %s97_s19 = int_to_ptr.vmem [resolvable:$true] %s96_s19 }
  0x69   :  { %p4237_p7 = scmp.lt.u32.totalorder %s4233_s23, %s6267_s6 }
  0x6b   :  { %p4239_p8 = pnand %p4237_p7, %p4234_p6 }
  0x6d   :  { %4242 = shalt.err (!%p4239_p8)
}
  0x6e   :  { %s4243_s0 = scalar_lea.vmem %s97_s19, 512  ;;  %p4248_p10 = scmp.lt.s32.totalorder %s97_s19, %s97_s19 }
  0x6f   :  { %p4244_p9 = scmp.ne.s32.totalorder %s97_s19, %s4243_s0  ;;  %p4249_p11 = scmp.lt.s32.totalorder %s4243_s0, %s4243_s0 }
  0x71   :  { %p4250_p12 = por %p4249_p11, %p4248_p10 }
  0x73   :  { %p4251_p13 = pnand %p4250_p12, %p4244_p9 }
  0x75   :  { %4254 = shalt.err (!%p4251_p13)
}
  0x76   :  { %102 = dma.hbm_to_vmem [thread:$0]  %s6267_s6, 512, %s97_s19, [#allocation13], %s4301_s17, %s4301_s17, %s4302_s18  }
  0x77   :  { %s4255_s14 = scalar_lea.hbm %s6268_s7, 16 }
  0x78   :  { %p4256_p0 = scmp.ne.s32.totalorder %s6268_s7, %s4255_s14  ;;  %p4259_p1 = scmp.lt.u32.totalorder %s4255_s14, %s6268_s7 }
  0x7a   :  { %p4261_p2 = pnand %p4259_p1, %p4256_p0 }
  0x7c   :  { %4264 = shalt.err (!%p4261_p2)
}
  0x7d   :  { %s4310_s10 = smov [#allocation15]  }
  0x7e   :  { %110 = dma.hbm_to_smem %s6268_s7, 16, %s4310_s10, [#allocation5]  }
  0x7f   :  { %4287 = dma.done.wait [#allocation3], 3072  }
  0x80   :  { %4288 = vsyncadd [#allocation3], 4294964224 }
  0x81   :  { %4289 = dma.done.wait [#allocation7], 6144  }
  0x82   :  { %4290 = vsyncadd [#allocation7], 4294961152 }
  0x83   :  { %4291 = dma.done.wait [#allocation10], 512  }
  0x84   :  { %4292 = vsyncadd [#allocation10], 4294966784 }
  0x85   :  { %4293 = dma.done.wait [#allocation13], 1024  }
  0x86   :  { %4294 = vsyncadd [#allocation13], 4294966272 }
  0x87   :  { %4295 = dma.done.wait [#allocation5], 16  }
  0x88   :  { %4296 = vsyncadd [#allocation5], 4294967280 }
  0x89   :  { %135 = sfence }
  0x8a   :  { %v4045_v0 = vld [vmem:[#allocation11] sm:$0xff]   ;;  %v4046_v1 = vld [vmem:[#allocation11 + $0x8] sm:$0xff]   ;;  %v137_v2 = vld [vmem:[#allocation2] sm:$0xff]  ;;  %vm409_vm0 = vcmask 261120   ;;  %s2773_s6 = sld [smem:[#allocation15]]  ;;  %s3483_s7 = sld [smem:[#allocation15 + $0x1]] }
  0x8b   :  { %3666 = vmatprep.subr.bf16.mxu0 %v4045_v0  ;;  %v138_v3 = vld [vmem:[#allocation2 + $0x8] sm:$0xff]  ;;  %v4495_v4 = vld [vmem:[#allocation8] sm:$0xff]  ;;  %v139_v8 = vld [vmem:[#allocation2 + $0x10] sm:$0xff]  ;;  %s4311_s17 = smov [#allocation16]  }
  0x8c   :  { %3667 = vmatpush3.bf16.msra.mxu0 %v4045_v0  ;;  %v4497_v5 = vld [vmem:[#allocation8 + $0x8] sm:$0xff]  ;;  %v4500_v6 = vmul.f32 %v4495_v4, %v137_v2  ;;  %v140_v9 = vld [vmem:[#allocation2 + $0x18] sm:$0xff]  ;;  %v4505_v10 = vld [vmem:[#allocation8 + $0x10] sm:$0xff]  ;;  %s3346_s18 = sshll.u32 %s4311_s17, 4  ;;  %s3347_s18 = int_to_ptr.vmem [resolvable:$true] %s3346_s18 }
  0x8d   :  { %3668 = vmatprep.subr.bf16.mxu0 %v4046_v1  ;;  %v4503_v7 = vmul.f32 %v4497_v5, %v138_v3  ;;  %v4507_v11 = vld [vmem:[#allocation8 + $0x18] sm:$0xff]  ;;  %v4510_v12 = vmul.f32 %v4505_v10, %v139_v8  ;;  %v141_v13 = vld [vmem:[#allocation2 + $0x20] sm:$0xff]  ;;  %v142_v14 = vld [vmem:[#allocation2 + $0x28] sm:$0xff]  ;;  %s4265_s12 = scalar_lea.vmem %s3347_s18, 128  ;;  %p4270_p4 = scmp.lt.s32.totalorder %s3347_s18, %s3347_s18 }
  0x8e   :  { %v4515_v16 = vmul.f32 %v4507_v11, %v140_v9  ;;  %v4517_v17 = vld [vmem:[#allocation8 + $0x20] sm:$0xff]  ;;  %v4519_v18 = vld [vmem:[#allocation8 + $0x28] sm:$0xff]  ;;  %v143_v19 = vld [vmem:[#allocation2 + $0x30] sm:$0xff]  ;;  %v4523_v20 = vmul.f32 %v4500_v6, %v4500_v6  ;;  %p4266_p3 = scmp.ne.s32.totalorder %s3347_s18, %s4265_s12  ;;  %p4271_p5 = scmp.lt.s32.totalorder %s4265_s12, %s4265_s12 }
  0x8f   :  { %v329_v15 = vpack.c.bf16 %v4503_v7, %v4500_v6  ;;  %v4526_v21 = vmul.f32 %v4517_v17, %v141_v13  ;;  %v4529_v22 = vmul.f32 %v4519_v18, %v142_v14  ;;  %v144_v23 = vld [vmem:[#allocation2 + $0x38] sm:$0xff]  ;;  %v4531_v24 = vld [vmem:[#allocation8 + $0x30] sm:$0xff]  ;;  %v4537_v26 = vmul.f32 %v4503_v7, %v4503_v7  ;;  %v145_v29 = vld [vmem:[#allocation2 + $0x40] sm:$0xff] }
  0x90   :  { %3669 = vmatpush3.bf16.msra.mxu0 %v4046_v1  ;;  %v4533_v25 = vld [vmem:[#allocation8 + $0x38] sm:$0xff]  ;;  %v4541_v27 = vmul.f32 %v4510_v12, %v4510_v12  ;;  %v330_v28 = vpack.c.bf16 %v4515_v16, %v4510_v12  ;;  %v146_v30 = vld [vmem:[#allocation2 + $0x48] sm:$0xff]  ;;  %v4546_v31 = vld [vmem:[#allocation8 + $0x40] sm:$0xff]  ;;  %v4550_v32 = vmul.f32 %v4515_v16, %v4515_v16  ;;  %v4560_v36 = vmul.f32 %v4531_v24, %v143_v19  ;;  %p4272_p6 = por %p4271_p5, %p4270_p4 }
  0x91   :  { %3670 = vmatprep.mubr.msk.bf16.mxu0 %vm409_vm0, %v329_v15  ;;  %v331_v33 = vpack.c.bf16 %v4529_v22, %v4526_v21  ;;  %v4554_v34 = vld [vmem:[#allocation8 + $0x48] sm:$0xff]  ;;  %v4563_v37 = vmul.f32 %v4533_v25, %v144_v23  ;;  %v4569_v39 = vmul.f32 %v4546_v31, %v145_v29  ;;  %v147_v42 = vld [vmem:[#allocation2 + $0x50] sm:$0xff]  ;;  %v148_v43 = vld [vmem:[#allocation2 + $0x58] sm:$0xff] }
  0x92   :  { %v4572_v40 = vmul.f32 %v4554_v34, %v146_v30  ;;  %v4578_v45 = vld [vmem:[#allocation8 + $0x50] sm:$0xff]  ;;  %v4580_v46 = vld [vmem:[#allocation8 + $0x58] sm:$0xff]  ;;  %v149_v47 = vld [vmem:[#allocation2 + $0x60] sm:$0xff]  ;;  %p4273_p7 = pnand %p4272_p6, %p4266_p3 }
  0x93   :  { %3671 = vmatmul.mubr.msk.bf16.vlgmr.msra.gmra.mrb[0].mxu0 %vm409_vm0, %v330_v28  ;;  %v332_v41 = vpack.c.bf16 %v4563_v37, %v4560_v36  ;;  %v150_v48 = vld [vmem:[#allocation2 + $0x68] sm:$0xff]  ;;  %v4582_v49 = vld [vmem:[#allocation8 + $0x60] sm:$0xff]  ;;  %v4588_v51 = vmul.f32 %v4578_v45, %v147_v42  ;;  %v4591_v52 = vmul.f32 %v4580_v46, %v148_v43  ;;  %v151_v55 = vld [vmem:[#allocation2 + $0x70] sm:$0xff] }
  0x94   :  { %3674 = vmatprep.mubr.msk.bf16.mxu0 %vm409_vm0, %v331_v33  ;;  %v333_v44 = vpack.c.bf16 %v4572_v40, %v4569_v39  ;;  %v4584_v50 = vld [vmem:[#allocation8 + $0x68] sm:$0xff]  ;;  %v4595_v53 = vmul.f32 %v4582_v49, %v149_v47  ;;  %v152_v56 = vld [vmem:[#allocation2 + $0x78] sm:$0xff]  ;;  %v4600_v57 = vld [vmem:[#allocation8 + $0x70] sm:$0xff] }
  0x95   :  { %v4598_v54 = vmul.f32 %v4584_v50, %v150_v48  ;;  %v4602_v58 = vld [vmem:[#allocation8 + $0x78] sm:$0xff]  ;;  %v153_v59 = vld [vmem:[#allocation2 + $0x80] sm:$0xff]  ;;  %v154_v60 = vld [vmem:[#allocation2 + $0x88] sm:$0xff]  ;;  %v334_v1 = vpack.c.bf16 %v4591_v52, %v4588_v51  ;;  %v4617_v14 = vmul.f32 %v4600_v57, %v151_v55 }
  0x96   :  { %v4604_v61 = vld [vmem:[#allocation8 + $0x80] sm:$0xff]  ;;  %v4606_v62 = vld [vmem:[#allocation8 + $0x88] sm:$0xff]  ;;  %v155_v3 = vld [vmem:[#allocation2 + $0x90] sm:$0xff]  ;;  %v4620_v15 = vmul.f32 %v4602_v58, %v152_v56 }
  0x97   :  { %v161_v63 = vld [vmem:[#allocation6] sm:$0xff]  ;;  %v162_v0 = vld [vmem:[#allocation6 + $0x8] sm:$0xff]  ;;  %v335_v2 = vpack.c.bf16 %v4598_v54, %v4595_v53  ;;  %v156_v8 = vld [vmem:[#allocation2 + $0x98] sm:$0xff]  ;;  %v4623_v19 = vmul.f32 %v4604_v61, %v153_v59  ;;  %v4626_v23 = vmul.f32 %v4606_v62, %v154_v60 }
  0x98   :  { %v4612_v9 = vld [vmem:[#allocation8 + $0x90] sm:$0xff]  ;;  %v4614_v13 = vld [vmem:[#allocation8 + $0x98] sm:$0xff]  ;;  %v157_v28 = vld [vmem:[#allocation2 + $0xa0] sm:$0xff]  ;;  %v4635_v47 = vmul.f32 %v4497_v5, %v162_v0  ;;  %v336_v56 = vpack.c.bf16 %v4620_v15, %v4617_v14 }
  0x99   :  { %v4628_v29 = vld [vmem:[#allocation8 + $0xa0] sm:$0xff]  ;;  %v163_v30 = vld [vmem:[#allocation6 + $0x10] sm:$0xff]  ;;  %v164_v33 = vld [vmem:[#allocation6 + $0x18] sm:$0xff]  ;;  %v337_v59 = vpack.c.bf16 %v4626_v23, %v4623_v19  ;;  %v4643_v60 = vmul.f32 %v4612_v9, %v155_v3 }
  0x9a   :  { %v166_v42 = vld [vmem:[#allocation6 + $0x28] sm:$0xff]  ;;  %v167_v43 = vld [vmem:[#allocation6 + $0x30] sm:$0xff]  ;;  %v168_v48 = vld [vmem:[#allocation6 + $0x38] sm:$0xff]  ;;  %v4649_v5 = vmul.f32 %v4628_v29, %v157_v28  ;;  %v4655_v0 = vmul.f32 %v4507_v11, %v164_v33 }
  0x9b   :  { %3675 = vmatmul.mubr.msk.bf16.gmra.mrb[4].mxu0 %vm409_vm0, %v332_v41  ;;  %v165_v41 = vld [vmem:[#allocation6 + $0x20] sm:$0xff]  ;;  %v171_v38 = vld [vmem:[#allocation6 + $0x50] sm:$0xff]  ;;  %v172_v35 = vld [vmem:[#allocation6 + $0x58] sm:$0xff]  ;;  %v4661_v3 = vmul.f32 %v4519_v18, %v166_v42  ;;  %v4667_v28 = vmul.f32 %v4533_v25, %v168_v48  ;;  %v4683_v18 = vmul.f32 %v4635_v47, %v4635_v47 }
  0x9c   :  { %3678 = vmatprep.mubr.msk.bf16.mxu0 %vm409_vm0, %v333_v44  ;;  %v4632_v44 = vmul.f32 %v4495_v4, %v161_v63  ;;  %v169_v55 = vld [vmem:[#allocation6 + $0x40] sm:$0xff]  ;;  %v170_v4 = vld [vmem:[#allocation6 + $0x48] sm:$0xff]  ;;  %v4652_v63 = vmul.f32 %v4505_v10, %v163_v30  ;;  %v4690_v25 = vmul.f32 %v4578_v45, %v171_v38 }
  0x9d   :  { %v4670_v10 = vmul.f32 %v4546_v31, %v169_v55  ;;  %v158_v30 = vld [vmem:[#allocation2 + $0xa8] sm:$0xff]  ;;  %v4693_v31 = vmul.f32 %v4580_v46, %v172_v35  ;;  %v4715_v35 = vmul.f32 %v4667_v28, %v4667_v28 }
  0x9e   :  { %v4672_v11 = vld [vmem:[#allocation8 + $0xa8] sm:$0xff]  ;;  %v4679_v33 = vmul.f32 %v4632_v44, %v4632_v44 }
  0x9f   :  { %6342 = vst [vmem:[#allocation27_spill] sm:$0xff] %v4715_v35  ;;  %v4719_v45 = vmul.f32 %v4672_v11, %v158_v30  ;;  %v4725_v48 = vmul.f32 %v4670_v10, %v4670_v10  ;;  %v4738_v30 = vmul.f32 %v4690_v25, %v4690_v25  ;;  %v4742_v46 = vmul.f32 %v4693_v31, %v4693_v31  ;;  %v4752_v35 = vld [vmem:[#allocation8 + $0xb0] sm:$0xff] }
  0xa1   :  { %6343 = vst [vmem:[#allocation28_spill] sm:$0xff] %v4725_v48  ;;  %6345 = vst [vmem:[#allocation30_spill] sm:$0xff] %v4738_v30  ;;  %v341_v30 = vpack.c.bf16 %v4635_v47, %v4632_v44  ;;  %v4787_v48 = vmul.f32 %v4635_v47, %v4503_v7  ;;  %v175_v47 = vld [vmem:[#allocation6 + $0x70] sm:$0xff] }
  0xa2   :  { %6346 = vst [vmem:[#allocation31_spill] sm:$0xff] %v4742_v46  ;;  %v173_v46 = vld [vmem:[#allocation6 + $0x60] sm:$0xff] }
  0xa3   :  { %3679 = vmatmul.mubr.msk.bf16.gmra.mrb[8].mxu0 %vm409_vm0, %v334_v1  ;;  %v4646_v1 = vmul.f32 %v4614_v13, %v156_v8  ;;  %v4664_v8 = vmul.f32 %v4531_v24, %v167_v43  ;;  %v4687_v24 = vmul.f32 %v4652_v63, %v4652_v63  ;;  %v4707_v43 = vmul.f32 %v4661_v3, %v4661_v3 }
  0xa4   :  { %3682 = vmatprep.mubr.msk.bf16.mxu0 %vm409_vm0, %v335_v2  ;;  %v4658_v2 = vmul.f32 %v4517_v17, %v165_v41  ;;  %v4675_v17 = vmul.f32 %v4554_v34, %v170_v4  ;;  %v4697_v34 = vmul.f32 %v4655_v0, %v4655_v0 }
  0xa5   :  { %6338 = vst [vmem:[#allocation23_spill] sm:$0xff] %v4687_v24  ;;  %6340 = vst [vmem:[#allocation25_spill] sm:$0xff] %v4707_v43  ;;  %v4711_v38 = vmul.f32 %v4664_v8, %v4664_v8  ;;  %v338_v4 = vpack.c.bf16 %v4646_v1, %v4643_v60  ;;  %v4754_v43 = vld [vmem:[#allocation8 + $0xb8] sm:$0xff] }
  0xa6   :  { %v4701_v41 = vmul.f32 %v4658_v2, %v4658_v2  ;;  %v4729_v55 = vmul.f32 %v4675_v17, %v4675_v17 }
  0xa7   :  { %6341 = vst [vmem:[#allocation26_spill] sm:$0xff] %v4711_v38  ;;  %v160_v38 = vld [vmem:[#allocation2 + $0xb8] sm:$0xff] }
  0xa8   :  { %6339 = vst [vmem:[#allocation24_spill] sm:$0xff] %v4701_v41  ;;  %6344 = vst [vmem:[#allocation29_spill] sm:$0xff] %v4729_v55  ;;  %v159_v41 = vld [vmem:[#allocation2 + $0xb0] sm:$0xff]  ;;  %v4761_v42 = vmul.f32 %v4754_v43, %v160_v38  ;;  %v344_v38 = vpack.c.bf16 %v4667_v28, %v4664_v8  ;;  %v4798_v55 = vmul.f32 %v4652_v63, %v4510_v12  ;;  %v177_v12 = vld [vmem:[#allocation6 + $0x80] sm:$0xff] }
  0xa9   :  { %v4758_v24 = vmul.f32 %v4752_v35, %v159_v41  ;;  %v343_v41 = vpack.c.bf16 %v4661_v3, %v4658_v2 }
  0xab   :  { %3683 = vmatmul.mubr.msk.bf16.gmra.mrb[12].mxu0 %vm409_vm0, %v336_v56  ;;  %v339_v56 = vpack.c.bf16 %v4719_v45, %v4649_v5 }
  0xac   :  { %3686 = vmatprep.mubr.msk.bf16.mxu0 %vm409_vm0, %v337_v59  ;;  %v340_v59 = vpack.c.bf16 %v4761_v42, %v4758_v24 }
  0xb3   :  { %3687 = vmatmul.mubr.msk.bf16.gmra.mrb[16].mxu0 %vm409_vm0, %v338_v4  ;;  %v342_v4 = vpack.c.bf16 %v4655_v0, %v4652_v63  ;;  %v178_v63 = vld [vmem:[#allocation6 + $0x88] sm:$0xff] }
  0xb4   :  { %3690 = vmatprep.mubr.msk.bf16.mxu0 %vm409_vm0, %v339_v56  ;;  %v345_v56 = vpack.c.bf16 %v4675_v17, %v4670_v10 }
  0xbb   :  { %3691 = vmatmul.mubr.msk.bf16.gmra.mrb[20].mxu0 %vm409_vm0, %v340_v59  ;;  %v174_v59 = vld [vmem:[#allocation6 + $0x68] sm:$0xff] }
  0xbc   :  { %3694 = vmatprep.mubr.msk.bf16.mxu0 %vm409_vm0, %v341_v30  ;;  %v4783_v30 = vmul.f32 %v4632_v44, %v4500_v6  ;;  %v4802_v6 = vmul.f32 %v4655_v0, %v4515_v16  ;;  %v4814_v16 = vmul.f32 %v4600_v57, %v175_v47  ;;  %v4836_v57 = vmul.f32 %v4664_v8, %v4560_v36  ;;  %v180_v47 = vld [vmem:[#allocation6 + $0x98] sm:$0xff]  ;;  %v181_v8 = vld [vmem:[#allocation6 + $0xa0] sm:$0xff] }
  0xbe   :  { %v377_v7 = vpack.c.bf16 %v4787_v48, %v4783_v30  ;;  %v378_v44 = vpack.c.bf16 %v4802_v6, %v4798_v55  ;;  %v319_v6 = vmul.f32 %v4814_v16, %v4617_v14 }
  0xc3   :  { %3695 = vmatmul.mubr.msk.bf16.gmra.mrb[24].mxu0 %vm409_vm0, %v342_v4  ;;  %v4791_v4 = vmul.f32 %v4582_v49, %v173_v46  ;;  %v346_v49 = vpack.c.bf16 %v4693_v31, %v4690_v25  ;;  %v176_v46 = vld [vmem:[#allocation6 + $0x78] sm:$0xff] }
  0xc4   :  { %3698 = vmatprep.mubr.msk.bf16.mxu0 %vm409_vm0, %v343_v41  ;;  %v4794_v41 = vmul.f32 %v4584_v50, %v174_v59  ;;  %v4817_v0 = vmul.f32 %v4602_v58, %v176_v46  ;;  %v4829_v59 = vmul.f32 %v4604_v61, %v177_v12  ;;  %v4840_v58 = vmul.f32 %v4667_v28, %v4563_v37  ;;  %v182_v46 = vld [vmem:[#allocation6 + $0xa8] sm:$0xff] }
  0xc5   :  { %v4855_v12 = vmul.f32 %v4614_v13, %v180_v47  ;;  %v4878_v13 = vmul.f32 %v4693_v31, %v4591_v52  ;;  %v317_v48 = vmul.f32 %v4791_v4, %v4595_v53 }
  0xc6   :  { %v347_v50 = vpack.c.bf16 %v4794_v41, %v4791_v4  ;;  %v348_v61 = vpack.c.bf16 %v4817_v0, %v4814_v16  ;;  %v318_v55 = vmul.f32 %v4794_v41, %v4598_v54 }
  0xc8   :  { %v383_v30 = vpack.c.bf16 %v318_v55, %v317_v48 }
  0xcb   :  { %3699 = vmatmul.mubr.msk.bf16.gmra.mrb[28].mxu0 %vm409_vm0, %v344_v38  ;;  %v4821_v38 = vmul.f32 %v4658_v2, %v4526_v21  ;;  %v4867_v2 = vmul.f32 %v4628_v29, %v181_v8  ;;  %v6347_v8 = vpack.c.bf16 %v4537_v26, %v4523_v20  ;;  %v264_v20 = vmul.f32 %v4563_v37, %v4563_v37 }
  0xcc   :  { %3702 = vmatprep.mubr.msk.bf16.mxu0 %vm409_vm0, %v345_v56  ;;  %v4825_v56 = vmul.f32 %v4661_v3, %v4529_v22  ;;  %v4863_v3 = vmul.f32 %v4675_v17, %v4572_v40  ;;  %v269_v37 = vmul.f32 %v4595_v53, %v4595_v53  ;;  %v321_v53 = vmul.f32 %v4829_v59, %v4623_v19 }
  0xd3   :  { %3703 = vmatmul.mubr.msk.bf16.gmra.mrb[32].mxu0 %vm409_vm0, %v346_v49  ;;  %v4832_v49 = vmul.f32 %v4606_v62, %v178_v63  ;;  %v4859_v63 = vmul.f32 %v4670_v10, %v4569_v39 }
  0xd4   :  { %3706 = vmatprep.mubr.msk.bf16.mxu0 %vm409_vm0, %v347_v50  ;;  %v179_v50 = vld [vmem:[#allocation6 + $0x90] sm:$0xff] }
  0xd5   :  { %v349_v62 = vpack.c.bf16 %v4832_v49, %v4829_v59  ;;  %v4852_v28 = vmul.f32 %v4612_v9, %v179_v50  ;;  %v4874_v9 = vmul.f32 %v4690_v25, %v4588_v51  ;;  %v381_v10 = vpack.c.bf16 %v4863_v3, %v4859_v63  ;;  %v184_v50 = vld [vmem:[#allocation6 + $0xb8] sm:$0xff]  ;;  %v5062_v63 = vld [vmem:[#allocation9 + $0x8] sm:$0xff]  }
  0xd6   :  { %v4893_v31 = vmul.f32 %v4754_v43, %v184_v50 }
  0xd7   :  { %v382_v17 = vpack.c.bf16 %v4878_v13, %v4874_v9  ;;  %v350_v29 = vpack.c.bf16 %v4855_v12, %v4852_v28 }
  0xdb   :  { %3707 = vmatmul.mubr.msk.bf16.gmra.mrb[36].mxu0 %vm409_vm0, %v348_v61  ;;  %v4870_v61 = vmul.f32 %v4672_v11, %v182_v46  ;;  %v261_v46 = vmul.f32 %v4526_v21, %v4526_v21  ;;  %v265_v21 = vmul.f32 %v4569_v39, %v4569_v39  ;;  %v270_v39 = vmul.f32 %v4598_v54, %v4598_v54 }
  0xdc   :  { %3710 = vmatprep.mubr.msk.bf16.mxu0 %vm409_vm0, %v349_v62  ;;  %v183_v62 = vld [vmem:[#allocation6 + $0xb0] sm:$0xff]  ;;  %v322_v54 = vmul.f32 %v4832_v49, %v4626_v23 }
  0xdd   :  { %v351_v11 = vpack.c.bf16 %v4870_v61, %v4867_v2  ;;  %v4890_v25 = vmul.f32 %v4752_v35, %v183_v62  ;;  %v262_v35 = vmul.f32 %v4529_v22, %v4529_v22  ;;  %v263_v62 = vmul.f32 %v4560_v36, %v4560_v36 }
  0xde   :  { %v266_v22 = vmul.f32 %v4572_v40, %v4572_v40  ;;  %v268_v36 = vmul.f32 %v4591_v52, %v4591_v52  ;;  %v359_v40 = vpack.c.bf16 %v270_v39, %v269_v37  ;;  %v273_v52 = vmul.f32 %v4623_v19, %v4623_v19  ;;  %v6350_v37 = vld [vmem:[#allocation23_spill] sm:$0xff] }
  0xdf   :  { %v352_v47 = vpack.c.bf16 %v4893_v31, %v4890_v25  ;;  %v355_v43 = vpack.c.bf16 %v262_v35, %v261_v46  ;;  %v356_v26 = vpack.c.bf16 %v264_v20, %v263_v62  ;;  %v277_v62 = vmul.f32 %v4649_v5, %v4649_v5 }
  0xe0   :  { %v278_v20 = vmul.f32 %v4719_v45, %v4719_v45  ;;  %v6351_v39 = vpack.c.bf16 %v4697_v34, %v6350_v37  ;;  %v294_v34 = vmul.f32 %v4794_v41, %v4794_v41  ;;  %v299_v37 = vmul.f32 %v4852_v28, %v4852_v28 }
  0xe1   :  { %v325_v19 = vmul.f32 %v4867_v2, %v4649_v5  ;;  %v327_v5 = vmul.f32 %v4890_v25, %v4758_v24 }
  0xe3   :  { %3711 = vmatmul.mubr.msk.bf16.gmra.mrb[40].mxu0 %vm409_vm0, %v350_v29  ;;  %v4907_v29 = vld [vmem:[#allocation9] sm:$0xff]  }
  0xe4   :  { %3714 = vmatprep.mubr.msk.bf16.mxu0 %vm409_vm0, %v351_v11  ;;  %v6348_v11 = vpack.c.bf16 %v4550_v32, %v4541_v27  ;;  %3794 = vmatprep.mubr.msk.bf16.mxu1 %vm409_vm0, %v4907_v29  ;;  %v357_v27 = vpack.c.bf16 %v266_v22, %v265_v21  ;;  %v267_v32 = vmul.f32 %v4588_v51, %v4588_v51 }
  0xe5   :  { %v272_v51 = vmul.f32 %v4620_v15, %v4620_v15  ;;  %v363_v22 = vpack.c.bf16 %v278_v20, %v277_v62  ;;  %v6362_v62 = vld [vmem:[#allocation30_spill] sm:$0xff] }
  0xe6   :  { %v358_v50 = vpack.c.bf16 %v268_v36, %v267_v32  ;;  %v6349_v36 = vpack.c.bf16 %v4683_v18, %v4679_v33  ;;  %v293_v18 = vmul.f32 %v4791_v4, %v4791_v4 }
  0xeb   :  { %3715 = vmatmul.mubr.msk.bf16.gmra.mrb[44].mxu0 %vm409_vm0, %v352_v47  ;;  %v271_v47 = vmul.f32 %v4617_v14, %v4617_v14  ;;  %v323_v14 = vmul.f32 %v4852_v28, %v4643_v60 }
  0xec   :  { %3718 = vmatprep.mubr.msk.bf16.mxu0 %vm409_vm0, %v6347_v8  ;;  %v274_v8 = vmul.f32 %v4626_v23, %v4626_v23  ;;  %v326_v23 = vmul.f32 %v4870_v61, %v4719_v45  ;;  %v328_v45 = vmul.f32 %v4893_v31, %v4761_v42 }
  0xed   :  { %v360_v46 = vpack.c.bf16 %v272_v51, %v271_v47  ;;  %v6355_v51 = vld [vmem:[#allocation27_spill] sm:$0xff] }
  0xee   :  { %v361_v35 = vpack.c.bf16 %v274_v8, %v273_v52  ;;  %v6356_v52 = vld [vmem:[#allocation26_spill] sm:$0xff]  ;;  %v388_v9 = vpack.c.bf16 %v328_v45, %v327_v5 }
  0xef   :  { %v6357_v8 = vpack.c.bf16 %v6355_v51, %v6356_v52  ;;  %v303_v52 = vmul.f32 %v4890_v25, %v4890_v25 }
  0xf3   :  { %3719 = vmatmul.mubr.msk.bf16.gmra.mrb[48].mxu0 %vm409_vm0, %v6348_v11  ;;  %v276_v11 = vmul.f32 %v4646_v1, %v4646_v1 }
  0xf4   :  { %3722 = vmatprep.mubr.msk.bf16.mxu0 %vm409_vm0, %v355_v43  ;;  %v275_v43 = vmul.f32 %v4643_v60, %v4643_v60 }
  0xf6   :  { %v362_v21 = vpack.c.bf16 %v276_v11, %v275_v43  ;;  %v371_v43 = vpack.c.bf16 %v294_v34, %v293_v18  ;;  %v6361_v11 = vld [vmem:[#allocation31_spill] sm:$0xff] }
  0xf7   :  { %v6363_v20 = vpack.c.bf16 %v6361_v11, %v6362_v62 }
  0xfb   :  { %3723 = vmatmul.mubr.msk.bf16.gmra.mrb[52].mxu0 %vm409_vm0, %v356_v26  ;;  %v279_v26 = vmul.f32 %v4758_v24, %v4758_v24 }
  0xfc   :  { %3726 = vmatprep.mubr.msk.bf16.mxu0 %vm409_vm0, %v357_v27  ;;  %v280_v27 = vmul.f32 %v4761_v42, %v4761_v42 }
  0xfe   :  { %v364_v32 = vpack.c.bf16 %v280_v27, %v279_v26  ;;  %v297_v26 = vmul.f32 %v4829_v59, %v4829_v59  ;;  %v298_v27 = vmul.f32 %v4832_v49, %v4832_v49 }
 0x103   :  { %3727 = vmatmul.mubr.msk.bf16.gmra.mrb[56].mxu0 %vm409_vm0, %v358_v50  ;;  %v6352_v50 = vld [vmem:[#allocation25_spill] sm:$0xff] }
 0x104   :  { %3730 = vmatprep.mubr.msk.bf16.mxu0 %vm409_vm0, %v359_v40  ;;  %v6353_v40 = vld [vmem:[#allocation24_spill] sm:$0xff] }
 0x105   :  { %v6354_v47 = vpack.c.bf16 %v6352_v50, %v6353_v40  ;;  %v301_v50 = vmul.f32 %v4867_v2, %v4867_v2  ;;  %v302_v40 = vmul.f32 %v4870_v61, %v4870_v61 }
 0x107   :  { %v375_v51 = vpack.c.bf16 %v302_v40, %v301_v50 }
 0x10b   :  { %3731 = vmatmul.mubr.msk.bf16.gmra.mrb[60].mxu0 %vm409_vm0, %v360_v46  ;;  %v6358_v46 = vld [vmem:[#allocation29_spill] sm:$0xff] }
 0x10c   :  { %3734 = vmatprep.mubr.msk.bf16.mxu0 %vm409_vm0, %v361_v35  ;;  %v6359_v35 = vld [vmem:[#allocation28_spill] sm:$0xff] }
 0x10d   :  { %v6360_v33 = vpack.c.bf16 %v6358_v46, %v6359_v35  ;;  %v6364_v35 = vpack.c.bf16 %v4825_v56, %v4821_v38  ;;  %v385_v56 = vpack.c.bf16 %v322_v54, %v321_v53 }
 0x113   :  { %3735 = vmatmul.mubr.msk.bf16.gmra.mrb[64].mxu0 %vm409_vm0, %v362_v21  ;;  %v295_v21 = vmul.f32 %v4814_v16, %v4814_v16 }
 0x114   :  { %3738 = vmatprep.mubr.msk.bf16.mxu0 %vm409_vm0, %v363_v22  ;;  %v296_v22 = vmul.f32 %v4817_v0, %v4817_v0 }
 0x11b   :  { %3739 = vmatmul.mubr.msk.bf16.gmra.mrb[68].mxu0 %vm409_vm0, %v364_v32  ;;  %v372_v32 = vpack.c.bf16 %v296_v22, %v295_v21 }
 0x11c   :  { %3742 = vmatprep.mubr.msk.bf16.mxu0 %vm409_vm0, %v6349_v36  ;;  %v373_v36 = vpack.c.bf16 %v298_v27, %v297_v26 }
 0x123   :  { %3743 = vmatmul.mubr.msk.bf16.gmra.mrb[72].mxu0 %vm409_vm0, %v6351_v39  ;;  %v300_v39 = vmul.f32 %v4855_v12, %v4855_v12 }
 0x124   :  { %3746 = vmatprep.mubr.msk.bf16.mxu0 %vm409_vm0, %v6354_v47 }
 0x125   :  { %v374_v47 = vpack.c.bf16 %v300_v39, %v299_v37 }
 0x12b   :  { %3747 = vmatmul.mubr.msk.bf16.gmra.mrb[76].mxu0 %vm409_vm0, %v6357_v8  ;;  %v304_v8 = vmul.f32 %v4893_v31, %v4893_v31 }
 0x12c   :  { %3750 = vmatprep.mubr.msk.bf16.mxu0 %vm409_vm0, %v6360_v33  ;;  %v6365_v33 = vpack.c.bf16 %v4840_v58, %v4836_v57 }
 0x12d   :  { %v376_v46 = vpack.c.bf16 %v304_v8, %v303_v52 }
 0x133   :  { %3751 = vmatmul.mubr.msk.bf16.gmra.mrb[80].mxu0 %vm409_vm0, %v6363_v20 }
 0x134   :  { %3754 = vmatprep.mubr.msk.bf16.mxu0 %vm409_vm0, %v371_v43 }
 0x13b   :  { %3755 = vmatmul.mubr.msk.bf16.gmra.mrb[84].mxu0 %vm409_vm0, %v372_v32 }
 0x13c   :  { %3758 = vmatprep.mubr.msk.bf16.mxu0 %vm409_vm0, %v373_v36 }
 0x143   :  { %3759 = vmatmul.mubr.msk.bf16.gmra.mrb[88].mxu0 %vm409_vm0, %v374_v47 }
 0x144   :  { %3762 = vmatprep.mubr.msk.bf16.mxu0 %vm409_vm0, %v375_v51 }
 0x14b   :  { %3763 = vmatmul.mubr.msk.bf16.gmra.mrb[92].mxu0 %vm409_vm0, %v376_v46 }
 0x14c   :  { %3766 = vmatprep.mubr.msk.bf16.mxu0 %vm409_vm0, %v377_v7  ;;  %v320_v7 = vmul.f32 %v4817_v0, %v4620_v15  ;;  %v324_v15 = vmul.f32 %v4855_v12, %v4646_v1  ;;  %v387_v1 = vpack.c.bf16 %v326_v23, %v325_v19 }
 0x14e   :  { %v386_v59 = vpack.c.bf16 %v324_v15, %v323_v14 }
 0x153   :  { %3767 = vmatmul.mubr.msk.bf16.gmra.mrb[96].mxu0 %vm409_vm0, %v378_v44  ;;  %v384_v44 = vpack.c.bf16 %v320_v7, %v319_v6 }
 0x154   :  { %3770 = vmatprep.mubr.msk.bf16.mxu0 %vm409_vm0, %v6364_v35 }
 0x15b   :  { %3771 = vmatmul.mubr.msk.bf16.gmra.mrb[100].mxu0 %vm409_vm0, %v6365_v33 }
 0x15c   :  { %3774 = vmatprep.mubr.msk.bf16.mxu0 %vm409_vm0, %v381_v10 }
 0x163   :  { %3775 = vmatmul.mubr.msk.bf16.gmra.mrb[104].mxu0 %vm409_vm0, %v382_v17 }
 0x164   :  { %3778 = vmatprep.mubr.msk.bf16.mxu0 %vm409_vm0, %v383_v30 }
 0x166   :  { %v3672_v4 = vpop.f32.mrb[0].mxu0 }
 0x167   :  { %v624_v41 = vpop.f32.mrb[1].mxu0 }
 0x168   :  { %v3673_v38 = vpop.f32.mrb[2].mxu0 }
 0x169   :  { %v1104_v57 = vpack.c.bf16 %v3673_v38, %v3672_v4  ;;  %v627_v58 = vpop.f32.mrb[3].mxu0 }
 0x16a   :  { %v1103_v3 = vpack.c.bf16 %v627_v58, %v624_v41 }
 0x16b   :  { %3779 = vmatmul.mubr.msk.bf16.gmra.mrb[108].mxu0 %vm409_vm0, %v384_v44 }
 0x16c   :  { %3790 = vmatprep.subr.bf16.mxu1 %v1103_v3  ;;  %3782 = vmatprep.mubr.msk.bf16.mxu0 %vm409_vm0, %v385_v56 }
 0x16d   :  { %3791 = vmatpush3.bf16.msra.mxu1 %v1103_v3 }
 0x16e   :  { %v3676_v16 = vpop.f32.mrb[4].mxu0  ;;  %3792 = vmatprep.subr.bf16.mxu1 %v1104_v57 }
 0x16f   :  { %v640_v0 = vpop.f32.mrb[5].mxu0 }
 0x170   :  { %v3677_v49 = vpop.f32.mrb[6].mxu0 }
 0x171   :  { %v1106_v60 = vpack.c.bf16 %v3677_v49, %v3676_v16  ;;  %v643_v28 = vpop.f32.mrb[7].mxu0  ;;  %3793 = vmatpush3.bf16.msra.mxu1 %v1104_v57 }
 0x172   :  { %v1105_v12 = vpack.c.bf16 %v643_v28, %v640_v0 }
 0x173   :  { %3783 = vmatmul.mubr.msk.bf16.gmra.mrb[112].mxu0 %vm409_vm0, %v386_v59 }
 0x174   :  { %3795 = vmatmul.mubr.msk.bf16.vlgmr.msra.gmra.mrb[0].mxu1 %vm409_vm0, %v5062_v63  ;;  %3798 = vmatprep.subr.bf16.mxu1 %v1105_v12 }
 0x175   :  { %3799 = vmatpush3.bf16.msra.mxu1 %v1105_v12  ;;  %3786 = vmatprep.mubr.msk.bf16.mxu0 %vm409_vm0, %v387_v1 }
 0x176   :  { %v3680_v2 = vpop.f32.mrb[8].mxu0  ;;  %3800 = vmatprep.subr.bf16.mxu1 %v1106_v60  ;;  %3802 = vmatprep.mubr.msk.bf16.mxu1 %vm409_vm0, %v4907_v29 }
 0x177   :  { %v656_v61 = vpop.f32.mrb[9].mxu0 }
 0x178   :  { %v3681_v13 = vpop.f32.mrb[10].mxu0 }
 0x179   :  { %v1108_v10 = vpack.c.bf16 %v3681_v13, %v3680_v2  ;;  %v659_v24 = vpop.f32.mrb[11].mxu0  ;;  %3801 = vmatpush3.bf16.msra.mxu1 %v1106_v60 }
 0x17a   :  { %v1107_v17 = vpack.c.bf16 %v659_v24, %v656_v61 }
 0x17b   :  { %3787 = vmatmul.mubr.msk.bf16.gmra.mrb[116].mxu0 %vm409_vm0, %v388_v9 }
 0x17c   :  { %3803 = vmatmul.mubr.msk.bf16.vlgmr.msra.gmra.mrb[4].mxu1 %vm409_vm0, %v5062_v63  ;;  %3806 = vmatprep.subr.bf16.mxu1 %v1107_v17 }
 0x17d   :  { %3807 = vmatpush3.bf16.msra.mxu1 %v1107_v17  ;;  %3810 = vmatprep.mubr.msk.bf16.mxu1 %vm409_vm0, %v4907_v29 }
 0x17e   :  { %v3684_v42 = vpop.f32.mrb[12].mxu0  ;;  %3808 = vmatprep.subr.bf16.mxu1 %v1108_v10 }
 0x17f   :  { %v672_v25 = vpop.f32.mrb[13].mxu0 }
 0x180   :  { %v3685_v31 = vpop.f32.mrb[14].mxu0 }
 0x181   :  { %v1110_v18 = vpack.c.bf16 %v3685_v31, %v3684_v42  ;;  %v675_v34 = vpop.f32.mrb[15].mxu0  ;;  %3809 = vmatpush3.bf16.msra.mxu1 %v1108_v10 }
 0x182   :  { %v1109_v43 = vpack.c.bf16 %v675_v34, %v672_v25 }
 0x184   :  { %3811 = vmatmul.mubr.msk.bf16.vlgmr.msra.gmra.mrb[8].mxu1 %vm409_vm0, %v5062_v63  ;;  %3814 = vmatprep.subr.bf16.mxu1 %v1109_v43 }
 0x185   :  { %3815 = vmatpush3.bf16.msra.mxu1 %v1109_v43  ;;  %3818 = vmatprep.mubr.msk.bf16.mxu1 %vm409_vm0, %v4907_v29 }
 0x186   :  { %v3688_v11 = vpop.f32.mrb[16].mxu0  ;;  %3816 = vmatprep.subr.bf16.mxu1 %v1110_v18 }
 0x187   :  { %v688_v62 = vpop.f32.mrb[17].mxu0 }
 0x188   :  { %v3689_v20 = vpop.f32.mrb[18].mxu0 }
 0x189   :  { %v1112_v21 = vpack.c.bf16 %v3689_v20, %v3688_v11  ;;  %v691_v22 = vpop.f32.mrb[19].mxu0  ;;  %3817 = vmatpush3.bf16.msra.mxu1 %v1110_v18 }
 0x18a   :  { %v1111_v26 = vpack.c.bf16 %v691_v22, %v688_v62 }
 0x18c   :  { %3819 = vmatmul.mubr.msk.bf16.vlgmr.msra.gmra.mrb[12].mxu1 %vm409_vm0, %v5062_v63  ;;  %3822 = vmatprep.subr.bf16.mxu1 %v1111_v26 }
 0x18d   :  { %3823 = vmatpush3.bf16.msra.mxu1 %v1111_v26  ;;  %3826 = vmatprep.mubr.msk.bf16.mxu1 %vm409_vm0, %v4907_v29 }
 0x18e   :  { %v3692_v27 = vpop.f32.mrb[20].mxu0  ;;  %3824 = vmatprep.subr.bf16.mxu1 %v1112_v21 }
 0x18f   :  { %v704_v32 = vpop.f32.mrb[21].mxu0 }
 0x190   :  { %v3693_v36 = vpop.f32.mrb[22].mxu0 }
 0x191   :  { %v1114_v37 = vpack.c.bf16 %v3693_v36, %v3692_v27  ;;  %v707_v39 = vpop.f32.mrb[23].mxu0  ;;  %3825 = vmatpush3.bf16.msra.mxu1 %v1112_v21 }
 0x192   :  { %v1113_v50 = vpack.c.bf16 %v707_v39, %v704_v32 }
 0x194   :  { %3827 = vmatmul.mubr.msk.bf16.vlgmr.msra.gmra.mrb[16].mxu1 %vm409_vm0, %v5062_v63  ;;  %3830 = vmatprep.subr.bf16.mxu1 %v1113_v50 }
 0x195   :  { %3831 = vmatpush3.bf16.msra.mxu1 %v1113_v50  ;;  %3834 = vmatprep.mubr.msk.bf16.mxu1 %vm409_vm0, %v4907_v29 }
 0x196   :  { %v3696_v40 = vpop.f32.mrb[24].mxu0  ;;  %3832 = vmatprep.subr.bf16.mxu1 %v1114_v37 }
 0x197   :  { %v720_v47 = vpop.f32.mrb[25].mxu0 }
 0x198   :  { %v3697_v51 = vpop.f32.mrb[26].mxu0 }
 0x199   :  { %v1116_v52 = vpack.c.bf16 %v3697_v51, %v3696_v40  ;;  %v723_v8 = vpop.f32.mrb[27].mxu0  ;;  %3833 = vmatpush3.bf16.msra.mxu1 %v1114_v37 }
 0x19a   :  { %v1115_v46 = vpack.c.bf16 %v723_v8, %v720_v47 }
 0x19c   :  { %3835 = vmatmul.mubr.msk.bf16.vlgmr.msra.gmra.mrb[20].mxu1 %vm409_vm0, %v5062_v63  ;;  %3838 = vmatprep.subr.bf16.mxu1 %v1115_v46 }
 0x19d   :  { %3839 = vmatpush3.bf16.msra.mxu1 %v1115_v46  ;;  %3842 = vmatprep.mubr.msk.bf16.mxu1 %vm409_vm0, %v4907_v29 }
 0x19e   :  { %v3700_v35 = vpop.f32.mrb[28].mxu0  ;;  %3840 = vmatprep.subr.bf16.mxu1 %v1116_v52 }
 0x19f   :  { %v736_v33 = vpop.f32.mrb[29].mxu0 }
 0x1a0   :  { %v3701_v48 = vpop.f32.mrb[30].mxu0 }
 0x1a1   :  { %v1118_v55 = vpack.c.bf16 %v3701_v48, %v3700_v35  ;;  %v739_v30 = vpop.f32.mrb[31].mxu0  ;;  %3841 = vmatpush3.bf16.msra.mxu1 %v1116_v52 }
 0x1a2   :  { %v1117_v6 = vpack.c.bf16 %v739_v30, %v736_v33 }
 0x1a4   :  { %3843 = vmatmul.mubr.msk.bf16.vlgmr.msra.gmra.mrb[24].mxu1 %vm409_vm0, %v5062_v63  ;;  %3846 = vmatprep.subr.bf16.mxu1 %v1117_v6 }
 0x1a5   :  { %3847 = vmatpush3.bf16.msra.mxu1 %v1117_v6  ;;  %3850 = vmatprep.mubr.msk.bf16.mxu1 %vm409_vm0, %v4907_v29 }
 0x1a6   :  { %v3704_v7 = vpop.f32.mrb[32].mxu0  ;;  %3848 = vmatprep.subr.bf16.mxu1 %v1118_v55 }
 0x1a7   :  { %v752_v53 = vpop.f32.mrb[33].mxu0 }
 0x1a8   :  { %v3705_v54 = vpop.f32.mrb[34].mxu0 }
 0x1a9   :  { %v1120_v4 = vpack.c.bf16 %v3705_v54, %v3704_v7  ;;  %v755_v41 = vpop.f32.mrb[35].mxu0  ;;  %3849 = vmatpush3.bf16.msra.mxu1 %v1118_v55 }
 0x1aa   :  { %v1119_v44 = vpack.c.bf16 %v755_v41, %v752_v53 }
 0x1ac   :  { %3851 = vmatmul.mubr.msk.bf16.vlgmr.msra.gmra.mrb[28].mxu1 %vm409_vm0, %v5062_v63  ;;  %3854 = vmatprep.subr.bf16.mxu1 %v1119_v44 }
 0x1ad   :  { %3855 = vmatpush3.bf16.msra.mxu1 %v1119_v44  ;;  %3858 = vmatprep.mubr.msk.bf16.mxu1 %vm409_vm0, %v4907_v29 }
 0x1ae   :  { %v3708_v38 = vpop.f32.mrb[36].mxu0  ;;  %3856 = vmatprep.subr.bf16.mxu1 %v1120_v4 }
 0x1af   :  { %v768_v56 = vpop.f32.mrb[37].mxu0 }
 0x1b0   :  { %v3709_v57 = vpop.f32.mrb[38].mxu0 }
 0x1b1   :  { %v1122_v58 = vpack.c.bf16 %v3709_v57, %v3708_v38  ;;  %v771_v3 = vpop.f32.mrb[39].mxu0  ;;  %3857 = vmatpush3.bf16.msra.mxu1 %v1120_v4 }
 0x1b2   :  { %v1121_v14 = vpack.c.bf16 %v771_v3, %v768_v56 }
 0x1b4   :  { %3859 = vmatmul.mubr.msk.bf16.vlgmr.msra.gmra.mrb[32].mxu1 %vm409_vm0, %v5062_v63  ;;  %3862 = vmatprep.subr.bf16.mxu1 %v1121_v14 }
 0x1b5   :  { %3863 = vmatpush3.bf16.msra.mxu1 %v1121_v14  ;;  %3866 = vmatprep.mubr.msk.bf16.mxu1 %vm409_vm0, %v4907_v29 }
 0x1b6   :  { %v3712_v15 = vpop.f32.mrb[40].mxu0  ;;  %3864 = vmatprep.subr.bf16.mxu1 %v1122_v58 }
 0x1b7   :  { %v784_v19 = vpop.f32.mrb[41].mxu0 }
 0x1b8   :  { %v3713_v23 = vpop.f32.mrb[42].mxu0 }
 0x1b9   :  { %v1124_v16 = vpack.c.bf16 %v3713_v23, %v3712_v15  ;;  %v787_v0 = vpop.f32.mrb[43].mxu0  ;;  %3865 = vmatpush3.bf16.msra.mxu1 %v1122_v58 }
 0x1ba   :  { %v1123_v59 = vpack.c.bf16 %v787_v0, %v784_v19 }
 0x1bc   :  { %3867 = vmatmul.mubr.msk.bf16.vlgmr.msra.gmra.mrb[36].mxu1 %vm409_vm0, %v5062_v63  ;;  %3870 = vmatprep.subr.bf16.mxu1 %v1123_v59 }
 0x1bd   :  { %3871 = vmatpush3.bf16.msra.mxu1 %v1123_v59  ;;  %3874 = vmatprep.mubr.msk.bf16.mxu1 %vm409_vm0, %v4907_v29 }
 0x1be   :  { %v3716_v49 = vpop.f32.mrb[44].mxu0  ;;  %3872 = vmatprep.subr.bf16.mxu1 %v1124_v16 }
 0x1bf   :  { %v800_v60 = vpop.f32.mrb[45].mxu0 }
 0x1c0   :  { %v3717_v28 = vpop.f32.mrb[46].mxu0 }
 0x1c1   :  { %v1126_v1 = vpack.c.bf16 %v3717_v28, %v3716_v49  ;;  %v803_v12 = vpop.f32.mrb[47].mxu0  ;;  %3873 = vmatpush3.bf16.msra.mxu1 %v1124_v16 }
 0x1c2   :  { %v1125_v5 = vpack.c.bf16 %v803_v12, %v800_v60 }
 0x1c4   :  { %3875 = vmatmul.mubr.msk.bf16.vlgmr.msra.gmra.mrb[40].mxu1 %vm409_vm0, %v5062_v63  ;;  %3878 = vmatprep.subr.bf16.mxu1 %v1125_v5 }
 0x1c5   :  { %3879 = vmatpush3.bf16.msra.mxu1 %v1125_v5  ;;  %3882 = vmatprep.mubr.msk.bf16.mxu1 %vm409_vm0, %v4907_v29 }
 0x1c6   :  { %v3720_v45 = vpop.f32.mrb[48].mxu0  ;;  %3880 = vmatprep.subr.bf16.mxu1 %v1126_v1 }
 0x1c7   :  { %v816_v2 = vpop.f32.mrb[49].mxu0 }
 0x1c8   :  { %v3721_v61 = vpop.f32.mrb[50].mxu0 }
 0x1c9   :  { %v1128_v9 = vpack.c.bf16 %v3721_v61, %v3720_v45  ;;  %v819_v13 = vpop.f32.mrb[51].mxu0  ;;  %3881 = vmatpush3.bf16.msra.mxu1 %v1126_v1 }
 0x1ca   :  { %v1127_v10 = vpack.c.bf16 %v819_v13, %v816_v2 }
 0x1cc   :  { %3883 = vmatmul.mubr.msk.bf16.vlgmr.msra.gmra.mrb[44].mxu1 %vm409_vm0, %v5062_v63  ;;  %3886 = vmatprep.subr.bf16.mxu1 %v1127_v10 }
 0x1cd   :  { %3887 = vmatpush3.bf16.msra.mxu1 %v1127_v10  ;;  %3890 = vmatprep.mubr.msk.bf16.mxu1 %vm409_vm0, %v4907_v29 }
 0x1ce   :  { %v3724_v24 = vpop.f32.mrb[52].mxu0  ;;  %3888 = vmatprep.subr.bf16.mxu1 %v1128_v9 }
 0x1cf   :  { %v832_v17 = vpop.f32.mrb[53].mxu0 }
 0x1d0   :  { %v3725_v42 = vpop.f32.mrb[54].mxu0 }
 0x1d1   :  { %v1130_v25 = vpack.c.bf16 %v3725_v42, %v3724_v24  ;;  %v835_v31 = vpop.f32.mrb[55].mxu0  ;;  %3889 = vmatpush3.bf16.msra.mxu1 %v1128_v9 }
 0x1d2   :  { %v1129_v18 = vpack.c.bf16 %v835_v31, %v832_v17 }
 0x1d4   :  { %3891 = vmatmul.mubr.msk.bf16.vlgmr.msra.gmra.mrb[48].mxu1 %vm409_vm0, %v5062_v63  ;;  %3894 = vmatprep.subr.bf16.mxu1 %v1129_v18 }
 0x1d5   :  { %3895 = vmatpush3.bf16.msra.mxu1 %v1129_v18  ;;  %3898 = vmatprep.mubr.msk.bf16.mxu1 %vm409_vm0, %v4907_v29 }
 0x1d6   :  { %v3728_v34 = vpop.f32.mrb[56].mxu0  ;;  %3896 = vmatprep.subr.bf16.mxu1 %v1130_v25 }
 0x1d7   :  { %v848_v43 = vpop.f32.mrb[57].mxu0 }
 0x1d8   :  { %v3729_v11 = vpop.f32.mrb[58].mxu0 }
 0x1d9   :  { %v1132_v62 = vpack.c.bf16 %v3729_v11, %v3728_v34  ;;  %v851_v20 = vpop.f32.mrb[59].mxu0  ;;  %3897 = vmatpush3.bf16.msra.mxu1 %v1130_v25 }
 0x1da   :  { %v1131_v21 = vpack.c.bf16 %v851_v20, %v848_v43 }
 0x1dc   :  { %3899 = vmatmul.mubr.msk.bf16.vlgmr.msra.gmra.mrb[52].mxu1 %vm409_vm0, %v5062_v63  ;;  %3902 = vmatprep.subr.bf16.mxu1 %v1131_v21 }
 0x1dd   :  { %3903 = vmatpush3.bf16.msra.mxu1 %v1131_v21  ;;  %3906 = vmatprep.mubr.msk.bf16.mxu1 %vm409_vm0, %v4907_v29 }
 0x1de   :  { %v3732_v22 = vpop.f32.mrb[60].mxu0  ;;  %3904 = vmatprep.subr.bf16.mxu1 %v1132_v62 }
 0x1df   :  { %v864_v26 = vpop.f32.mrb[61].mxu0 }
 0x1e0   :  { %v3733_v27 = vpop.f32.mrb[62].mxu0 }
 0x1e1   :  { %v1134_v32 = vpack.c.bf16 %v3733_v27, %v3732_v22  ;;  %v867_v36 = vpop.f32.mrb[63].mxu0  ;;  %3905 = vmatpush3.bf16.msra.mxu1 %v1132_v62 }
 0x1e2   :  { %v1133_v37 = vpack.c.bf16 %v867_v36, %v864_v26 }
 0x1e4   :  { %3907 = vmatmul.mubr.msk.bf16.vlgmr.msra.gmra.mrb[56].mxu1 %vm409_vm0, %v5062_v63  ;;  %3910 = vmatprep.subr.bf16.mxu1 %v1133_v37 }
 0x1e5   :  { %3911 = vmatpush3.bf16.msra.mxu1 %v1133_v37  ;;  %3914 = vmatprep.mubr.msk.bf16.mxu1 %vm409_vm0, %v4907_v29 }
 0x1e6   :  { %v3736_v39 = vpop.f32.mrb[64].mxu0  ;;  %3912 = vmatprep.subr.bf16.mxu1 %v1134_v32 }
 0x1e7   :  { %v880_v50 = vpop.f32.mrb[65].mxu0 }
 0x1e8   :  { %v3737_v40 = vpop.f32.mrb[66].mxu0 }
 0x1e9   :  { %v1136_v47 = vpack.c.bf16 %v3737_v40, %v3736_v39  ;;  %v883_v51 = vpop.f32.mrb[67].mxu0  ;;  %3913 = vmatpush3.bf16.msra.mxu1 %v1134_v32 }
 0x1ea   :  { %v1135_v52 = vpack.c.bf16 %v883_v51, %v880_v50 }
 0x1ec   :  { %3915 = vmatmul.mubr.msk.bf16.vlgmr.msra.gmra.mrb[60].mxu1 %vm409_vm0, %v5062_v63  ;;  %3918 = vmatprep.subr.bf16.mxu1 %v1135_v52 }
 0x1ed   :  { %3919 = vmatpush3.bf16.msra.mxu1 %v1135_v52  ;;  %3922 = vmatprep.mubr.msk.bf16.mxu1 %vm409_vm0, %v4907_v29 }
 0x1ee   :  { %v3740_v8 = vpop.f32.mrb[68].mxu0  ;;  %3920 = vmatprep.subr.bf16.mxu1 %v1136_v47 }
 0x1ef   :  { %v896_v46 = vpop.f32.mrb[69].mxu0 }
 0x1f0   :  { %v3741_v35 = vpop.f32.mrb[70].mxu0 }
 0x1f1   :  { %v1138_v33 = vpack.c.bf16 %v3741_v35, %v3740_v8  ;;  %v899_v48 = vpop.f32.mrb[71].mxu0  ;;  %3921 = vmatpush3.bf16.msra.mxu1 %v1136_v47 }
 0x1f2   :  { %v1137_v55 = vpack.c.bf16 %v899_v48, %v896_v46 }
 0x1f4   :  { %3923 = vmatmul.mubr.msk.bf16.vlgmr.msra.gmra.mrb[64].mxu1 %vm409_vm0, %v5062_v63  ;;  %3926 = vmatprep.subr.bf16.mxu1 %v1137_v55 }
 0x1f5   :  { %3927 = vmatpush3.bf16.msra.mxu1 %v1137_v55  ;;  %3930 = vmatprep.mubr.msk.bf16.mxu1 %vm409_vm0, %v4907_v29 }
 0x1f6   :  { %v3744_v30 = vpop.f32.mrb[72].mxu0  ;;  %3928 = vmatprep.subr.bf16.mxu1 %v1138_v33 }
 0x1f7   :  { %v912_v6 = vpop.f32.mrb[73].mxu0 }
 0x1f8   :  { %v3745_v7 = vpop.f32.mrb[74].mxu0 }
 0x1f9   :  { %v1140_v53 = vpack.c.bf16 %v3745_v7, %v3744_v30  ;;  %v915_v54 = vpop.f32.mrb[75].mxu0  ;;  %3929 = vmatpush3.bf16.msra.mxu1 %v1138_v33 }
 0x1fa   :  { %v1139_v4 = vpack.c.bf16 %v915_v54, %v912_v6 }
 0x1fc   :  { %3931 = vmatmul.mubr.msk.bf16.vlgmr.msra.gmra.mrb[68].mxu1 %vm409_vm0, %v5062_v63  ;;  %3934 = vmatprep.subr.bf16.mxu1 %v1139_v4 }
 0x1fd   :  { %3935 = vmatpush3.bf16.msra.mxu1 %v1139_v4  ;;  %3938 = vmatprep.mubr.msk.bf16.mxu1 %vm409_vm0, %v4907_v29 }
 0x1fe   :  { %v3748_v41 = vpop.f32.mrb[76].mxu0  ;;  %3936 = vmatprep.subr.bf16.mxu1 %v1140_v53 }
 0x1ff   :  { %v928_v44 = vpop.f32.mrb[77].mxu0 }
 0x200   :  { %v3749_v38 = vpop.f32.mrb[78].mxu0 }
 0x201   :  { %v1142_v56 = vpack.c.bf16 %v3749_v38, %v3748_v41  ;;  %v931_v57 = vpop.f32.mrb[79].mxu0  ;;  %3937 = vmatpush3.bf16.msra.mxu1 %v1140_v53 }
 0x202   :  { %v1141_v58 = vpack.c.bf16 %v931_v57, %v928_v44 }
 0x204   :  { %3939 = vmatmul.mubr.msk.bf16.vlgmr.msra.gmra.mrb[72].mxu1 %vm409_vm0, %v5062_v63  ;;  %3942 = vmatprep.subr.bf16.mxu1 %v1141_v58 }
 0x205   :  { %3943 = vmatpush3.bf16.msra.mxu1 %v1141_v58  ;;  %3946 = vmatprep.mubr.msk.bf16.mxu1 %vm409_vm0, %v4907_v29 }
 0x206   :  { %v3752_v3 = vpop.f32.mrb[80].mxu0  ;;  %3944 = vmatprep.subr.bf16.mxu1 %v1142_v56 }
 0x207   :  { %v944_v14 = vpop.f32.mrb[81].mxu0 }
 0x208   :  { %v3753_v15 = vpop.f32.mrb[82].mxu0 }
 0x209   :  { %v1144_v19 = vpack.c.bf16 %v3753_v15, %v3752_v3  ;;  %v947_v23 = vpop.f32.mrb[83].mxu0  ;;  %3945 = vmatpush3.bf16.msra.mxu1 %v1142_v56 }
 0x20a   :  { %v1143_v16 = vpack.c.bf16 %v947_v23, %v944_v14 }
 0x20c   :  { %3947 = vmatmul.mubr.msk.bf16.vlgmr.msra.gmra.mrb[76].mxu1 %vm409_vm0, %v5062_v63  ;;  %3950 = vmatprep.subr.bf16.mxu1 %v1143_v16 }
 0x20d   :  { %3951 = vmatpush3.bf16.msra.mxu1 %v1143_v16  ;;  %3954 = vmatprep.mubr.msk.bf16.mxu1 %vm409_vm0, %v4907_v29 }
 0x20e   :  { %v3756_v0 = vpop.f32.mrb[84].mxu0  ;;  %3952 = vmatprep.subr.bf16.mxu1 %v1144_v19 }
 0x20f   :  { %v960_v59 = vpop.f32.mrb[85].mxu0 }
 0x210   :  { %v3757_v49 = vpop.f32.mrb[86].mxu0 }
 0x211   :  { %v1146_v60 = vpack.c.bf16 %v3757_v49, %v3756_v0  ;;  %v963_v28 = vpop.f32.mrb[87].mxu0  ;;  %3953 = vmatpush3.bf16.msra.mxu1 %v1144_v19 }
 0x212   :  { %v1145_v1 = vpack.c.bf16 %v963_v28, %v960_v59 }
 0x214   :  { %3955 = vmatmul.mubr.msk.bf16.vlgmr.msra.gmra.mrb[80].mxu1 %vm409_vm0, %v5062_v63  ;;  %3958 = vmatprep.subr.bf16.mxu1 %v1145_v1 }
 0x215   :  { %3959 = vmatpush3.bf16.msra.mxu1 %v1145_v1  ;;  %3962 = vmatprep.mubr.msk.bf16.mxu1 %vm409_vm0, %v4907_v29 }
 0x216   :  { %v3760_v12 = vpop.f32.mrb[88].mxu0  ;;  %3960 = vmatprep.subr.bf16.mxu1 %v1146_v60 }
 0x217   :  { %v976_v5 = vpop.f32.mrb[89].mxu0 }
 0x218   :  { %v3761_v45 = vpop.f32.mrb[90].mxu0 }
 0x219   :  { %v1148_v2 = vpack.c.bf16 %v3761_v45, %v3760_v12  ;;  %v979_v61 = vpop.f32.mrb[91].mxu0  ;;  %3961 = vmatpush3.bf16.msra.mxu1 %v1146_v60 }
 0x21a   :  { %v1147_v9 = vpack.c.bf16 %v979_v61, %v976_v5 }
 0x21c   :  { %3963 = vmatmul.mubr.msk.bf16.vlgmr.msra.gmra.mrb[84].mxu1 %vm409_vm0, %v5062_v63  ;;  %3966 = vmatprep.subr.bf16.mxu1 %v1147_v9 }
 0x21d   :  { %3967 = vmatpush3.bf16.msra.mxu1 %v1147_v9  ;;  %3970 = vmatprep.mubr.msk.bf16.mxu1 %vm409_vm0, %v4907_v29 }
 0x21e   :  { %v3764_v13 = vpop.f32.mrb[92].mxu0  ;;  %3968 = vmatprep.subr.bf16.mxu1 %v1148_v2 }
 0x21f   :  { %v992_v10 = vpop.f32.mrb[93].mxu0 }
 0x220   :  { %v3765_v24 = vpop.f32.mrb[94].mxu0 }
 0x221   :  { %v1150_v17 = vpack.c.bf16 %v3765_v24, %v3764_v13  ;;  %v995_v42 = vpop.f32.mrb[95].mxu0  ;;  %3969 = vmatpush3.bf16.msra.mxu1 %v1148_v2  ;;  %v5221_v24 = vld [vmem:[#allocation12 + $0x10] sm:$0xff] }
 0x222   :  { %v1149_v25 = vpack.c.bf16 %v995_v42, %v992_v10  ;;  %v5225_v42 = vld [vmem:[#allocation12 + $0x18] sm:$0xff] }
 0x224   :  { %3971 = vmatmul.mubr.msk.bf16.vlgmr.msra.gmra.mrb[88].mxu1 %vm409_vm0, %v5062_v63  ;;  %3974 = vmatprep.subr.bf16.mxu1 %v1149_v25 }
 0x225   :  { %3975 = vmatpush3.bf16.msra.mxu1 %v1149_v25  ;;  %3978 = vmatprep.mubr.msk.bf16.mxu1 %vm409_vm0, %v4907_v29 }
 0x226   :  { %v3768_v31 = vpop.f32.mrb[96].mxu0  ;;  %3976 = vmatprep.subr.bf16.mxu1 %v1150_v17 }
 0x227   :  { %v1008_v18 = vpop.f32.mrb[97].mxu0 }
 0x228   :  { %v3769_v34 = vpop.f32.mrb[98].mxu0 }
 0x229   :  { %v1152_v43 = vpack.c.bf16 %v3769_v34, %v3768_v31  ;;  %v1011_v11 = vpop.f32.mrb[99].mxu0  ;;  %3977 = vmatpush3.bf16.msra.mxu1 %v1150_v17  ;;  %v5223_v17 = vld [vmem:[#allocation12] sm:$0xff]  ;;  %v5228_v31 = vld [vmem:[#allocation12 + $0x8] sm:$0xff] }
 0x22a   :  { %v1151_v62 = vpack.c.bf16 %v1011_v11, %v1008_v18 }
 0x22c   :  { %3979 = vmatmul.mubr.msk.bf16.vlgmr.msra.gmra.mrb[92].mxu1 %vm409_vm0, %v5062_v63  ;;  %3982 = vmatprep.subr.bf16.mxu1 %v1151_v62 }
 0x22d   :  { %3983 = vmatpush3.bf16.msra.mxu1 %v1151_v62  ;;  %3986 = vmatprep.mubr.msk.bf16.mxu1 %vm409_vm0, %v4907_v29 }
 0x22e   :  { %v3772_v20 = vpop.f32.mrb[100].mxu0  ;;  %3984 = vmatprep.subr.bf16.mxu1 %v1152_v43 }
 0x22f   :  { %v1024_v21 = vpop.f32.mrb[101].mxu0 }
 0x230   :  { %v3773_v22 = vpop.f32.mrb[102].mxu0 }
 0x231   :  { %v1154_v26 = vpack.c.bf16 %v3773_v22, %v3772_v20  ;;  %v1027_v27 = vpop.f32.mrb[103].mxu0  ;;  %3985 = vmatpush3.bf16.msra.mxu1 %v1152_v43 }
 0x232   :  { %v1153_v32 = vpack.c.bf16 %v1027_v27, %v1024_v21 }
 0x234   :  { %3987 = vmatmul.mubr.msk.bf16.vlgmr.msra.gmra.mrb[96].mxu1 %vm409_vm0, %v5062_v63  ;;  %3990 = vmatprep.subr.bf16.mxu1 %v1153_v32 }
 0x235   :  { %3991 = vmatpush3.bf16.msra.mxu1 %v1153_v32  ;;  %3994 = vmatprep.mubr.msk.bf16.mxu1 %vm409_vm0, %v4907_v29 }
 0x236   :  { %v3776_v36 = vpop.f32.mrb[104].mxu0  ;;  %3992 = vmatprep.subr.bf16.mxu1 %v1154_v26 }
 0x237   :  { %v1040_v37 = vpop.f32.mrb[105].mxu0 }
 0x238   :  { %v3777_v39 = vpop.f32.mrb[106].mxu0 }
 0x239   :  { %v1156_v50 = vpack.c.bf16 %v3777_v39, %v3776_v36  ;;  %v1043_v40 = vpop.f32.mrb[107].mxu0  ;;  %3993 = vmatpush3.bf16.msra.mxu1 %v1154_v26 }
 0x23a   :  { %v1155_v47 = vpack.c.bf16 %v1043_v40, %v1040_v37 }
 0x23c   :  { %3995 = vmatmul.mubr.msk.bf16.vlgmr.msra.gmra.mrb[100].mxu1 %vm409_vm0, %v5062_v63  ;;  %3998 = vmatprep.subr.bf16.mxu1 %v1155_v47 }
 0x23d   :  { %3999 = vmatpush3.bf16.msra.mxu1 %v1155_v47  ;;  %4002 = vmatprep.mubr.msk.bf16.mxu1 %vm409_vm0, %v4907_v29 }
 0x23e   :  { %v3780_v51 = vpop.f32.mrb[108].mxu0  ;;  %4000 = vmatprep.subr.bf16.mxu1 %v1156_v50 }
 0x23f   :  { %v1056_v52 = vpop.f32.mrb[109].mxu0 }
 0x240   :  { %v3781_v8 = vpop.f32.mrb[110].mxu0 }
 0x241   :  { %v1158_v46 = vpack.c.bf16 %v3781_v8, %v3780_v51  ;;  %v1059_v35 = vpop.f32.mrb[111].mxu0  ;;  %4001 = vmatpush3.bf16.msra.mxu1 %v1156_v50 }
 0x242   :  { %v1157_v33 = vpack.c.bf16 %v1059_v35, %v1056_v52 }
 0x244   :  { %4003 = vmatmul.mubr.msk.bf16.vlgmr.msra.gmra.mrb[104].mxu1 %vm409_vm0, %v5062_v63  ;;  %4006 = vmatprep.subr.bf16.mxu1 %v1157_v33 }
 0x245   :  { %4007 = vmatpush3.bf16.msra.mxu1 %v1157_v33  ;;  %4010 = vmatprep.mubr.msk.bf16.mxu1 %vm409_vm0, %v4907_v29 }
 0x246   :  { %v3784_v48 = vpop.f32.mrb[112].mxu0  ;;  %4008 = vmatprep.subr.bf16.mxu1 %v1158_v46 }
 0x247   :  { %v1072_v55 = vpop.f32.mrb[113].mxu0  ;;  %v3796_v30 = vpop.f32.mrb[0].mxu1 }
 0x248   :  { %v3785_v6 = vpop.f32.mrb[114].mxu0  ;;  %v1213_v7 = vpop.f32.mrb[1].mxu1  ;;  %v2655_v25 = vmul.f32 %v3796_v30, %v5221_v24 }
 0x249   :  { %v1160_v53 = vpack.c.bf16 %v3785_v6, %v3784_v48  ;;  %v1075_v54 = vpop.f32.mrb[115].mxu0  ;;  %v3797_v4 = vpop.f32.mrb[2].mxu1  ;;  %4009 = vmatpush3.bf16.msra.mxu1 %v1158_v46  ;;  %v2653_v18 = vmul.f32 %v5223_v17, %v1213_v7 }
 0x24a   :  { %v1159_v41 = vpack.c.bf16 %v1075_v54, %v1072_v55  ;;  %v1216_v44 = vpop.f32.mrb[3].mxu1  ;;  %v2656_v43 = vmul.f32 %v3797_v4, %v5225_v42  ;;  %v5235_v26 = vmul.f32 %v2655_v25, %v2655_v25 }
 0x24b   :  { %v2654_v20 = vmul.f32 %v5228_v31, %v1216_v44  ;;  %v5242_v39 = vmul.f32 %v2653_v18, %v2653_v18 }
 0x24c   :  { %4011 = vmatmul.mubr.msk.bf16.vlgmr.msra.gmra.mrb[108].mxu1 %vm409_vm0, %v5062_v63  ;;  %4014 = vmatprep.subr.bf16.mxu1 %v1159_v41  ;;  %v5249_v51 = vmul.f32 %v2656_v43, %v2656_v43 }
 0x24d   :  { %4015 = vmatpush3.bf16.msra.mxu1 %v1159_v41  ;;  %4018 = vmatprep.mubr.msk.bf16.mxu1 %vm409_vm0, %v4907_v29  ;;  %v5259_v35 = vmul.f32 %v2654_v20, %v2654_v20 }
 0x24e   :  { %v3788_v38 = vpop.f32.mrb[116].mxu0  ;;  %4016 = vmatprep.subr.bf16.mxu1 %v1160_v53 }
 0x24f   :  { %v1088_v56 = vpop.f32.mrb[117].mxu0  ;;  %v3804_v57 = vpop.f32.mrb[4].mxu1 }
 0x250   :  { %v3789_v58 = vpop.f32.mrb[118].mxu0  ;;  %v1262_v3 = vpop.f32.mrb[5].mxu1  ;;  %v2659_v30 = vmul.f32 %v3804_v57, %v5221_v24 }
 0x251   :  { %v1162_v14 = vpack.c.bf16 %v3789_v58, %v3788_v38  ;;  %v1091_v15 = vpop.f32.mrb[119].mxu0  ;;  %v3805_v19 = vpop.f32.mrb[6].mxu1  ;;  %4017 = vmatpush3.bf16.msra.mxu1 %v1160_v53  ;;  %v2657_v7 = vmul.f32 %v5223_v17, %v1262_v3 }
 0x252   :  { %v1161_v23 = vpack.c.bf16 %v1091_v15, %v1088_v56  ;;  %v1265_v16 = vpop.f32.mrb[7].mxu1  ;;  %v2660_v4 = vmul.f32 %v3805_v19, %v5225_v42  ;;  %v5283_v58 = vmul.f32 %v2659_v30, %v2659_v30 }
 0x253   :  { %v2658_v38 = vmul.f32 %v5228_v31, %v1265_v16 }
 0x254   :  { %4019 = vmatmul.mubr.msk.bf16.vlgmr.msra.gmra.mrb[112].mxu1 %vm409_vm0, %v5062_v63  ;;  %4022 = vmatprep.subr.bf16.mxu1 %v1161_v23  ;;  %6369 = vst [vmem:[#allocation27_spill] sm:$0xff] %v5283_v58 }
 0x255   :  { %4023 = vmatpush3.bf16.msra.mxu1 %v1161_v23  ;;  %4026 = vmatprep.mubr.msk.bf16.mxu1 %vm409_vm0, %v4907_v29 }
 0x256   :  { %4024 = vmatprep.subr.bf16.mxu1 %v1162_v14 }
 0x257   :  { %v5187_v0 = vpop.f32.mrb[8].mxu1 }
 0x258   :  { %v5189_v59 = vpop.f32.mrb[9].mxu1 }
 0x259   :  { %v5191_v49 = vpop.f32.mrb[10].mxu1  ;;  %4025 = vmatpush3.bf16.msra.mxu1 %v1162_v14 }
 0x25a   :  { %v5193_v60 = vpop.f32.mrb[11].mxu1 }
 0x25c   :  { %4027 = vmatmul.mubr.msk.bf16.vlgmr.msra.gmra.mrb[116].mxu1 %vm409_vm0, %v5062_v63 }
 0x25f   :  { %v5197_v28 = vpop.f32.mrb[12].mxu1 }
 0x260   :  { %v5199_v1 = vpop.f32.mrb[13].mxu1 }
 0x261   :  { %v5201_v12 = vpop.f32.mrb[14].mxu1 }
 0x262   :  { %v5203_v29 = vpop.f32.mrb[15].mxu1 }
 0x267   :  { %v5205_v5 = vpop.f32.mrb[16].mxu1 }
 0x268   :  { %v5207_v45 = vpop.f32.mrb[17].mxu1 }
 0x269   :  { %v5209_v2 = vpop.f32.mrb[18].mxu1 }
 0x26a   :  { %v5211_v61 = vpop.f32.mrb[19].mxu1 }
 0x26f   :  { %v5213_v9 = vpop.f32.mrb[20].mxu1 }
 0x270   :  { %v5215_v13 = vpop.f32.mrb[21].mxu1 }
 0x271   :  { %v5217_v63 = vpop.f32.mrb[22].mxu1 }
 0x272   :  { %v5219_v10 = vpop.f32.mrb[23].mxu1 }
 0x277   :  { %v3844_v34 = vpop.f32.mrb[24].mxu1 }
 0x278   :  { %v2679_v11 = vmul.f32 %v3844_v34, %v5221_v24  ;;  %v1507_v62 = vpop.f32.mrb[25].mxu1  ;;  %v5297_v34 = vmul.f32 %v2660_v4, %v2660_v4 }
 0x279   :  { %v2677_v21 = vmul.f32 %v5223_v17, %v1507_v62  ;;  %v3845_v22 = vpop.f32.mrb[26].mxu1 }
 0x27a   :  { %v5237_v27 = vmul.f32 %v2679_v11, %v2679_v11  ;;  %v5239_v32 = vmul.f32 %v2679_v11, %v2655_v25  ;;  %v2680_v36 = vmul.f32 %v3845_v22, %v5225_v42  ;;  %v1510_v37 = vpop.f32.mrb[27].mxu1  ;;  %v5290_v25 = vmul.f32 %v2657_v7, %v2657_v7 }
 0x27b   :  { %v5244_v50 = vmul.f32 %v2677_v21, %v2677_v21  ;;  %v5246_v40 = vmul.f32 %v2677_v21, %v2653_v18  ;;  %v2678_v47 = vmul.f32 %v5228_v31, %v1510_v37  ;;  %v2663_v37 = vmul.f32 %v5187_v0, %v5221_v24 }
 0x27c   :  { %6366 = vst [vmem:[#allocation23_spill] sm:$0xff] %v5239_v32  ;;  %v5253_v52 = vadd.f32 %v5237_v27, %v5235_v26  ;;  %v5255_v8 = vmul.f32 %v2680_v36, %v2680_v36  ;;  %v5257_v46 = vmul.f32 %v2680_v36, %v2656_v43  ;;  %6371 = vst [vmem:[#allocation29_spill] sm:$0xff] %v5290_v25 }
 0x27d   :  { %6367 = vst [vmem:[#allocation25_spill] sm:$0xff] %v5246_v40  ;;  %v5263_v33 = vadd.f32 %v5244_v50, %v5242_v39  ;;  %v5265_v48 = vmul.f32 %v2678_v47, %v2678_v47  ;;  %v5267_v55 = vmul.f32 %v2678_v47, %v2654_v20  ;;  %v5307_v20 = vmul.f32 %v2658_v38, %v2658_v38 }
 0x27e   :  { %6368 = vst [vmem:[#allocation24_spill] sm:$0xff] %v5257_v46  ;;  %v5272_v6 = vadd.f32 %v5255_v8, %v5249_v51  ;;  %v2662_v0 = vmul.f32 %v5228_v31, %v5193_v60 }
 0x27f   :  { %v5277_v53 = vadd.f32 %v5265_v48, %v5259_v35  ;;  %v3852_v54 = vpop.f32.mrb[28].mxu1  ;;  %6373 = vst [vmem:[#allocation31_spill] sm:$0xff] %v5307_v20 }
 0x280   :  { %v2683_v41 = vmul.f32 %v3852_v54, %v5221_v24  ;;  %v1556_v44 = vpop.f32.mrb[29].mxu1 }
 0x281   :  { %v2681_v56 = vmul.f32 %v5223_v17, %v1556_v44  ;;  %v3853_v57 = vpop.f32.mrb[30].mxu1 }
 0x282   :  { %v5285_v14 = vmul.f32 %v2683_v41, %v2683_v41  ;;  %v5287_v3 = vmul.f32 %v2683_v41, %v2659_v30  ;;  %v2684_v15 = vmul.f32 %v3853_v57, %v5225_v42  ;;  %v1559_v23 = vpop.f32.mrb[31].mxu1  ;;  %v2661_v30 = vmul.f32 %v5223_v17, %v5189_v59 }
 0x283   :  { %v5292_v19 = vmul.f32 %v2681_v56, %v2681_v56  ;;  %v5294_v18 = vmul.f32 %v2681_v56, %v2657_v7  ;;  %v2682_v16 = vmul.f32 %v5228_v31, %v1559_v23  ;;  %v5335_v57 = vmul.f32 %v2663_v37, %v2663_v37 }
 0x284   :  { %6370 = vst [vmem:[#allocation26_spill] sm:$0xff] %v5287_v3  ;;  %v5301_v43 = vadd.f32 %v5285_v14, %v5283_v58  ;;  %v5303_v11 = vmul.f32 %v2684_v15, %v2684_v15  ;;  %v5305_v62 = vmul.f32 %v2684_v15, %v2660_v4  ;;  %v2664_v4 = vmul.f32 %v5191_v49, %v5225_v42 }
 0x285   :  { %v5311_v21 = vadd.f32 %v5292_v19, %v5290_v25  ;;  %v5313_v22 = vmul.f32 %v2682_v16, %v2682_v16  ;;  %v5315_v36 = vmul.f32 %v2682_v16, %v2658_v38  ;;  %6378 = vst [vmem:[#allocation35_spill] sm:$0xff] %v5335_v57 }
 0x286   :  { %6372 = vst [vmem:[#allocation28_spill] sm:$0xff] %v5303_v11  ;;  %v5321_v47 = vadd.f32 %v5303_v11, %v5297_v34 }
 0x287   :  { %6374 = vst [vmem:[#allocation30_spill] sm:$0xff] %v5311_v21  ;;  %6375 = vst [vmem:[#allocation32_spill] sm:$0xff] %v5313_v22  ;;  %v5327_v7 = vadd.f32 %v5313_v22, %v5307_v20  ;;  %v3860_v54 = vpop.f32.mrb[32].mxu1  ;;  %v5349_v22 = vmul.f32 %v2664_v4, %v2664_v4 }
 0x288   :  { %6376 = vst [vmem:[#allocation33_spill] sm:$0xff] %v5321_v47  ;;  %v2687_v41 = vmul.f32 %v3860_v54, %v5221_v24  ;;  %v1605_v44 = vpop.f32.mrb[33].mxu1 }
 0x289   :  { %6377 = vst [vmem:[#allocation34_spill] sm:$0xff] %v5327_v7  ;;  %v2685_v38 = vmul.f32 %v5223_v17, %v1605_v44  ;;  %v3861_v56 = vpop.f32.mrb[34].mxu1  ;;  %v5342_v7 = vmul.f32 %v2661_v30, %v2661_v30 }
 0x28a   :  { %v5337_v59 = vmul.f32 %v2687_v41, %v2687_v41  ;;  %v5339_v15 = vmul.f32 %v2687_v41, %v2663_v37  ;;  %v2688_v23 = vmul.f32 %v3861_v56, %v5225_v42  ;;  %v1608_v16 = vpop.f32.mrb[35].mxu1  ;;  %v5359_v41 = vmul.f32 %v2662_v0, %v2662_v0 }
 0x28b   :  { %6380 = vst [vmem:[#allocation37_spill] sm:$0xff] %v5342_v7  ;;  %v5344_v49 = vmul.f32 %v2685_v38, %v2685_v38  ;;  %v5346_v54 = vmul.f32 %v2685_v38, %v2661_v30  ;;  %v2686_v60 = vmul.f32 %v5228_v31, %v1608_v16  ;;  %v2667_v16 = vmul.f32 %v5197_v28, %v5221_v24 }
 0x28c   :  { %6379 = vst [vmem:[#allocation36_spill] sm:$0xff] %v5337_v59  ;;  %v5353_v44 = vadd.f32 %v5337_v59, %v5335_v57  ;;  %v5355_v47 = vmul.f32 %v2688_v23, %v2688_v23  ;;  %v5357_v37 = vmul.f32 %v2688_v23, %v2664_v4  ;;  %6386 = vst [vmem:[#allocation43_spill] sm:$0xff] %v5359_v41 }
 0x28d   :  { %6381 = vst [vmem:[#allocation38_spill] sm:$0xff] %v5344_v49  ;;  %6382 = vst [vmem:[#allocation39_spill] sm:$0xff] %v5346_v54  ;;  %v5363_v56 = vadd.f32 %v5344_v49, %v5342_v7  ;;  %v5365_v30 = vmul.f32 %v2686_v60, %v2686_v60  ;;  %v5367_v38 = vmul.f32 %v2686_v60, %v2662_v0 }
 0x28e   :  { %6383 = vst [vmem:[#allocation40_spill] sm:$0xff] %v5353_v44  ;;  %6384 = vst [vmem:[#allocation41_spill] sm:$0xff] %v5355_v47  ;;  %v5373_v59 = vadd.f32 %v5355_v47, %v5349_v22  ;;  %v2665_v4 = vmul.f32 %v5223_v17, %v5199_v1  ;;  %v2666_v28 = vmul.f32 %v5228_v31, %v5203_v29 }
 0x28f   :  { %6385 = vst [vmem:[#allocation42_spill] sm:$0xff] %v5357_v37  ;;  %6387 = vst [vmem:[#allocation44_spill] sm:$0xff] %v5363_v56  ;;  %v5379_v23 = vadd.f32 %v5365_v30, %v5359_v41  ;;  %v3868_v49 = vpop.f32.mrb[36].mxu1  ;;  %v2668_v56 = vmul.f32 %v5201_v12, %v5225_v42 }
 0x290   :  { %6388 = vst [vmem:[#allocation45_spill] sm:$0xff] %v5365_v30  ;;  %6389 = vst [vmem:[#allocation46_spill] sm:$0xff] %v5367_v38  ;;  %v2691_v0 = vmul.f32 %v3868_v49, %v5221_v24  ;;  %v1654_v60 = vpop.f32.mrb[37].mxu1  ;;  %v5387_v38 = vmul.f32 %v2667_v16, %v2667_v16  ;;  %v5394_v44 = vmul.f32 %v2665_v4, %v2665_v4 }
 0x291   :  { %6390 = vst [vmem:[#allocation47_spill] sm:$0xff] %v5373_v59  ;;  %6391 = vst [vmem:[#allocation48_spill] sm:$0xff] %v5379_v23  ;;  %v2689_v47 = vmul.f32 %v5223_v17, %v1654_v60  ;;  %v3869_v59 = vpop.f32.mrb[38].mxu1  ;;  %v5401_v54 = vmul.f32 %v2668_v56, %v2668_v56 }
 0x292   :  { %6392 = vst [vmem:[#allocation49_spill] sm:$0xff] %v5387_v38  ;;  %v5389_v1 = vmul.f32 %v2691_v0, %v2691_v0  ;;  %v5391_v37 = vmul.f32 %v2691_v0, %v2667_v16  ;;  %v2692_v23 = vmul.f32 %v3869_v59, %v5225_v42  ;;  %v1657_v30 = vpop.f32.mrb[39].mxu1  ;;  %6395 = vst [vmem:[#allocation52_spill] sm:$0xff] %v5394_v44 }
 0x293   :  { %v5396_v12 = vmul.f32 %v2689_v47, %v2689_v47  ;;  %v5398_v49 = vmul.f32 %v2689_v47, %v2665_v4  ;;  %v2690_v29 = vmul.f32 %v5228_v31, %v1657_v30  ;;  %v5411_v59 = vmul.f32 %v2666_v28, %v2666_v28 }
 0x294   :  { %6393 = vst [vmem:[#allocation50_spill] sm:$0xff] %v5389_v1  ;;  %6394 = vst [vmem:[#allocation51_spill] sm:$0xff] %v5391_v37  ;;  %v5405_v60 = vadd.f32 %v5389_v1, %v5387_v38  ;;  %v5407_v11 = vmul.f32 %v2692_v23, %v2692_v23  ;;  %v5409_v16 = vmul.f32 %v2692_v23, %v2668_v56 }
 0x295   :  { %6396 = vst [vmem:[#allocation53_spill] sm:$0xff] %v5396_v12  ;;  %6397 = vst [vmem:[#allocation54_spill] sm:$0xff] %v5398_v49  ;;  %v5415_v0 = vadd.f32 %v5396_v12, %v5394_v44  ;;  %v5417_v47 = vmul.f32 %v2690_v29, %v2690_v29  ;;  %v5419_v4 = vmul.f32 %v2690_v29, %v2666_v28 }
 0x296   :  { %6398 = vst [vmem:[#allocation55_spill] sm:$0xff] %v5405_v60  ;;  %6399 = vst [vmem:[#allocation56_spill] sm:$0xff] %v5407_v11  ;;  %v2671_v30 = vmul.f32 %v5205_v5, %v5221_v24  ;;  %v5425_v1 = vadd.f32 %v5407_v11, %v5401_v54  ;;  %v2669_v56 = vmul.f32 %v5223_v17, %v5207_v45 }
 0x297   :  { %6400 = vst [vmem:[#allocation57_spill] sm:$0xff] %v5409_v16  ;;  %6401 = vst [vmem:[#allocation58_spill] sm:$0xff] %v5411_v59  ;;  %v5431_v23 = vadd.f32 %v5417_v47, %v5411_v59  ;;  %v3876_v12 = vpop.f32.mrb[40].mxu1  ;;  %v2670_v5 = vmul.f32 %v5228_v31, %v5211_v61 }
 0x298   :  { %6402 = vst [vmem:[#allocation59_spill] sm:$0xff] %v5415_v0  ;;  %6403 = vst [vmem:[#allocation60_spill] sm:$0xff] %v5417_v47  ;;  %v2672_v0 = vmul.f32 %v5209_v2, %v5225_v42  ;;  %v2695_v28 = vmul.f32 %v3876_v12, %v5221_v24  ;;  %v1703_v29 = vpop.f32.mrb[41].mxu1  ;;  %v5446_v60 = vmul.f32 %v2669_v56, %v2669_v56 }
 0x299   :  { %6404 = vst [vmem:[#allocation61_spill] sm:$0xff] %v5419_v4  ;;  %6405 = vst [vmem:[#allocation62_spill] sm:$0xff] %v5425_v1  ;;  %v2693_v11 = vmul.f32 %v5223_v17, %v1703_v29  ;;  %v3877_v1 = vpop.f32.mrb[42].mxu1  ;;  %v5439_v4 = vmul.f32 %v2671_v30, %v2671_v30 }
 0x29a   :  { %6406 = vst [vmem:[#allocation63_spill] sm:$0xff] %v5431_v23  ;;  %v5441_v45 = vmul.f32 %v2695_v28, %v2695_v28  ;;  %v5443_v16 = vmul.f32 %v2695_v28, %v2671_v30  ;;  %v2696_v23 = vmul.f32 %v3877_v1, %v5225_v42  ;;  %v1706_v47 = vpop.f32.mrb[43].mxu1  ;;  %v5453_v49 = vmul.f32 %v2672_v0, %v2672_v0 }
 0x29b   :  { %6407 = vst [vmem:[#allocation64_spill] sm:$0xff] %v5439_v4  ;;  %v5448_v2 = vmul.f32 %v2693_v11, %v2693_v11  ;;  %v5450_v12 = vmul.f32 %v2693_v11, %v2669_v56  ;;  %v2694_v61 = vmul.f32 %v5228_v31, %v1706_v47  ;;  %v5463_v1 = vmul.f32 %v2670_v5, %v2670_v5 }
 0x29c   :  { %6408 = vst [vmem:[#allocation65_spill] sm:$0xff] %v5441_v45  ;;  %6409 = vst [vmem:[#allocation66_spill] sm:$0xff] %v5443_v16  ;;  %v5457_v29 = vadd.f32 %v5441_v45, %v5439_v4  ;;  %v5459_v37 = vmul.f32 %v2696_v23, %v2696_v23  ;;  %v5461_v30 = vmul.f32 %v2696_v23, %v2672_v0 }
 0x29d   :  { %6410 = vst [vmem:[#allocation67_spill] sm:$0xff] %v5448_v2  ;;  %6411 = vst [vmem:[#allocation68_spill] sm:$0xff] %v5450_v12  ;;  %v5467_v28 = vadd.f32 %v5448_v2, %v5446_v60  ;;  %v5469_v11 = vmul.f32 %v2694_v61, %v2694_v61  ;;  %v5471_v56 = vmul.f32 %v2694_v61, %v2670_v5 }
 0x29e   :  { %6412 = vst [vmem:[#allocation69_spill] sm:$0xff] %v5453_v49  ;;  %6413 = vst [vmem:[#allocation70_spill] sm:$0xff] %v5457_v29  ;;  %v2675_v47 = vmul.f32 %v5213_v9, %v5221_v24  ;;  %v5477_v45 = vadd.f32 %v5459_v37, %v5453_v49  ;;  %v2673_v0 = vmul.f32 %v5223_v17, %v5215_v13  ;;  %v5654_v49 = vstv %s2773_s6 }
 0x29f   :  { %6414 = vst [vmem:[#allocation71_spill] sm:$0xff] %v5459_v37  ;;  %6415 = vst [vmem:[#allocation72_spill] sm:$0xff] %v5461_v30  ;;  %v5483_v23 = vadd.f32 %v5469_v11, %v5463_v1  ;;  %v3884_v2 = vpop.f32.mrb[44].mxu1  ;;  %v2674_v9 = vmul.f32 %v5228_v31, %v5219_v10 }
 0x2a0   :  { %6416 = vst [vmem:[#allocation73_spill] sm:$0xff] %v5463_v1  ;;  %6417 = vst [vmem:[#allocation74_spill] sm:$0xff] %v5467_v28  ;;  %v2676_v28 = vmul.f32 %v5217_v63, %v5225_v42  ;;  %v2699_v5 = vmul.f32 %v3884_v2, %v5221_v24  ;;  %v1752_v61 = vpop.f32.mrb[45].mxu1  ;;  %v5498_v29 = vmul.f32 %v2673_v0, %v2673_v0 }
 0x2a1   :  { %6418 = vst [vmem:[#allocation75_spill] sm:$0xff] %v5469_v11  ;;  %6419 = vst [vmem:[#allocation76_spill] sm:$0xff] %v5471_v56  ;;  %v2697_v37 = vmul.f32 %v5223_v17, %v1752_v61  ;;  %v5491_v56 = vmul.f32 %v2675_v47, %v2675_v47 }
 0x2a2   :  { %6420 = vst [vmem:[#allocation77_spill] sm:$0xff] %v5477_v45  ;;  %6421 = vst [vmem:[#allocation78_spill] sm:$0xff] %v5483_v23  ;;  %v3885_v45 = vpop.f32.mrb[46].mxu1  ;;  %v5493_v13 = vmul.f32 %v2699_v5, %v2699_v5  ;;  %v5495_v30 = vmul.f32 %v2699_v5, %v2675_v47  ;;  %v5505_v12 = vmul.f32 %v2676_v28, %v2676_v28 }
 0x2a3   :  { %6422 = vst [vmem:[#allocation79_spill] sm:$0xff] %v5491_v56  ;;  %v2700_v11 = vmul.f32 %v3885_v45, %v5225_v42  ;;  %v1755_v23 = vpop.f32.mrb[47].mxu1  ;;  %6425 = vst [vmem:[#allocation82_spill] sm:$0xff] %v5498_v29  ;;  %v5500_v63 = vmul.f32 %v2697_v37, %v2697_v37  ;;  %v5502_v2 = vmul.f32 %v2697_v37, %v2673_v0 }
 0x2a4   :  { %6423 = vst [vmem:[#allocation80_spill] sm:$0xff] %v5493_v13  ;;  %6424 = vst [vmem:[#allocation81_spill] sm:$0xff] %v5495_v30  ;;  %v2698_v10 = vmul.f32 %v5228_v31, %v1755_v23  ;;  %v5509_v61 = vadd.f32 %v5493_v13, %v5491_v56  ;;  %v5515_v45 = vmul.f32 %v2674_v9, %v2674_v9  ;;  %v2922_v56 = vmul.f32 2.0, %v5257_v46 }
 0x2a5   :  { %6426 = vst [vmem:[#allocation83_spill] sm:$0xff] %v5500_v63  ;;  %6427 = vst [vmem:[#allocation84_spill] sm:$0xff] %v5502_v2  ;;  %v5511_v16 = vmul.f32 %v2700_v11, %v2700_v11  ;;  %v5513_v47 = vmul.f32 %v2700_v11, %v2676_v28  ;;  %v5519_v5 = vadd.f32 %v5500_v63, %v5498_v29 }
 0x2a6   :  { %6428 = vst [vmem:[#allocation85_spill] sm:$0xff] %v5505_v12  ;;  %6429 = vst [vmem:[#allocation86_spill] sm:$0xff] %v5509_v61  ;;  %v5521_v37 = vmul.f32 %v2698_v10, %v2698_v10  ;;  %v5523_v0 = vmul.f32 %v2698_v10, %v2674_v9 }
 0x2a7   :  { %6430 = vst [vmem:[#allocation87_spill] sm:$0xff] %v5511_v16  ;;  %6431 = vst [vmem:[#allocation88_spill] sm:$0xff] %v5513_v47  ;;  %v5527_v23 = vadd.f32 %v5511_v16, %v5505_v12  ;;  %v3892_v28 = vpop.f32.mrb[48].mxu1  ;;  %v3065_v12 = vadd.f32 %v5263_v33, %v5654_v49 }
 0x2a8   :  { %6432 = vst [vmem:[#allocation89_spill] sm:$0xff] %v5515_v45  ;;  %6433 = vst [vmem:[#allocation90_spill] sm:$0xff] %v5519_v5  ;;  %v5531_v61 = vadd.f32 %v5521_v37, %v5515_v45  ;;  %v5534_v11 = vmul.f32 %v3892_v28, %v5221_v24  ;;  %v1801_v47 = vpop.f32.mrb[49].mxu1  ;;  %v2920_v45 = vmul.f32 2.0, %v5267_v55 }
 0x2a9   :  { %6434 = vst [vmem:[#allocation91_spill] sm:$0xff] %v5521_v37  ;;  %6435 = vst [vmem:[#allocation92_spill] sm:$0xff] %v5523_v0  ;;  %v5537_v63 = vmul.f32 %v5223_v17, %v1801_v47  ;;  %v3893_v5 = vpop.f32.mrb[50].mxu1 }
 0x2aa   :  { %6436 = vst [vmem:[#allocation93_spill] sm:$0xff] %v5527_v23  ;;  %6437 = vst [vmem:[#allocation94_spill] sm:$0xff] %v5531_v61  ;;  %v5542_v10 = vmul.f32 %v3893_v5, %v5225_v42  ;;  %v1804_v0 = vpop.f32.mrb[51].mxu1 }
 0x2ab   :  { %v5547_v61 = vmul.f32 %v5228_v31, %v1804_v0 }
 0x2af   :  { %v3900_v37 = vpop.f32.mrb[52].mxu1 }
 0x2b0   :  { %v5554_v16 = vmul.f32 %v3900_v37, %v5221_v24  ;;  %v1850_v9 = vpop.f32.mrb[53].mxu1 }
 0x2b1   :  { %v5557_v5 = vmul.f32 %v5223_v17, %v1850_v9  ;;  %v3901_v13 = vpop.f32.mrb[54].mxu1 }
 0x2b2   :  { %v5562_v0 = vmul.f32 %v3901_v13, %v5225_v42  ;;  %v1853_v2 = vpop.f32.mrb[55].mxu1 }
 0x2b3   :  { %v5567_v47 = vmul.f32 %v5228_v31, %v1853_v2 }
 0x2b5   :  { %6438 = vst [vmem:[#allocation95_spill] sm:$0xff] %v5567_v47 }
 0x2b7   :  { %v3908_v30 = vpop.f32.mrb[56].mxu1 }
 0x2b8   :  { %v5574_v21 = vmul.f32 %v3908_v30, %v5221_v24  ;;  %v1899_v23 = vpop.f32.mrb[57].mxu1 }
 0x2b9   :  { %v5577_v13 = vmul.f32 %v5223_v17, %v1899_v23  ;;  %v3909_v58 = vpop.f32.mrb[58].mxu1 }
 0x2ba   :  { %v5582_v2 = vmul.f32 %v3909_v58, %v5225_v42  ;;  %v1902_v25 = vpop.f32.mrb[59].mxu1 }
 0x2bb   :  { %v5587_v9 = vmul.f32 %v5228_v31, %v1902_v25 }
 0x2bd   :  { %6439 = vst [vmem:[#allocation96_spill] sm:$0xff] %v5587_v9 }
 0x2bf   :  { %v3916_v20 = vpop.f32.mrb[60].mxu1 }
 0x2c0   :  { %v5594_v47 = vmul.f32 %v3916_v20, %v5221_v24  ;;  %v1948_v28 = vpop.f32.mrb[61].mxu1 }
 0x2c1   :  { %v5597_v58 = vmul.f32 %v5223_v17, %v1948_v28  ;;  %v3917_v57 = vpop.f32.mrb[62].mxu1 }
 0x2c2   :  { %v5602_v25 = vmul.f32 %v3917_v57, %v5225_v42  ;;  %v1951_v7 = vpop.f32.mrb[63].mxu1 }
 0x2c3   :  { %v5607_v23 = vmul.f32 %v5228_v31, %v1951_v7 }
 0x2c7   :  { %v3924_v41 = vpop.f32.mrb[64].mxu1 }
 0x2c8   :  { %v5614_v9 = vmul.f32 %v3924_v41, %v5221_v24  ;;  %v1997_v37 = vpop.f32.mrb[65].mxu1 }
 0x2c9   :  { %v5617_v57 = vmul.f32 %v5223_v17, %v1997_v37  ;;  %v3925_v38 = vpop.f32.mrb[66].mxu1 }
 0x2ca   :  { %6440 = vst [vmem:[#allocation97_spill] sm:$0xff] %v5614_v9  ;;  %v5622_v7 = vmul.f32 %v3925_v38, %v5225_v42  ;;  %v2000_v44 = vpop.f32.mrb[67].mxu1 }
 0x2cb   :  { %v5627_v28 = vmul.f32 %v5228_v31, %v2000_v44 }
 0x2cd   :  { %6441 = vst [vmem:[#allocation98_spill] sm:$0xff] %v5627_v28  ;;  %v3067_v28 = vadd.f32 %v5253_v52, %v5654_v49  ;;  %v5679_v52 = vadd.f32 %v5654_v49, %v2922_v56  ;;  %v5693_v56 = vadd.f32 %v5654_v49, %v2920_v45 }
 0x2cf   :  { %v3932_v59 = vpop.f32.mrb[68].mxu1 }
 0x2d0   :  { %v5634_v30 = vmul.f32 %v3932_v59, %v5221_v24  ;;  %v2046_v38 = vpop.f32.mrb[69].mxu1 }
 0x2d1   :  { %v5637_v4 = vmul.f32 %v5223_v17, %v2046_v38  ;;  %v3933_v9 = vpop.f32.mrb[70].mxu1  ;;  %v2921_v38 = vmul.f32 2.0, %v5239_v32 }
 0x2d2   :  { %v5642_v20 = vmul.f32 %v3933_v9, %v5225_v42  ;;  %v2049_v41 = vpop.f32.mrb[71].mxu1  ;;  %v2919_v9 = vmul.f32 2.0, %v5246_v40 }
 0x2d3   :  { %6442 = vst [vmem:[#allocation99_spill] sm:$0xff] %v5637_v4  ;;  %v5647_v1 = vmul.f32 %v5228_v31, %v2049_v41  ;;  %v5660_v41 = vadd.f32 %v5654_v49, %v2921_v38  ;;  %v5662_v4 = vstv %s3483_s7  ;;  %v2925_v38 = vmul.f32 2.0, %v5287_v3 }
 0x2d4   :  { %v2923_v3 = vmul.f32 2.0, %v5294_v18 }
 0x2d5   :  { %6443 = vst [vmem:[#allocation100_spill] sm:$0xff] %v5647_v1  ;;  %6444 = vst [vmem:[#allocation101_spill] sm:$0xff] %v5660_v41 }
 0x2d7   :  { %v3940_v44 = vpop.f32.mrb[72].mxu1 }
 0x2d8   :  { %v2727_v37 = vmul.f32 %v3940_v44, %v5221_v24  ;;  %v2095_v29 = vpop.f32.mrb[73].mxu1  ;;  %v5671_v44 = vadd.f32 %v5654_v49, %v2919_v9  ;;  %v3068_v9 = vadd.f32 %v5272_v6, %v5654_v49  ;;  %v5702_v6 = vadd.f32 %v5654_v49, %v2925_v38 }
 0x2d9   :  { %v2725_v59 = vmul.f32 %v5223_v17, %v2095_v29  ;;  %v3941_v32 = vpop.f32.mrb[74].mxu1  ;;  %v5716_v38 = vadd.f32 %v5654_v49, %v2923_v3 }
 0x2da   :  { %v2873_v40 = vsub.f32 %v2727_v37, %v5237_v27  ;;  %v2728_v46 = vmul.f32 %v3941_v32, %v5225_v42  ;;  %v2098_v1 = vpop.f32.mrb[75].mxu1  ;;  %v6445_v27 = vsub.f32 %v5534_v11, %v5235_v26  ;;  %v3066_v26 = vadd.f32 %v5277_v53, %v5654_v49 }
 0x2db   :  { %v2871_v41 = vsub.f32 %v2725_v59, %v5244_v50  ;;  %v2726_v29 = vmul.f32 %v5228_v31, %v2098_v1  ;;  %v6446_v50 = vsub.f32 %v5537_v63, %v5242_v39  ;;  %v3071_v39 = vadd.f32 %v5301_v43, %v5654_v49 }
 0x2dc   :  { %v3091_v32 = vadd.f32 %v2873_v40, %v6445_v27  ;;  %v2874_v37 = vsub.f32 %v2728_v46, %v5255_v8  ;;  %v6447_v8 = vsub.f32 %v5542_v10, %v5249_v51  ;;  %v6448_v63 = vsub.f32 %v5547_v61, %v5259_v35 }
 0x2dd   :  { %v3089_v1 = vadd.f32 %v2871_v41, %v6446_v50  ;;  %v2872_v33 = vsub.f32 %v2726_v29, %v5265_v48  ;;  %v2926_v53 = vmul.f32 2.0, %v5305_v62  ;;  %v2924_v27 = vmul.f32 2.0, %v5315_v36 }
 0x2de   :  { %v3115_v40 = vadd.f32 %v3091_v32, %v5662_v4  ;;  %v3092_v46 = vadd.f32 %v2874_v37, %v6447_v8 }
 0x2df   :  { %v3113_v48 = vadd.f32 %v3089_v1, %v5662_v4  ;;  %v3090_v45 = vadd.f32 %v2872_v33, %v6448_v63  ;;  %v3948_v11 = vpop.f32.mrb[76].mxu1  ;;  %v2929_v1 = vmul.f32 2.0, %v5339_v15  ;;  %v6452_v63 = vld [vmem:[#allocation28_spill] sm:$0xff] }
 0x2e0   :  { %v5711_v59 = vmul.f32 %v3115_v40, %v3067_v28  ;;  %v3116_v51 = vadd.f32 %v3092_v46, %v5662_v4  ;;  %v2731_v10 = vmul.f32 %v3948_v11, %v5221_v24  ;;  %v2144_v41 = vpop.f32.mrb[77].mxu1  ;;  %v6449_v40 = vld [vmem:[#allocation30_spill] sm:$0xff]  ;;  %v5735_v46 = vadd.f32 %v5654_v49, %v2926_v53  ;;  %v6453_v11 = vld [vmem:[#allocation33_spill] sm:$0xff] }
 0x2e1   :  { %v5718_v43 = vmul.f32 %v3113_v48, %v3065_v12  ;;  %v3114_v29 = vadd.f32 %v3090_v45, %v5662_v4  ;;  %v2729_v35 = vmul.f32 %v5223_v17, %v2144_v41  ;;  %v3949_v61 = vpop.f32.mrb[78].mxu1  ;;  %v3069_v8 = vadd.f32 %v6449_v40, %v5654_v49 }
 0x2e2   :  { %v5723_v32 = vmul.f32 %v3116_v51, %v3068_v9  ;;  %v2877_v28 = vsub.f32 %v2731_v10, %v5285_v14  ;;  %v2732_v37 = vmul.f32 %v3949_v61, %v5225_v42  ;;  %v2147_v50 = vpop.f32.mrb[79].mxu1  ;;  %v6450_v9 = vld [vmem:[#allocation27_spill] sm:$0xff]  ;;  %v5749_v53 = vadd.f32 %v5654_v49, %v2924_v27 }
 0x2e3   :  { %v5728_v3 = vmul.f32 %v3114_v29, %v3066_v26  ;;  %v2875_v12 = vsub.f32 %v2729_v35, %v5292_v19  ;;  %v2730_v33 = vmul.f32 %v5228_v31, %v2147_v50  ;;  %v6451_v14 = vsub.f32 %v5554_v16, %v6450_v9  ;;  %v6454_v51 = vld [vmem:[#allocation39_spill] sm:$0xff]  ;;  %v6455_v19 = vld [vmem:[#allocation29_spill] sm:$0xff]  ;;  %v6457_v35 = vld [vmem:[#allocation32_spill] sm:$0xff] }
 0x2e4   :  { %v2878_v45 = vsub.f32 %v2732_v37, %v6452_v63  ;;  %v3072_v26 = vadd.f32 %v6453_v11, %v5654_v49  ;;  %v2927_v10 = vmul.f32 2.0, %v6454_v51  ;;  %v6456_v41 = vsub.f32 %v5557_v5, %v6455_v19  ;;  %v6458_v50 = vld [vmem:[#allocation34_spill] sm:$0xff]  ;;  %v6461_v5 = vld [vmem:[#allocation40_spill] sm:$0xff]  ;;  %v6463_v27 = vld [vmem:[#allocation31_spill] sm:$0xff] }
 0x2e5   :  { %v3095_v48 = vadd.f32 %v2877_v28, %v6451_v14  ;;  %v2876_v61 = vsub.f32 %v2730_v33, %v6457_v35  ;;  %v3070_v16 = vadd.f32 %v6458_v50, %v5654_v49  ;;  %v6459_v37 = vsub.f32 %v5562_v0, %v5297_v34  ;;  %v6462_v14 = vld [vmem:[#allocation95_spill] sm:$0xff]  ;;  %v6480_v51 = vld [vmem:[#allocation45_spill] sm:$0xff] }
 0x2e6   :  { %v3093_v29 = vadd.f32 %v2875_v12, %v6456_v41  ;;  %v5758_v9 = vadd.f32 %v5654_v49, %v2929_v1  ;;  %v3075_v12 = vadd.f32 %v6461_v5, %v5654_v49  ;;  %v6464_v63 = vsub.f32 %v6462_v14, %v6463_v27  ;;  %v6465_v41 = vld [vmem:[#allocation42_spill] sm:$0xff] }
 0x2e7   :  { %v3119_v28 = vadd.f32 %v3095_v48, %v5662_v4  ;;  %v3096_v40 = vadd.f32 %v2878_v45, %v6459_v37  ;;  %v3956_v19 = vpop.f32.mrb[80].mxu1  ;;  %v2930_v35 = vmul.f32 2.0, %v6465_v41  ;;  %v5772_v45 = vadd.f32 %v5654_v49, %v2927_v10  ;;  %v6467_v5 = vld [vmem:[#allocation46_spill] sm:$0xff] }
 0x2e8   :  { %6460 = vst [vmem:[#allocation30_spill] sm:$0xff] %v5758_v9  ;;  %v3117_v33 = vadd.f32 %v3093_v29, %v5662_v4  ;;  %v3094_v11 = vadd.f32 %v2876_v61, %v6464_v63  ;;  %v2735_v0 = vmul.f32 %v3956_v19, %v5221_v24  ;;  %v2193_v1 = vpop.f32.mrb[81].mxu1  ;;  %v2928_v14 = vmul.f32 2.0, %v6467_v5  ;;  %v6469_v19 = vld [vmem:[#allocation51_spill] sm:$0xff] }
 0x2e9   :  { %v5767_v48 = vmul.f32 %v3119_v28, %v3071_v39  ;;  %v3120_v34 = vadd.f32 %v3096_v40, %v5662_v4  ;;  %6466 = vst [vmem:[#allocation27_spill] sm:$0xff] %v5772_v45  ;;  %v2733_v37 = vmul.f32 %v5223_v17, %v2193_v1  ;;  %v3957_v61 = vpop.f32.mrb[82].mxu1  ;;  %v6468_v39 = vld [vmem:[#allocation36_spill] sm:$0xff]  ;;  %v2933_v9 = vmul.f32 2.0, %v6469_v19  ;;  %v6476_v19 = vld [vmem:[#allocation47_spill] sm:$0xff] }
 0x2ea   :  { %v5774_v50 = vmul.f32 %v3117_v33, %v3069_v8  ;;  %v3118_v29 = vadd.f32 %v3094_v11, %v5662_v4  ;;  %v2881_v28 = vsub.f32 %v2735_v0, %v6468_v39  ;;  %v2736_v40 = vmul.f32 %v3957_v61, %v5225_v42  ;;  %v2196_v63 = vpop.f32.mrb[83].mxu1  ;;  %v6470_v8 = vld [vmem:[#allocation38_spill] sm:$0xff]  ;;  %v6471_v1 = vld [vmem:[#allocation44_spill] sm:$0xff]  ;;  %v6475_v61 = vld [vmem:[#allocation41_spill] sm:$0xff] }
 0x2eb   :  { %v5779_v27 = vmul.f32 %v3120_v34, %v3072_v26  ;;  %v2879_v33 = vsub.f32 %v2733_v37, %v6470_v8  ;;  %v2734_v11 = vmul.f32 %v5228_v31, %v2196_v63  ;;  %v3073_v45 = vadd.f32 %v6471_v1, %v5654_v49  ;;  %v6473_v26 = vld [vmem:[#allocation35_spill] sm:$0xff]  ;;  %v6478_v37 = vld [vmem:[#allocation37_spill] sm:$0xff] }
 0x2ec   :  { %v5784_v10 = vmul.f32 %v3118_v29, %v3070_v16  ;;  %v5791_v5 = vadd.f32 %v5654_v49, %v2930_v35  ;;  %v6474_v34 = vsub.f32 %v5574_v21, %v6473_v26  ;;  %v2882_v39 = vsub.f32 %v2736_v40, %v6475_v61  ;;  %v6477_v29 = vld [vmem:[#allocation54_spill] sm:$0xff] }
 0x2ed   :  { %v3076_v16 = vadd.f32 %v6476_v19, %v5654_v49  ;;  %v2931_v41 = vmul.f32 2.0, %v6477_v29  ;;  %v6479_v63 = vsub.f32 %v5577_v13, %v6478_v37  ;;  %v2880_v1 = vsub.f32 %v2734_v11, %v6480_v51  ;;  %v6485_v13 = vld [vmem:[#allocation55_spill] sm:$0xff]  ;;  %v6486_v11 = vld [vmem:[#allocation96_spill] sm:$0xff] }
 0x2ee   :  { %6472 = vst [vmem:[#allocation28_spill] sm:$0xff] %v5791_v5  ;;  %v3099_v0 = vadd.f32 %v2881_v28, %v6474_v34  ;;  %v5805_v35 = vadd.f32 %v5654_v49, %v2928_v14  ;;  %v6482_v5 = vld [vmem:[#allocation48_spill] sm:$0xff]  ;;  %v6483_v40 = vsub.f32 %v5582_v2, %v5349_v22  ;;  %v5814_v26 = vadd.f32 %v5654_v49, %v2933_v9  ;;  %v6487_v14 = vld [vmem:[#allocation43_spill] sm:$0xff] }
 0x2ef   :  { %v3097_v8 = vadd.f32 %v2879_v33, %v6479_v63  ;;  %v3074_v21 = vadd.f32 %v6482_v5, %v5654_v49  ;;  %v3079_v33 = vadd.f32 %v6485_v13, %v5654_v49  ;;  %v6488_v34 = vsub.f32 %v6486_v11, %v6487_v14  ;;  %v3964_v37 = vpop.f32.mrb[84].mxu1  ;;  %v6489_v5 = vld [vmem:[#allocation57_spill] sm:$0xff]  ;;  %v6504_v29 = vld [vmem:[#allocation60_spill] sm:$0xff] }
 0x2f0   :  { %6481 = vst [vmem:[#allocation33_spill] sm:$0xff] %v5805_v35  ;;  %v3123_v28 = vadd.f32 %v3099_v0, %v5662_v4  ;;  %v3100_v19 = vadd.f32 %v2882_v39, %v6483_v40  ;;  %6484 = vst [vmem:[#allocation29_spill] sm:$0xff] %v5814_v26  ;;  %v2934_v63 = vmul.f32 2.0, %v6489_v5  ;;  %v2739_v2 = vmul.f32 %v3964_v37, %v5221_v24  ;;  %v2242_v9 = vpop.f32.mrb[85].mxu1  ;;  %v6491_v11 = vld [vmem:[#allocation61_spill] sm:$0xff]  ;;  %v6493_v26 = vld [vmem:[#allocation66_spill] sm:$0xff] }
 0x2f1   :  { %v3121_v51 = vadd.f32 %v3097_v8, %v5662_v4  ;;  %v3098_v61 = vadd.f32 %v2880_v1, %v6488_v34  ;;  %v5828_v39 = vadd.f32 %v5654_v49, %v2931_v41  ;;  %v2737_v13 = vmul.f32 %v5223_v17, %v2242_v9  ;;  %v3965_v1 = vpop.f32.mrb[86].mxu1  ;;  %v6495_v9 = vld [vmem:[#allocation59_spill] sm:$0xff] }
 0x2f2   :  { %v5823_v0 = vmul.f32 %v3123_v28, %v3075_v12  ;;  %v3124_v22 = vadd.f32 %v3100_v19, %v5662_v4  ;;  %v2932_v14 = vmul.f32 2.0, %v6491_v11  ;;  %v6492_v12 = vld [vmem:[#allocation50_spill] sm:$0xff]  ;;  %v2740_v19 = vmul.f32 %v3965_v1, %v5225_v42  ;;  %v2245_v37 = vpop.f32.mrb[87].mxu1  ;;  %v6499_v1 = vld [vmem:[#allocation56_spill] sm:$0xff] }
 0x2f3   :  { %6490 = vst [vmem:[#allocation32_spill] sm:$0xff] %v5828_v39  ;;  %v5830_v40 = vmul.f32 %v3121_v51, %v3073_v45  ;;  %v3122_v8 = vadd.f32 %v3098_v61, %v5662_v4  ;;  %v2885_v28 = vsub.f32 %v2739_v2, %v6492_v12  ;;  %v2937_v35 = vmul.f32 2.0, %v6493_v26  ;;  %v6494_v45 = vld [vmem:[#allocation53_spill] sm:$0xff]  ;;  %v6500_v26 = vld [vmem:[#allocation62_spill] sm:$0xff] }
 0x2f4   :  { %v5835_v34 = vmul.f32 %v3124_v22, %v3076_v16  ;;  %v2883_v51 = vsub.f32 %v2737_v13, %v6494_v45  ;;  %v2738_v61 = vmul.f32 %v5228_v31, %v2245_v37  ;;  %v3077_v39 = vadd.f32 %v6495_v9, %v5654_v49  ;;  %v6497_v16 = vld [vmem:[#allocation49_spill] sm:$0xff]  ;;  %v6502_v13 = vld [vmem:[#allocation52_spill] sm:$0xff] }
 0x2f5   :  { %v5840_v41 = vmul.f32 %v3122_v8, %v3074_v21  ;;  %v5847_v11 = vadd.f32 %v5654_v49, %v2934_v63  ;;  %v6498_v22 = vsub.f32 %v5594_v47, %v6497_v16  ;;  %v2886_v12 = vsub.f32 %v2740_v19, %v6499_v1  ;;  %v6501_v8 = vld [vmem:[#allocation68_spill] sm:$0xff] }
 0x2f6   :  { %v3080_v21 = vadd.f32 %v6500_v26, %v5654_v49  ;;  %v2935_v5 = vmul.f32 2.0, %v6501_v8  ;;  %v6503_v37 = vsub.f32 %v5597_v58, %v6502_v13  ;;  %v2884_v9 = vsub.f32 %v2738_v61, %v6504_v29  ;;  %v6509_v58 = vld [vmem:[#allocation70_spill] sm:$0xff] }
 0x2f7   :  { %6496 = vst [vmem:[#allocation34_spill] sm:$0xff] %v5847_v11  ;;  %v3103_v2 = vadd.f32 %v2885_v28, %v6498_v22  ;;  %v5861_v63 = vadd.f32 %v5654_v49, %v2932_v14  ;;  %v6506_v11 = vld [vmem:[#allocation63_spill] sm:$0xff]  ;;  %v6507_v19 = vsub.f32 %v5602_v25, %v5401_v54  ;;  %v5870_v16 = vadd.f32 %v5654_v49, %v2937_v35  ;;  %v6510_v14 = vld [vmem:[#allocation58_spill] sm:$0xff]  ;;  %v3972_v1 = vpop.f32.mrb[88].mxu1 }
 0x2f8   :  { %v3101_v45 = vadd.f32 %v2883_v51, %v6503_v37  ;;  %v3078_v47 = vadd.f32 %v6506_v11, %v5654_v49  ;;  %v3083_v51 = vadd.f32 %v6509_v58, %v5654_v49  ;;  %v6511_v61 = vsub.f32 %v5607_v23, %v6510_v14  ;;  %v6512_v11 = vld [vmem:[#allocation72_spill] sm:$0xff]  ;;  %v2291_v35 = vpop.f32.mrb[89].mxu1 }
 0x2f9   :  { %6505 = vst [vmem:[#allocation40_spill] sm:$0xff] %v5861_v63  ;;  %v3127_v28 = vadd.f32 %v3103_v2, %v5662_v4  ;;  %v3104_v26 = vadd.f32 %v2886_v12, %v6507_v19  ;;  %6508 = vst [vmem:[#allocation95_spill] sm:$0xff] %v5870_v16  ;;  %v2938_v13 = vmul.f32 2.0, %v6512_v11  ;;  %v2743_v25 = vmul.f32 %v3972_v1, %v5221_v24  ;;  %v6514_v19 = vld [vmem:[#allocation74_spill] sm:$0xff]  ;;  %v6516_v1 = vld [vmem:[#allocation76_spill] sm:$0xff] }
 0x2fa   :  { %v3125_v29 = vadd.f32 %v3101_v45, %v5662_v4  ;;  %v3102_v22 = vadd.f32 %v2884_v9, %v6511_v61  ;;  %v5884_v12 = vadd.f32 %v5654_v49, %v2935_v5  ;;  %v2741_v23 = vmul.f32 %v5223_v17, %v2291_v35  ;;  %v3973_v9 = vpop.f32.mrb[90].mxu1  ;;  %v6523_v16 = vld [vmem:[#allocation71_spill] sm:$0xff] }
 0x2fb   :  { %v5879_v2 = vmul.f32 %v3127_v28, %v3079_v33  ;;  %v3128_v54 = vadd.f32 %v3104_v26, %v5662_v4  ;;  %v3081_v58 = vadd.f32 %v6514_v19, %v5654_v49  ;;  %v6515_v28 = vld [vmem:[#allocation65_spill] sm:$0xff]  ;;  %v2744_v14 = vmul.f32 %v3973_v9, %v5225_v42  ;;  %v2294_v61 = vpop.f32.mrb[91].mxu1 }
 0x2fc   :  { %6513 = vst [vmem:[#allocation31_spill] sm:$0xff] %v5884_v12  ;;  %v5886_v37 = vmul.f32 %v3125_v29, %v3077_v39  ;;  %v3126_v45 = vadd.f32 %v3102_v22, %v5662_v4  ;;  %v2889_v26 = vsub.f32 %v2743_v25, %v6515_v28  ;;  %v5897_v5 = vmul.f32 2.0, %v6516_v1  ;;  %v6517_v29 = vld [vmem:[#allocation67_spill] sm:$0xff]  ;;  %v6520_v19 = vld [vmem:[#allocation97_spill] sm:$0xff]  ;;  %v6521_v25 = vld [vmem:[#allocation64_spill] sm:$0xff] }
 0x2fd   :  { %v5892_v33 = vmul.f32 %v3128_v54, %v3080_v21  ;;  %v2887_v22 = vsub.f32 %v2741_v23, %v6517_v29  ;;  %v2742_v35 = vmul.f32 %v5228_v31, %v2294_v61  ;;  %v5904_v12 = vadd.f32 %v5654_v49, %v2938_v13  ;;  %v6519_v21 = vld [vmem:[#allocation77_spill] sm:$0xff]  ;;  %v6524_v1 = vld [vmem:[#allocation78_spill] sm:$0xff]  ;;  %v6526_v13 = vld [vmem:[#allocation75_spill] sm:$0xff] }
 0x2fe   :  { %v5899_v39 = vmul.f32 %v3126_v45, %v3078_v47  ;;  %v3084_v54 = vadd.f32 %v6519_v21, %v5654_v49  ;;  %v6522_v28 = vsub.f32 %v6520_v19, %v6521_v25  ;;  %v2890_v63 = vsub.f32 %v2744_v14, %v6523_v16  ;;  %v6527_v29 = vld [vmem:[#allocation81_spill] sm:$0xff] }
 0x2ff   :  { %6518 = vst [vmem:[#allocation36_spill] sm:$0xff] %v5904_v12  ;;  %v3082_v47 = vadd.f32 %v6524_v1, %v5654_v49  ;;  %4049 = vrcp.f32 %v5711_v59  ;;  %v6525_v45 = vsub.f32 %v5617_v57, %v5446_v60  ;;  %v2888_v61 = vsub.f32 %v2742_v35, %v6526_v13  ;;  %v6528_v16 = vld [vmem:[#allocation69_spill] sm:$0xff]  ;;  %v6530_v1 = vld [vmem:[#allocation84_spill] sm:$0xff]  ;;  %v6531_v57 = vld [vmem:[#allocation98_spill] sm:$0xff]  ;;  %v3980_v25 = vpop.f32.mrb[92].mxu1 }
 0x300   :  { %v3107_v9 = vadd.f32 %v2889_v26, %v6522_v28  ;;  %v5920_v12 = vmul.f32 2.0, %v6527_v29  ;;  %4051 = vrcp.f32 %v5718_v43  ;;  %v6529_v14 = vsub.f32 %v5622_v7, %v6528_v16  ;;  %v6532_v59 = vld [vmem:[#allocation73_spill] sm:$0xff] }
 0x301   :  { %v3105_v23 = vadd.f32 %v2887_v22, %v6525_v45  ;;  %v5928_v19 = vmul.f32 2.0, %v6530_v1  ;;  %4053 = vrcp.f32 %v5723_v32  ;;  %v6533_v22 = vsub.f32 %v6531_v57, %v6532_v59  ;;  %v6539_v59 = vld [vmem:[#allocation87_spill] sm:$0xff] }
 0x302   :  { %v3131_v26 = vadd.f32 %v3107_v9, %v5662_v4  ;;  %v3108_v21 = vadd.f32 %v2890_v63, %v6529_v14  ;;  %4055 = vrcp.f32 %v5728_v3  ;;  %v2747_v7 = vmul.f32 %v3980_v25, %v5221_v24  ;;  %v2340_v63 = vpop.f32.mrb[93].mxu1  ;;  %v6534_v3 = vld [vmem:[#allocation80_spill] sm:$0xff]  ;;  %v6542_v25 = vld [vmem:[#allocation82_spill] sm:$0xff] }
 0x303   :  { %v3129_v60 = vadd.f32 %v3105_v23, %v5662_v4  ;;  %v3106_v35 = vadd.f32 %v2888_v61, %v6533_v22  ;;  %4057 = vrcp.f32 %v5767_v48  ;;  %v2745_v45 = vmul.f32 %v5223_v17, %v2340_v63  ;;  %v3981_v23 = vpop.f32.mrb[94].mxu1  ;;  %v6535_v48 = vld [vmem:[#allocation83_spill] sm:$0xff] }
 0x304   :  { %v5936_v43 = vmul.f32 %v3131_v26, %v3083_v51  ;;  %v3132_v28 = vadd.f32 %v3108_v21, %v5662_v4  ;;  %4059 = vrcp.f32 %v5774_v50  ;;  %v2893_v51 = vsub.f32 %v2747_v7, %v6534_v3  ;;  %v2343_v26 = vpop.f32.mrb[95].mxu1  ;;  %v6536_v21 = vld [vmem:[#allocation86_spill] sm:$0xff]  ;;  %v6537_v50 = vld [vmem:[#allocation79_spill] sm:$0xff] }
 0x305   :  { %v5941_v9 = vmul.f32 %v3129_v60, %v3081_v58  ;;  %v3130_v32 = vadd.f32 %v3106_v35, %v5662_v4  ;;  %v2748_v61 = vmul.f32 %v3981_v23, %v5225_v42  ;;  %4061 = vrcp.f32 %v5779_v27  ;;  %v6540_v35 = vld [vmem:[#allocation90_spill] sm:$0xff]  ;;  %v6544_v63 = vld [vmem:[#allocation91_spill] sm:$0xff]  ;;  %v6546_v23 = vld [vmem:[#allocation85_spill] sm:$0xff] }
 0x306   :  { %v5946_v13 = vmul.f32 %v3132_v28, %v3084_v54  ;;  %v2891_v58 = vsub.f32 %v2745_v45, %v6535_v48  ;;  %v2746_v14 = vmul.f32 %v5228_v31, %v2343_v26  ;;  %v3087_v60 = vadd.f32 %v6536_v21, %v5654_v49  ;;  %v6545_v45 = vld [vmem:[#allocation93_spill] sm:$0xff] }
 0x307   :  { %v5951_v16 = vmul.f32 %v3130_v32, %v3082_v47  ;;  %4063 = vrcp.f32 %v5784_v10  ;;  %v6538_v54 = vsub.f32 %v5634_v30, %v6537_v50  ;;  %v2894_v22 = vsub.f32 %v2748_v61, %v6539_v59  ;;  %v6541_v47 = vld [vmem:[#allocation99_spill] sm:$0xff] }
 0x308   :  { %v3085_v27 = vadd.f32 %v6540_v35, %v5654_v49  ;;  %4065 = vrcp.f32 %v5823_v0  ;;  %v6543_v28 = vsub.f32 %v6541_v47, %v6542_v25  ;;  %v2892_v32 = vsub.f32 %v2746_v14, %v6544_v63  ;;  %v6548_v0 = vld [vmem:[#allocation94_spill] sm:$0xff]  ;;  %v6550_v14 = vld [vmem:[#allocation89_spill] sm:$0xff] }
 0x309   :  { %v3111_v57 = vadd.f32 %v2893_v51, %v6538_v54  ;;  %v3088_v10 = vadd.f32 %v6545_v45, %v5654_v49  ;;  %4067 = vrcp.f32 %v5830_v40  ;;  %v6547_v3 = vsub.f32 %v5642_v20, %v6546_v23  ;;  %v5976_v61 = vpop.eup %4049  ;;  %v3988_v40 = vpop.f32.mrb[96].mxu1 }
 0x30a   :  { %v3109_v7 = vadd.f32 %v2891_v58, %v6543_v28  ;;  %v3086_v26 = vadd.f32 %v6548_v0, %v5654_v49  ;;  %4069 = vrcp.f32 %v5835_v34  ;;  %v6549_v58 = vld [vmem:[#allocation100_spill] sm:$0xff]  ;;  %v5985_v54 = vpop.eup %4051  ;;  %v2751_v59 = vmul.f32 %v3988_v40, %v5221_v24 }
 0x30b   :  { %v3135_v30 = vadd.f32 %v3111_v57, %v5662_v4  ;;  %v3112_v51 = vadd.f32 %v2894_v22, %v6547_v3  ;;  %v6551_v21 = vsub.f32 %v6549_v58, %v6550_v14  ;;  %4071 = vrcp.f32 %v5840_v41  ;;  %v2389_v22 = vpop.f32.mrb[97].mxu1  ;;  %v5990_v35 = vpop.eup %4053 }
 0x30c   :  { %v3133_v48 = vadd.f32 %v3109_v7, %v5662_v4  ;;  %4073 = vrcp.f32 %v5879_v2  ;;  %v2749_v25 = vmul.f32 %v5223_v17, %v2389_v22  ;;  %v3989_v28 = vpop.f32.mrb[98].mxu1  ;;  %v5997_v7 = vpop.eup %4055 }
 0x30d   :  { %v3110_v50 = vadd.f32 %v2892_v32, %v6551_v21  ;;  %v3159_v20 = vmul.f32 %v3135_v30, %v3087_v60  ;;  %v3136_v57 = vadd.f32 %v3112_v51, %v5662_v4  ;;  %4075 = vrcp.f32 %v5886_v37  ;;  %v6552_v60 = vld [vmem:[#allocation23_spill] sm:$0xff]  ;;  %v2392_v32 = vpop.f32.mrb[99].mxu1  ;;  %v6004_v45 = vpop.eup %4057 }
 0x30e   :  { %v5993_v34 = vmul.f32 %v3133_v48, %v3085_v27  ;;  %v2897_v24 = vsub.f32 %v2751_v59, %v6552_v60  ;;  %v2752_v63 = vmul.f32 %v3989_v28, %v5225_v42  ;;  %4077 = vrcp.f32 %v5892_v33  ;;  %v6553_v27 = vld [vmem:[#allocation25_spill] sm:$0xff]  ;;  %v6011_v23 = vpop.eup %4059  ;;  %v6047_v59 = vld [vmem:[#allocation12 + $0x10] sm:$0xff]  ;;  %v6056_v60 = vld [vmem:[#allocation12] sm:$0xff] }
 0x30f   :  { %v3134_v47 = vadd.f32 %v3110_v50, %v5662_v4  ;;  %v6000_v41 = vmul.f32 %v3136_v57, %v3088_v10  ;;  %v2895_v17 = vsub.f32 %v2749_v25, %v6553_v27  ;;  %v2750_v30 = vmul.f32 %v5228_v31, %v2392_v32  ;;  %v6554_v10 = vld [vmem:[#allocation24_spill] sm:$0xff]  ;;  %v6019_v51 = vpop.eup %4061  ;;  %v3996_v21 = vpop.f32.mrb[100].mxu1  ;;  %v6062_v27 = vld [vmem:[#allocation14] sm:$0xff] }
 0x310   :  { %v6015_v37 = vadd.f32 %v5654_v49, %v5897_v5  ;;  %4079 = vrcp.f32 %v5899_v39  ;;  %v2970_v42 = vmul.f32 2.0, %v2897_v24  ;;  %v2898_v3 = vsub.f32 %v2752_v63, %v6554_v10  ;;  %v6555_v5 = vld [vmem:[#allocation88_spill] sm:$0xff] }
 0x311   :  { %v6007_v2 = vmul.f32 %v3134_v47, %v3086_v26  ;;  %v6023_v33 = vadd.f32 %v5654_v49, %v5920_v12  ;;  %4081 = vrcp.f32 %v5936_v43  ;;  %v2968_v31 = vmul.f32 2.0, %v2895_v17  ;;  %v6027_v26 = vpop.eup %4063 }
 0x312   :  { %v2896_v0 = vsub.f32 %v2750_v30, %v5267_v55  ;;  %v6030_v48 = vmul.f32 2.0, %v6555_v5  ;;  %4083 = vrcp.f32 %v5941_v9  ;;  %v2995_v39 = vadd.f32 %v5662_v4, %v2970_v42  ;;  %v6034_v14 = vpop.eup %4065  ;;  %v6556_v9 = vld [vmem:[#allocation101_spill] sm:$0xff] }
 0x313   :  { %v2971_v58 = vmul.f32 2.0, %v2898_v3  ;;  %v6038_v12 = vadd.f32 %v5654_v49, %v5928_v19  ;;  %4085 = vrcp.f32 %v5946_v13  ;;  %v2993_v55 = vadd.f32 %v5662_v4, %v2968_v31  ;;  %v6042_v50 = vpop.eup %4067  ;;  %v2438_v19 = vpop.f32.mrb[101].mxu1  ;;  %v6052_v13 = vld [vmem:[#allocation14 + $0x10] sm:$0xff]  ;;  %v6066_v42 = vld [vmem:[#allocation12 + $0x18] sm:$0xff] }
 0x314   :  { %v2969_v43 = vmul.f32 2.0, %v2896_v0  ;;  %4087 = vrcp.f32 %v5951_v16  ;;  %v3019_v40 = vmul.f32 %v2995_v39, %v6556_v9  ;;  %v2755_v22 = vmul.f32 %v6047_v59, %v3996_v21  ;;  %v6050_v47 = vpop.eup %4069  ;;  %v3997_v24 = vpop.f32.mrb[102].mxu1  ;;  %v6072_v0 = vld [vmem:[#allocation14 + $0x18] sm:$0xff]  ;;  %v6083_v9 = vld [vmem:[#allocation14 + $0x8] sm:$0xff] }
 0x315   :  { %v2996_v57 = vadd.f32 %v5662_v4, %v2971_v58  ;;  %4089 = vrcp.f32 %v3159_v20  ;;  %v3017_v25 = vmul.f32 %v2993_v55, %v5671_v44  ;;  %v2753_v16 = vmul.f32 %v6056_v60, %v2438_v19  ;;  %v6059_v63 = vpop.eup %4071  ;;  %v6557_v20 = vld [vmem:[#allocation26_spill] sm:$0xff]  ;;  %v2441_v10 = vpop.f32.mrb[103].mxu1  ;;  %v6076_v58 = vld [vmem:[#allocation12 + $0x8] sm:$0xff] }
 0x316   :  { %v2994_v28 = vadd.f32 %v5662_v4, %v2969_v43  ;;  %v3187_v32 = vmul.f32 %v5976_v61, %v3019_v40  ;;  %v2901_v30 = vsub.f32 %v2755_v22, %v6557_v20  ;;  %v2756_v44 = vmul.f32 %v6066_v42, %v3997_v24  ;;  %v6069_v3 = vpop.eup %4073 }
 0x317   :  { %v3020_v17 = vmul.f32 %v2996_v57, %v5679_v52  ;;  %v3185_v31 = vmul.f32 %v5985_v54, %v3017_v25  ;;  %v2899_v61 = vsub.f32 %v2753_v16, %v5294_v18  ;;  %v2754_v52 = vmul.f32 %v6076_v58, %v2441_v10  ;;  %v6079_v55 = vpop.eup %4075 }
 0x318   :  { %v3018_v39 = vmul.f32 %v2994_v28, %v5693_v56  ;;  %v3236_v43 = vmul.f32 %v6052_v13, %v3187_v32  ;;  %v2974_v40 = vmul.f32 2.0, %v2901_v30  ;;  %v2902_v54 = vsub.f32 %v2756_v44, %v5305_v62  ;;  %v6086_v57 = vpop.eup %4077  ;;  %v4004_v30 = vpop.f32.mrb[104].mxu1 }
 0x319   :  { %v3188_v21 = vmul.f32 %v5990_v35, %v3020_v17  ;;  %v3234_v56 = vmul.f32 %v6062_v27, %v3185_v31  ;;  %v2972_v22 = vmul.f32 2.0, %v2899_v61  ;;  %v2900_v19 = vsub.f32 %v2754_v52, %v5315_v36  ;;  %v2487_v61 = vpop.f32.mrb[105].mxu1 }
 0x31a   :  { %v3186_v18 = vmul.f32 %v5997_v7, %v3018_v39  ;;  %v6091_v25 = vpop.eup %4079  ;;  %v3285_v28 = vsel %vm409_vm0, %v3236_v43, 0.0  ;;  %v2999_v16 = vadd.f32 %v5662_v4, %v2974_v40  ;;  %v2975_v24 = vmul.f32 2.0, %v2902_v54 }
 0x31b   :  { %v3237_v35 = vmul.f32 %v6072_v0, %v3188_v21  ;;  %v6096_v32 = vpop.eup %4081  ;;  %v3282_v62 = vsel %vm409_vm0, %v3234_v56, 0.0  ;;  %v2997_v7 = vadd.f32 %v5662_v4, %v2972_v22  ;;  %v2973_v20 = vmul.f32 2.0, %v2900_v19  ;;  %v4005_v56 = vpop.f32.mrb[106].mxu1 }
 0x31c   :  { %v3235_v17 = vmul.f32 %v6083_v9, %v3186_v18  ;;  %v6101_v36 = vpop.eup %4083  ;;  %v3023_v10 = vmul.f32 %v2999_v16, %v5702_v6  ;;  %v3000_v31 = vadd.f32 %v5662_v4, %v2975_v24  ;;  %v2759_v39 = vmul.f32 %v6047_v59, %v4004_v30  ;;  %v2490_v16 = vpop.f32.mrb[107].mxu1 }
 0x31d   :  { %v3287_v44 = vsel %vm409_vm0, %v3237_v35, 0.0  ;;  %v6107_v52 = vpop.eup %4085  ;;  %v3021_v21 = vmul.f32 %v2997_v7, %v5716_v38  ;;  %v2998_v40 = vadd.f32 %v5662_v4, %v2973_v20  ;;  %v2757_v54 = vmul.f32 %v6056_v60, %v2487_v61  ;;  %v6558_v7 = vld [vmem:[#allocation39_spill] sm:$0xff] }
 0x31e   :  { %v3283_v43 = vsel %vm409_vm0, %v3235_v17, 0.0  ;;  %v6113_v18 = vpop.eup %4087  ;;  %v3191_v6 = vmul.f32 %v6004_v45, %v3023_v10  ;;  %v3024_v19 = vmul.f32 %v3000_v31, %v5735_v46  ;;  %v2905_v35 = vsub.f32 %v2759_v39, %v5339_v15  ;;  %v6559_v39 = vld [vmem:[#allocation42_spill] sm:$0xff] }
 0x31f   :  { %v3284_v22 = vadd.f32 %v3283_v43, %v3282_v62  ;;  %v6118_v24 = vpop.eup %4089  ;;  %v3189_v17 = vmul.f32 %v6011_v23, %v3021_v21  ;;  %v3022_v38 = vmul.f32 %v2998_v40, %v5749_v53  ;;  %v2903_v20 = vsub.f32 %v2757_v54, %v6558_v7 }
 0x320   :  { %v2760_v30 = vmul.f32 %v6066_v42, %v4005_v56  ;;  %v3240_v62 = vmul.f32 %v6052_v13, %v3191_v6  ;;  %v3192_v45 = vmul.f32 %v6019_v51, %v3024_v19  ;;  %v2978_v10 = vmul.f32 2.0, %v2905_v35  ;;  %v4012_v56 = vpop.f32.mrb[108].mxu1  ;;  %v6560_v6 = vld [vmem:[#allocation30_spill] sm:$0xff] }
 0x321   :  { %v3286_v61 = vadd.f32 %v3285_v28, %v3284_v22  ;;  %v3238_v46 = vmul.f32 %v6062_v27, %v3189_v17  ;;  %v3190_v15 = vmul.f32 %v6027_v26, %v3022_v38  ;;  %v2976_v31 = vmul.f32 2.0, %v2903_v20  ;;  %v2536_v35 = vpop.f32.mrb[109].mxu1  ;;  %v6561_v17 = vld [vmem:[#allocation27_spill] sm:$0xff] }
 0x322   :  { %v2906_v43 = vsub.f32 %v2760_v30, %v6559_v39  ;;  %4091 = vrcp.f32 %v5993_v34  ;;  %v3293_v53 = vsel %vm409_vm0, %v3240_v62, 0.0  ;;  %v3003_v21 = vadd.f32 %v5662_v4, %v2978_v10  ;;  %v4013_v30 = vpop.f32.mrb[110].mxu1  ;;  %v6562_v10 = vld [vmem:[#allocation46_spill] sm:$0xff] }
 0x323   :  { %v3288_v23 = vadd.f32 %v3287_v44, %v3286_v61  ;;  %v3289_v28 = vsel %vm409_vm0, %v3238_v46, 0.0  ;;  %v3239_v40 = vmul.f32 %v6083_v9, %v3190_v15  ;;  %v3001_v51 = vadd.f32 %v5662_v4, %v2976_v31  ;;  %v2539_v15 = vpop.f32.mrb[111].mxu1  ;;  %v6563_v31 = vld [vmem:[#allocation28_spill] sm:$0xff] }
 0x324   :  { %v2979_v54 = vmul.f32 2.0, %v2906_v43  ;;  %v3241_v26 = vmul.f32 %v6072_v0, %v3192_v45  ;;  %v3027_v19 = vmul.f32 %v3003_v21, %v6560_v6  ;;  %v2758_v34 = vmul.f32 %v6076_v58, %v2490_v16  ;;  %v6564_v43 = vld [vmem:[#allocation51_spill] sm:$0xff] }
 0x325   :  { %v3290_v22 = vadd.f32 %v3289_v28, %v3288_v23  ;;  %v3291_v44 = vsel %vm409_vm0, %v3239_v40, 0.0  ;;  %v3025_v38 = vmul.f32 %v3001_v51, %v6561_v17  ;;  %v2763_v20 = vmul.f32 %v6047_v59, %v4012_v56 }
 0x326   :  { %v3004_v7 = vadd.f32 %v5662_v4, %v2979_v54  ;;  %v3195_v62 = vmul.f32 %v6034_v14, %v3027_v19  ;;  %v2904_v46 = vsub.f32 %v2758_v34, %v6562_v10  ;;  %v2761_v45 = vmul.f32 %v6056_v60, %v2536_v35  ;;  %v6565_v54 = vld [vmem:[#allocation54_spill] sm:$0xff]  ;;  %v6566_v19 = vld [vmem:[#allocation57_spill] sm:$0xff] }
 0x327   :  { %v3292_v61 = vadd.f32 %v3291_v44, %v3290_v22  ;;  %v3193_v16 = vmul.f32 %v6042_v50, %v3025_v38  ;;  %v2909_v23 = vsub.f32 %v2763_v20, %v6564_v43  ;;  %v2764_v21 = vmul.f32 %v6066_v42, %v4013_v30  ;;  %v6567_v30 = vld [vmem:[#allocation33_spill] sm:$0xff] }
 0x328   :  { %v3028_v39 = vmul.f32 %v3004_v7, %v6563_v31  ;;  %v3295_v28 = vsel %vm409_vm0, %v3241_v26, 0.0  ;;  %v2977_v51 = vmul.f32 2.0, %v2904_v46  ;;  %v2907_v56 = vsub.f32 %v2761_v45, %v6565_v54  ;;  %v4020_v7 = vpop.f32.mrb[112].mxu1 }
 0x329   :  { %v3294_v40 = vadd.f32 %v3293_v53, %v3292_v61  ;;  %v3242_v14 = vmul.f32 %v6062_v27, %v3193_v16  ;;  %v2982_v6 = vmul.f32 2.0, %v2909_v23  ;;  %v2910_v34 = vsub.f32 %v2764_v21, %v6566_v19  ;;  %v2585_v46 = vpop.f32.mrb[113].mxu1  ;;  %v6568_v16 = vld [vmem:[#allocation29_spill] sm:$0xff]  ;;  %v6569_v21 = vld [vmem:[#allocation32_spill] sm:$0xff] }
 0x32a   :  { %v3196_v22 = vmul.f32 %v6050_v47, %v3028_v39  ;;  %4093 = vrcp.f32 %v6000_v41  ;;  %v3002_v35 = vadd.f32 %v5662_v4, %v2977_v51  ;;  %v2980_v44 = vmul.f32 2.0, %v2907_v56  ;;  %v4021_v43 = vpop.f32.mrb[114].mxu1 }
 0x32b   :  { %v3296_v50 = vadd.f32 %v3295_v28, %v3294_v40  ;;  %v3244_v17 = vmul.f32 %v6052_v13, %v3195_v62  ;;  %v3297_v53 = vsel %vm409_vm0, %v3242_v14, 0.0  ;;  %v3007_v26 = vadd.f32 %v5662_v4, %v2982_v6  ;;  %v6570_v40 = vld [vmem:[#allocation61_spill] sm:$0xff]  ;;  %v2588_v56 = vpop.f32.mrb[115].mxu1  ;;  %v6571_v14 = vld [vmem:[#allocation34_spill] sm:$0xff] }
 0x32c   :  { %v2983_v38 = vmul.f32 2.0, %v2910_v34  ;;  %v6159_v20 = vpop.eup %4091  ;;  %v3026_v61 = vmul.f32 %v3002_v35, %v6567_v30  ;;  %v3005_v10 = vadd.f32 %v5662_v4, %v2980_v44  ;;  %v2762_v41 = vmul.f32 %v6076_v58, %v2539_v15  ;;  %v6572_v6 = vld [vmem:[#allocation66_spill] sm:$0xff] }
 0x32d   :  { %v3298_v47 = vadd.f32 %v3297_v53, %v3296_v50  ;;  %v3245_v45 = vmul.f32 %v6072_v0, %v3196_v22  ;;  %v3031_v62 = vmul.f32 %v3007_v26, %v6568_v16  ;;  %v2767_v39 = vmul.f32 %v6047_v59, %v4020_v7 }
 0x32e   :  { %v3008_v31 = vadd.f32 %v5662_v4, %v2983_v38  ;;  %v3194_v23 = vmul.f32 %v6059_v63, %v3026_v61  ;;  %v3029_v28 = vmul.f32 %v3005_v10, %v6569_v21  ;;  %v2908_v51 = vsub.f32 %v2762_v41, %v6570_v40  ;;  %v6575_v40 = vld [vmem:[#allocation31_spill] sm:$0xff] }
 0x32f   :  { %v2765_v54 = vmul.f32 %v6056_v60, %v2585_v46  ;;  %v3199_v15 = vmul.f32 %v6069_v3, %v3031_v62  ;;  %v2913_v19 = vsub.f32 %v2767_v39, %v6572_v6  ;;  %v2768_v34 = vmul.f32 %v6066_v42, %v4021_v43 }
 0x330   :  { %v3032_v22 = vmul.f32 %v3008_v31, %v6571_v14  ;;  %v3243_v50 = vmul.f32 %v6083_v9, %v3194_v23  ;;  %v3197_v35 = vmul.f32 %v6079_v55, %v3029_v28  ;;  %v2981_v63 = vmul.f32 2.0, %v2908_v51 }
 0x331   :  { %v2911_v44 = vsub.f32 %v2765_v54, %v6501_v8  ;;  %4095 = vrcp.f32 %v6007_v2  ;;  %v2986_v26 = vmul.f32 2.0, %v2913_v19  ;;  %v2914_v3 = vsub.f32 %v2768_v34, %v6512_v11  ;;  %v4028_v2 = vpop.f32.mrb[116].mxu1  ;;  %v6573_v11 = vld [vmem:[#allocation40_spill] sm:$0xff] }
 0x332   :  { %v3200_v53 = vmul.f32 %v6086_v57, %v3032_v22  ;;  %v3299_v38 = vsel %vm409_vm0, %v3243_v50, 0.0  ;;  %v3246_v7 = vmul.f32 %v6062_v27, %v3197_v35  ;;  %v3006_v30 = vadd.f32 %v5662_v4, %v2981_v63  ;;  %v2634_v39 = vpop.f32.mrb[117].mxu1  ;;  %v6576_v19 = vld [vmem:[#allocation76_spill] sm:$0xff] }
 0x333   :  { %v2984_v61 = vmul.f32 2.0, %v2911_v44  ;;  %v3301_v10 = vsel %vm409_vm0, %v3244_v17, 0.0  ;;  %v3303_v55 = vsel %vm409_vm0, %v3245_v45, 0.0  ;;  %v3300_v41 = vadd.f32 %v3299_v38, %v3298_v47  ;;  %v6574_v17 = vld [vmem:[#allocation95_spill] sm:$0xff]  ;;  %v4029_v45 = vpop.f32.mrb[118].mxu1  ;;  %v6577_v63 = vld [vmem:[#allocation36_spill] sm:$0xff] }
 0x334   :  { %v3011_v8 = vadd.f32 %v5662_v4, %v2986_v26  ;;  %v6188_v46 = vpop.eup %4093  ;;  %v3248_v57 = vmul.f32 %v6052_v13, %v3199_v15  ;;  %v3030_v16 = vmul.f32 %v3006_v30, %v6573_v11  ;;  %v2987_v31 = vmul.f32 2.0, %v2914_v3  ;;  %v2637_v14 = vpop.f32.mrb[119].mxu1 }
 0x335   :  { %v3009_v62 = vadd.f32 %v5662_v4, %v2984_v61  ;;  %v3302_v43 = vadd.f32 %v3301_v10, %v3300_v41  ;;  %v3305_v23 = vsel %vm409_vm0, %v3246_v7, 0.0  ;;  %v2766_v47 = vmul.f32 %v6076_v58, %v2588_v56  ;;  %v6578_v41 = vld [vmem:[#allocation92_spill] sm:$0xff] }
 0x336   :  { %v3035_v21 = vmul.f32 %v3011_v8, %v6574_v17  ;;  %v3198_v28 = vmul.f32 %v6091_v25, %v3030_v16  ;;  %v3012_v54 = vadd.f32 %v5662_v4, %v2987_v31  ;;  %v2771_v15 = vmul.f32 %v6047_v59, %v4028_v2 }
 0x337   :  { %v3033_v51 = vmul.f32 %v3009_v62, %v6575_v40  ;;  %v3304_v22 = vadd.f32 %v3303_v55, %v3302_v43  ;;  %v2912_v34 = vsub.f32 %v2766_v47, %v6576_v19  ;;  %v2769_v50 = vmul.f32 %v6056_v60, %v2634_v39 }
 0x338   :  { %v3203_v6 = vmul.f32 %v6096_v32, %v3035_v21  ;;  %v3247_v35 = vmul.f32 %v6083_v9, %v3198_v28  ;;  %v3036_v25 = vmul.f32 %v3012_v54, %v6577_v63  ;;  %v2917_v44 = vsub.f32 %v2771_v15, %v6527_v29 }
 0x339   :  { %v3201_v56 = vmul.f32 %v6101_v36, %v3033_v51  ;;  %v3306_v26 = vadd.f32 %v3305_v23, %v3304_v22  ;;  %v3249_v3 = vmul.f32 %v6072_v0, %v3200_v53  ;;  %v2985_v59 = vmul.f32 2.0, %v2912_v34 }
 0x33a   :  { %v2915_v38 = vsub.f32 %v2769_v50, %v6530_v1  ;;  %v3307_v32 = vsel %vm409_vm0, %v3247_v35, 0.0  ;;  %v3204_v60 = vmul.f32 %v6107_v52, %v3036_v25  ;;  %v2990_v30 = vmul.f32 2.0, %v2917_v44 }
 0x33b   :  { %v3250_v7 = vmul.f32 %v6062_v27, %v3201_v56  ;;  %v4096_v61 = vpop.eup %4095  ;;  %v3308_v10 = vadd.f32 %v3307_v32, %v3306_v26  ;;  %v3010_v36 = vadd.f32 %v5662_v4, %v2985_v59  ;;  %v2772_v29 = vmul.f32 %v6066_v42, %v4029_v45 }
 0x33c   :  { %v2988_v55 = vmul.f32 2.0, %v2915_v38  ;;  %v2940_v8 = vmul.f32 2.0, %v6578_v41  ;;  %v3309_v53 = vsel %vm409_vm0, %v3248_v57, 0.0  ;;  %v3015_v1 = vadd.f32 %v5662_v4, %v2990_v30 }
 0x33d   :  { %v2770_v2 = vmul.f32 %v6076_v58, %v2637_v14  ;;  %v3310_v11 = vadd.f32 %v3309_v53, %v3308_v10  ;;  %v3034_v16 = vmul.f32 %v3010_v36, %v6015_v37  ;;  %v2918_v62 = vsub.f32 %v2772_v29, %v6555_v5 }
 0x33e   :  { %v3013_v52 = vadd.f32 %v5662_v4, %v2988_v55  ;;  %v3311_v31 = vsel %vm409_vm0, %v3249_v3, 0.0  ;;  %v3313_v39 = vsel %vm409_vm0, %v3250_v7, 0.0  ;;  %v3039_v42 = vmul.f32 %v3015_v1, %v6023_v33 }
 0x33f   :  { %v2916_v43 = vsub.f32 %v2770_v2, %v6578_v41  ;;  %v3202_v57 = vmul.f32 %v6113_v18, %v3034_v16  ;;  %v2991_v58 = vmul.f32 2.0, %v2918_v62  ;;  %v3312_v17 = vadd.f32 %v3311_v31, %v3310_v11 }
 0x340   :  { %v3037_v23 = vmul.f32 %v3013_v52, %v6038_v12  ;;  %v2967_v37 = vadd.f32 %v5654_v49, %v6030_v48  ;;  %v3252_v21 = vmul.f32 %v6052_v13, %v3203_v6  ;;  %v3207_v47 = vmul.f32 %v6118_v24, %v3039_v42 }
 0x341   :  { %v2989_v5 = vmul.f32 2.0, %v2916_v43  ;;  %v3251_v45 = vmul.f32 %v6083_v9, %v3202_v57  ;;  %v3016_v28 = vadd.f32 %v5662_v4, %v2991_v58  ;;  %v3314_v40 = vadd.f32 %v3313_v39, %v3312_v17 }
 0x342   :  { %v3205_v33 = vmul.f32 %v6159_v20, %v3037_v23  ;;  %v2965_v18 = vadd.f32 %v5654_v49, %v2940_v8  ;;  %v3253_v54 = vmul.f32 %v6072_v0, %v3204_v60  ;;  %v3317_v20 = vsel %vm409_vm0, %v3252_v21, 0.0 }
 0x343   :  { %v3014_v12 = vadd.f32 %v5662_v4, %v2989_v5  ;;  %v3040_v51 = vmul.f32 %v3016_v28, %v2967_v37  ;;  %v3315_v15 = vsel %vm409_vm0, %v3251_v45, 0.0  ;;  %v3256_v35 = vmul.f32 %v6052_v13, %v3207_v47 }
 0x344   :  { %v3254_v48 = vmul.f32 %v6062_v27, %v3205_v33  ;;  %v3316_v24 = vadd.f32 %v3315_v15, %v3314_v40  ;;  %v3319_v34 = vsel %vm409_vm0, %v3253_v54, 0.0 }
 0x345   :  { %v3038_v14 = vmul.f32 %v3014_v12, %v2965_v18  ;;  %v3208_v22 = vmul.f32 %v6188_v46, %v3040_v51  ;;  %v3325_v46 = vsel %vm409_vm0, %v3256_v35, 0.0 }
 0x346   :  { %v3318_v19 = vadd.f32 %v3317_v20, %v3316_v24  ;;  %v3321_v49 = vsel %vm409_vm0, %v3254_v48, 0.0 }
 0x347   :  { %v3206_v6 = vmul.f32 %v4096_v61, %v3038_v14  ;;  %v3257_v63 = vmul.f32 %v6072_v0, %v3208_v22 }
 0x348   :  { %v3320_v50 = vadd.f32 %v3319_v34, %v3318_v19 }
 0x349   :  { %v3255_v4 = vmul.f32 %v6083_v9, %v3206_v6  ;;  %v3327_v26 = vsel %vm409_vm0, %v3257_v63, 0.0 }
 0x34a   :  { %v3322_v27 = vadd.f32 %v3321_v49, %v3320_v50 }
 0x34b   :  { %v3323_v56 = vsel %vm409_vm0, %v3255_v4, 0.0 }
 0x34c   :  { %v3324_v25 = vadd.f32 %v3323_v56, %v3322_v27 }
 0x34e   :  { %v3326_v44 = vadd.f32 %v3325_v46, %v3324_v25 }
 0x350   :  { %v3328_v3 = vadd.f32 %v3327_v26, %v3326_v44 }
 0x352   :  { %3329 = vadd.xlane.f32.xlu0 %v3328_v3 }
 0x3df   :  { %v3330_v59 = vpop.xlane.xlu0 %3329 }
 0x3e0   :  { %v3331_v38 = vrot.slane %v3330_v59, 4 }
 0x3e2   :  { %v3332_v32 = vadd.f32 %v3331_v38, %v3330_v59 }
 0x3e4   :  { %v3333_v9 = vrot.slane %v3332_v32, 2 }
 0x3e6   :  { %v3334_v7 = vadd.f32 %v3333_v9, %v3332_v32 }
 0x3e8   :  { %v3335_v60 = vrot.slane %v3334_v7, 1 }
 0x3ea   :  { %v3336_v13 = vadd.f32 %v3335_v60, %v3334_v7 }
 0x3ec   :  { %4030 = vpush %v3336_v13 }
 0x41d   :  { %s4031_s5 = spop %4030 }
 0x41e   :  { %v3338_v0 = vstv %s4031_s5 }
 0x41f   :  { %3339 = vst [vmem:[#allocation16] sm:$0xff] %v3338_v0 }
 0x420   :  { %4276 = shalt.err (!%p4273_p7)
}
 0x421   :  { %s4277_s16 = scalar_lea.hbm %s6269_s8, 128 }
 0x422   :  { %p4278_p8 = scmp.ne.s32.totalorder %s6269_s8, %s4277_s16  ;;  %p4281_p9 = scmp.lt.u32.totalorder %s4277_s16, %s6269_s8 }
 0x424   :  { %p4283_p10 = pnand %p4281_p9, %p4278_p8 }
 0x426   :  { %4286 = shalt.err (!%p4283_p10)
}
 0x427   :  { %3349 = dma.vmem_to_hbm [thread:$0]  %s3347_s18, 128, %s6269_s8, [#allocation4]  }
 0x428   :  { %4297 = dma.done.wait [#allocation4], 128  }
 0x429   :  { %4298 = vsyncadd [#allocation4], 4294967168 }
 0x42a   :  { %3353 = vsyncpa [#allocation3], 1 }
 0x42b   :  { %3354 = vsyncpa [#allocation7], 1 }
 0x42c   :  { %3355 = vsyncpa [#allocation10], 1 }
 0x42d   :  { %3356 = vsyncpa [#allocation13], 1 }
 0x42e   :  { %3357 = vsyncpa [#allocation4], 1 }
 0x42f   :  { %3358 = vsyncpa [#allocation5], 1 }

</bundles_post_ra>
